<compile_context>
chip_gen: v7x
topology: tpu7x:2x2x1
jax: 0.10.0
libtpu: 0.0.40
codegen_flags: <defaults>
</compile_context>

<pallas_src>
import math
import functools

import jax
import jax.numpy as jnp
from jax.experimental import pallas as pl
from jax.experimental.pallas import tpu as pltpu

WIN_SIZE = 11
WIN_SIGMA = 1.5
K1 = 0.01
K2 = 0.03
DATA_RANGE = 1.0
C1 = float((K1 * DATA_RANGE) ** 2)
C2 = float((K2 * DATA_RANGE) ** 2)
LANES = 128

# 1-D Gaussian taps as compile-time Python constants
# (matches pytorch_msssim._fspecial_gauss_1d).
_coords = [i - WIN_SIZE // 2 for i in range(WIN_SIZE)]
_graw = [math.exp(-(c * c) / (2.0 * WIN_SIGMA ** 2)) for c in _coords]
_gsum = sum(_graw)
GAUSS = tuple(v / _gsum for v in _graw)


def _w_filter_matrix(W):
    """(W, WO) matrix so that (img @ fw)[:, j] = sum_k g[k] * img[:, j + k]
    (valid 11-tap Gaussian filtering along the last axis)."""
    WO = W - WIN_SIZE + 1
    g = jnp.asarray(GAUSS, dtype=jnp.float32)
    cols = jnp.arange(WO)[None, :]
    taps = jnp.arange(WIN_SIZE)[:, None]
    fw = jnp.zeros((W, WO), jnp.float32).at[cols + taps, cols].set(
        jnp.broadcast_to(g[:, None], (WIN_SIZE, WO)))
    return fw


def _ssim_block_kernel(x_ref, y_ref, fw_ref, out_ref, t_ref, *,
                       B, H, W, HO, WO, n_valid, padded):
    x = x_ref[...].astype(jnp.float32)   # (B, H, W)
    y = y_ref[...].astype(jnp.float32)   # (B, H, W)

    # Five quantities to be Gaussian-filtered, fused into one big matmul.
    xx = x * x
    yy = y * y
    xy = x * y
    s3 = jnp.concatenate([x, y, xx, yy, xy], axis=0)          # (5B, H, W)
    s2 = s3.reshape(5 * B * H, W)                             # (5BH, W)

    # W-direction filter: single MXU matmul for all 5 quantities x B images.
    t = jnp.dot(s2, fw_ref[...], preferred_element_type=jnp.float32)  # (5BH, WO)
    t_ref[...] = t.reshape(5 * B, H, WO)

    # H-direction filter: 11-tap band structure as shifted multiply-adds (VPU),
    # reading shifted windows straight from the VMEM scratch.
    acc = GAUSS[0] * t_ref[:, 0:HO, :]
    for k in range(1, WIN_SIZE):
        acc = acc + GAUSS[k] * t_ref[:, k:k + HO, :]          # (5B, HO, WO)

    mu1 = acc[0 * B:1 * B]
    mu2 = acc[1 * B:2 * B]
    ex2 = acc[2 * B:3 * B]
    ey2 = acc[3 * B:4 * B]
    exy = acc[4 * B:5 * B]

    mu1_sq = mu1 * mu1
    mu2_sq = mu2 * mu2
    mu1_mu2 = mu1 * mu2
    sigma1_sq = ex2 - mu1_sq
    sigma2_sq = ey2 - mu2_sq
    sigma12 = exy - mu1_mu2

    num = (2.0 * mu1_mu2 + C1) * (2.0 * sigma12 + C2)
    den = (mu1_sq + mu2_sq + C1) * (sigma1_sq + sigma2_sq + C2)
    ssim_map = num * pl.reciprocal(den, approx=True)          # (B, HO, WO)

    if padded:
        # Zero out the contribution of batch-padding images.
        img_idx = (jax.lax.broadcasted_iota(jnp.int32, (B, HO, WO), 0)
                   + pl.program_id(0) * B)
        ssim_map = jnp.where(img_idx < n_valid, ssim_map, 0.0)

    block_sum = jnp.sum(ssim_map)
    # Lane-dense (1, 128) store; lane 0 is consumed outside.
    out_ref[...] = jnp.zeros((1, LANES), jnp.float32) + block_sum


def _pick_block_images(H, W, HO, WO, nc):
    """Images per grid step: as many as fit a ~32 MiB working-set budget."""
    # Rough per-image f32 footprint: x/y (double-buffered) + fused concat +
    # matmul result / scratch + SSIM-map temporaries.
    per_img_f32 = 4 * H * W + 6 * H * W + 10 * H * WO + 10 * HO * WO
    per_img_bytes = 4 * per_img_f32
    budget = 32 * 1024 * 1024
    b = max(1, budget // max(per_img_bytes, 1))
    return int(max(1, min(b, 32, nc)))


def ssim_loss(sr, hr):
    """sr, hr: (N, C, H, W) arrays in [0, 1]. Returns scalar 1 - SSIM."""
    N, C, H, W = sr.shape
    assert H >= WIN_SIZE and W >= WIN_SIZE, "spatial dims must be >= 11"
    HO = H - WIN_SIZE + 1
    WO = W - WIN_SIZE + 1
    NC = N * C

    x = sr.reshape(NC, H, W).astype(jnp.float32)
    y = hr.reshape(NC, H, W).astype(jnp.float32)

    B = _pick_block_images(H, W, HO, WO, NC)
    G = -(-NC // B)                      # ceil(NC / B)
    NC_pad = G * B
    padded = NC_pad != NC
    if padded:
        x = jnp.pad(x, ((0, NC_pad - NC), (0, 0), (0, 0)))
        y = jnp.pad(y, ((0, NC_pad - NC), (0, 0), (0, 0)))

    fw = _w_filter_matrix(W)

    try:
        cap = pltpu.get_tpu_info().vmem_capacity_bytes
        vmem_limit = min(100 * 1024 * 1024, int(cap * 0.7))
    except Exception:
        vmem_limit = 64 * 1024 * 1024

    kernel = functools.partial(_ssim_block_kernel, B=B, H=H, W=W, HO=HO, WO=WO,
                               n_valid=NC, padded=padded)

    block_sums = pl.pallas_call(
        kernel,
        out_shape=jax.ShapeDtypeStruct((G, LANES), jnp.float32),
        grid_spec=pltpu.PrefetchScalarGridSpec(
            num_scalar_prefetch=0,
            grid=(G,),
            in_specs=[
                pl.BlockSpec((B, H, W), lambda g: (g, 0, 0)),
                pl.BlockSpec((B, H, W), lambda g: (g, 0, 0)),
                pl.BlockSpec((W, WO), lambda g: (0, 0)),
            ],
            out_specs=pl.BlockSpec((1, LANES), lambda g: (g, 0)),
            scratch_shapes=[pltpu.VMEM((5 * B, H, WO), jnp.float32)],
        ),
        compiler_params=pltpu.CompilerParams(
            dimension_semantics=("parallel",),
            vmem_limit_bytes=vmem_limit,
        ),
    )(x, y, fw)

    mean_ssim = jnp.sum(block_sums[:, 0]) / jnp.float32(NC * HO * WO)
    return 1.0 - mean_ssim


if __name__ == "__main__":
    key = jax.random.PRNGKey(0)
    k1, k2 = jax.random.split(key)
    N, C, H, W = 2, 4, 16, 16
    sr = jax.random.uniform(k1, (N, C, H, W), dtype=jnp.float32)
    hr = jax.random.uniform(k2, (N, C, H, W), dtype=jnp.float32)

    loss = jax.jit(ssim_loss)(sr, hr)
    jax.block_until_ready(loss)
    print("KERNEL_OK")
</pallas_src>

<mosaic_0001>
module attributes {stable_mosaic.version = 11 : i64} {
  func.func @_ssim_block_kernel(%arg0: i32, %arg1: memref<8x16x16xf32, #tpu.memory_space<vmem>>, %arg2: memref<8x16x16xf32, #tpu.memory_space<vmem>>, %arg3: memref<16x6xf32, #tpu.memory_space<vmem>>, %arg4: memref<1x128xf32, #tpu.memory_space<vmem>>, %arg5: memref<40x16x6xf32, #tpu.memory_space<vmem>>) attributes {dimension_semantics = [#tpu.dimension_semantics<parallel>], iteration_bounds = array<i64: 1>, scalar_prefetch = 0 : i64, scratch_operands = 1 : i64, tpu.core_type = #tpu.core_type<tc>, window_params = [{transform_indices = @transform_0, window_bounds = array<i64: 8, 16, 16>}, {transform_indices = @transform_1, window_bounds = array<i64: 8, 16, 16>}, {pipeline_mode = #tpu.pipeline_mode<synchronous>, transform_indices = @transform_2, window_bounds = array<i64: 16, 6>}, {transform_indices = @transform_3, window_bounds = array<i64: 1, 128>}]} {
    %c0 = arith.constant 0 : index
    %c0_0 = arith.constant 0 : index
    %c0_1 = arith.constant 0 : index
    %0 = vector.load %arg1[%c0, %c0_0, %c0_1] : memref<8x16x16xf32, #tpu.memory_space<vmem>>, vector<8x16x16xf32>
    %c0_2 = arith.constant 0 : index
    %c0_3 = arith.constant 0 : index
    %c0_4 = arith.constant 0 : index
    %1 = vector.load %arg2[%c0_2, %c0_3, %c0_4] : memref<8x16x16xf32, #tpu.memory_space<vmem>>, vector<8x16x16xf32>
    %2 = arith.mulf %0, %0 : vector<8x16x16xf32>
    %3 = arith.mulf %1, %1 : vector<8x16x16xf32>
    %4 = arith.mulf %0, %1 : vector<8x16x16xf32>
    %5 = tpu.concatenate %0, %1, %2, %3, %4 in 0 : vector<8x16x16xf32>, vector<8x16x16xf32>, vector<8x16x16xf32>, vector<8x16x16xf32>, vector<8x16x16xf32> -> vector<40x16x16xf32>
    %6 = vector.shape_cast %5 : vector<40x16x16xf32> to vector<640x16xf32>
    %c0_5 = arith.constant 0 : index
    %c0_6 = arith.constant 0 : index
    %7 = vector.load %arg3[%c0_5, %c0_6] : memref<16x6xf32, #tpu.memory_space<vmem>>, vector<16x6xf32>
    %cst = arith.constant dense<0.000000e+00> : vector<640x6xf32>
    %8 = tpu.matmul %6, %7, %cst {dimension_numbers = #tpu.dot_dimension_numbers<[1], [0], [0], [1], [0, 0, 1, 1], [], []>} : vector<640x16xf32>, vector<16x6xf32>, vector<640x6xf32> -> vector<640x6xf32>
    %9 = vector.shape_cast %8 : vector<640x6xf32> to vector<40x16x6xf32>
    %c0_7 = arith.constant 0 : index
    %c0_8 = arith.constant 0 : index
    %c0_9 = arith.constant 0 : index
    %10 = vector.load %arg5[%c0_7, %c0_8, %c0_9] : memref<40x16x6xf32, #tpu.memory_space<vmem>>, vector<40x16x6xf32>
    tpu.vector_store %arg5[%c0_7, %c0_8, %c0_9], %9 {strides = array<i32>} : memref<40x16x6xf32, #tpu.memory_space<vmem>>, vector<40x16x6xf32>,
    %c0_10 = arith.constant 0 : index
    %c0_11 = arith.constant 0 : index
    %c0_12 = arith.constant 0 : index
    %11 = vector.load %arg5[%c0_10, %c0_11, %c0_12] : memref<40x16x6xf32, #tpu.memory_space<vmem>>, vector<40x6x6xf32>
    %cst_13 = arith.constant 0.00102838012 : f32
    %12 = vector.broadcast %cst_13 : f32 to vector<40x6x6xf32>
    %13 = arith.mulf %12, %11 : vector<40x6x6xf32>
    %c0_14 = arith.constant 0 : index
    %c1 = arith.constant 1 : index
    %c0_15 = arith.constant 0 : index
    %14 = vector.load %arg5[%c0_14, %c1, %c0_15] : memref<40x16x6xf32, #tpu.memory_space<vmem>>, vector<40x6x6xf32>
    %cst_16 = arith.constant 0.00759875821 : f32
    %15 = vector.broadcast %cst_16 : f32 to vector<40x6x6xf32>
    %16 = arith.mulf %15, %14 : vector<40x6x6xf32>
    %17 = arith.addf %13, %16 : vector<40x6x6xf32>
    %c0_17 = arith.constant 0 : index
    %c2 = arith.constant 2 : index
    %c0_18 = arith.constant 0 : index
    %18 = vector.load %arg5[%c0_17, %c2, %c0_18] : memref<40x16x6xf32, #tpu.memory_space<vmem>>, vector<40x6x6xf32>
    %cst_19 = arith.constant 0.0360007733 : f32
    %19 = vector.broadcast %cst_19 : f32 to vector<40x6x6xf32>
    %20 = arith.mulf %19, %18 : vector<40x6x6xf32>
    %21 = arith.addf %17, %20 : vector<40x6x6xf32>
    %c0_20 = arith.constant 0 : index
    %c3 = arith.constant 3 : index
    %c0_21 = arith.constant 0 : index
    %22 = vector.load %arg5[%c0_20, %c3, %c0_21] : memref<40x16x6xf32, #tpu.memory_space<vmem>>, vector<40x6x6xf32>
    %cst_22 = arith.constant 0.109360687 : f32
    %23 = vector.broadcast %cst_22 : f32 to vector<40x6x6xf32>
    %24 = arith.mulf %23, %22 : vector<40x6x6xf32>
    %25 = arith.addf %21, %24 : vector<40x6x6xf32>
    %c0_23 = arith.constant 0 : index
    %c4 = arith.constant 4 : index
    %c0_24 = arith.constant 0 : index
    %26 = vector.load %arg5[%c0_23, %c4, %c0_24] : memref<40x16x6xf32, #tpu.memory_space<vmem>>, vector<40x6x6xf32>
    %cst_25 = arith.constant 0.213005543 : f32
    %27 = vector.broadcast %cst_25 : f32 to vector<40x6x6xf32>
    %28 = arith.mulf %27, %26 : vector<40x6x6xf32>
    %29 = arith.addf %25, %28 : vector<40x6x6xf32>
    %c0_26 = arith.constant 0 : index
    %c5 = arith.constant 5 : index
    %c0_27 = arith.constant 0 : index
    %30 = vector.load %arg5[%c0_26, %c5, %c0_27] : memref<40x16x6xf32, #tpu.memory_space<vmem>>, vector<40x6x6xf32>
    %cst_28 = arith.constant 0.266011715 : f32
    %31 = vector.broadcast %cst_28 : f32 to vector<40x6x6xf32>
    %32 = arith.mulf %31, %30 : vector<40x6x6xf32>
    %33 = arith.addf %29, %32 : vector<40x6x6xf32>
    %c0_29 = arith.constant 0 : index
    %c6 = arith.constant 6 : index
    %c0_30 = arith.constant 0 : index
    %34 = vector.load %arg5[%c0_29, %c6, %c0_30] : memref<40x16x6xf32, #tpu.memory_space<vmem>>, vector<40x6x6xf32>
    %cst_31 = arith.constant 0.213005543 : f32
    %35 = vector.broadcast %cst_31 : f32 to vector<40x6x6xf32>
    %36 = arith.mulf %35, %34 : vector<40x6x6xf32>
    %37 = arith.addf %33, %36 : vector<40x6x6xf32>
    %c0_32 = arith.constant 0 : index
    %c7 = arith.constant 7 : index
    %c0_33 = arith.constant 0 : index
    %38 = vector.load %arg5[%c0_32, %c7, %c0_33] : memref<40x16x6xf32, #tpu.memory_space<vmem>>, vector<40x6x6xf32>
    %cst_34 = arith.constant 0.109360687 : f32
    %39 = vector.broadcast %cst_34 : f32 to vector<40x6x6xf32>
    %40 = arith.mulf %39, %38 : vector<40x6x6xf32>
    %41 = arith.addf %37, %40 : vector<40x6x6xf32>
    %c0_35 = arith.constant 0 : index
    %c8 = arith.constant 8 : index
    %c0_36 = arith.constant 0 : index
    %42 = vector.load %arg5[%c0_35, %c8, %c0_36] : memref<40x16x6xf32, #tpu.memory_space<vmem>>, vector<40x6x6xf32>
    %cst_37 = arith.constant 0.0360007733 : f32
    %43 = vector.broadcast %cst_37 : f32 to vector<40x6x6xf32>
    %44 = arith.mulf %43, %42 : vector<40x6x6xf32>
    %45 = arith.addf %41, %44 : vector<40x6x6xf32>
    %c0_38 = arith.constant 0 : index
    %c9 = arith.constant 9 : index
    %c0_39 = arith.constant 0 : index
    %46 = vector.load %arg5[%c0_38, %c9, %c0_39] : memref<40x16x6xf32, #tpu.memory_space<vmem>>, vector<40x6x6xf32>
    %cst_40 = arith.constant 0.00759875821 : f32
    %47 = vector.broadcast %cst_40 : f32 to vector<40x6x6xf32>
    %48 = arith.mulf %47, %46 : vector<40x6x6xf32>
    %49 = arith.addf %45, %48 : vector<40x6x6xf32>
    %c0_41 = arith.constant 0 : index
    %c10 = arith.constant 10 : index
    %c0_42 = arith.constant 0 : index
    %50 = vector.load %arg5[%c0_41, %c10, %c0_42] : memref<40x16x6xf32, #tpu.memory_space<vmem>>, vector<40x6x6xf32>
    %cst_43 = arith.constant 0.00102838012 : f32
    %51 = vector.broadcast %cst_43 : f32 to vector<40x6x6xf32>
    %52 = arith.mulf %51, %50 : vector<40x6x6xf32>
    %53 = arith.addf %49, %52 : vector<40x6x6xf32>
    %54 = vector.extract_strided_slice %53 {offsets = [0, 0, 0], sizes = [8, 6, 6], strides = [1, 1, 1]} : vector<40x6x6xf32> to vector<8x6x6xf32>
    %55 = vector.extract_strided_slice %53 {offsets = [8, 0, 0], sizes = [8, 6, 6], strides = [1, 1, 1]} : vector<40x6x6xf32> to vector<8x6x6xf32>
    %56 = vector.extract_strided_slice %53 {offsets = [16, 0, 0], sizes = [8, 6, 6], strides = [1, 1, 1]} : vector<40x6x6xf32> to vector<8x6x6xf32>
    %57 = vector.extract_strided_slice %53 {offsets = [24, 0, 0], sizes = [8, 6, 6], strides = [1, 1, 1]} : vector<40x6x6xf32> to vector<8x6x6xf32>
    %58 = vector.extract_strided_slice %53 {offsets = [32, 0, 0], sizes = [8, 6, 6], strides = [1, 1, 1]} : vector<40x6x6xf32> to vector<8x6x6xf32>
    %59 = arith.mulf %54, %54 : vector<8x6x6xf32>
    %60 = arith.mulf %55, %55 : vector<8x6x6xf32>
    %61 = arith.mulf %54, %55 : vector<8x6x6xf32>
    %62 = arith.subf %56, %59 : vector<8x6x6xf32>
    %63 = arith.subf %57, %60 : vector<8x6x6xf32>
    %64 = arith.subf %58, %61 : vector<8x6x6xf32>
    %cst_44 = arith.constant 2.000000e+00 : f32
    %65 = vector.broadcast %cst_44 : f32 to vector<8x6x6xf32>
    %66 = arith.mulf %65, %61 : vector<8x6x6xf32>
    %cst_45 = arith.constant 9.99999974E-5 : f32
    %67 = vector.broadcast %cst_45 : f32 to vector<8x6x6xf32>
    %68 = arith.addf %66, %67 : vector<8x6x6xf32>
    %cst_46 = arith.constant 2.000000e+00 : f32
    %69 = vector.broadcast %cst_46 : f32 to vector<8x6x6xf32>
    %70 = arith.mulf %69, %64 : vector<8x6x6xf32>
    %cst_47 = arith.constant 8.99999984E-4 : f32
    %71 = vector.broadcast %cst_47 : f32 to vector<8x6x6xf32>
    %72 = arith.addf %70, %71 : vector<8x6x6xf32>
    %73 = arith.mulf %68, %72 : vector<8x6x6xf32>
    %74 = arith.addf %59, %60 : vector<8x6x6xf32>
    %cst_48 = arith.constant 9.99999974E-5 : f32
    %75 = vector.broadcast %cst_48 : f32 to vector<8x6x6xf32>
    %76 = arith.addf %74, %75 : vector<8x6x6xf32>
    %77 = arith.addf %62, %63 : vector<8x6x6xf32>
    %cst_49 = arith.constant 8.99999984E-4 : f32
    %78 = vector.broadcast %cst_49 : f32 to vector<8x6x6xf32>
    %79 = arith.addf %77, %78 : vector<8x6x6xf32>
    %80 = arith.mulf %76, %79 : vector<8x6x6xf32>
    %81 = tpu.reciprocal %80 {approx = true} : vector<8x6x6xf32> -> vector<8x6x6xf32>
    %82 = arith.mulf %73, %81 : vector<8x6x6xf32>
    %83 = vector.shape_cast %82 : vector<8x6x6xf32> to vector<1x8x6x6xf32>
    %cst_50 = arith.constant dense<0.000000e+00> : vector<1xf32>
    %84 = vector.multi_reduction <add>, %83, %cst_50 [1, 2, 3] : vector<1x8x6x6xf32> to vector<1xf32>
    %85 = vector.shape_cast %84 : vector<1xf32> to vector<1x1x1x1xf32>
    %86 = vector.extract %85[0, 0, 0, 0] : f32 from vector<1x1x1x1xf32>
    %cst_51 = arith.constant 0.000000e+00 : f32
    %87 = vector.broadcast %cst_51 : f32 to vector<1x128xf32>
    %88 = vector.broadcast %86 : f32 to vector<1x128xf32>
    %89 = arith.addf %87, %88 : vector<1x128xf32>
    %c0_52 = arith.constant 0 : index
    %c0_53 = arith.constant 0 : index
    %90 = vector.load %arg4[%c0_52, %c0_53] : memref<1x128xf32, #tpu.memory_space<vmem>>, vector<1x128xf32>
    tpu.vector_store %arg4[%c0_52, %c0_53], %89 {strides = array<i32>} : memref<1x128xf32, #tpu.memory_space<vmem>>, vector<1x128xf32>,
    return
  }
  func.func @transform_0(%arg0: i32) -> (i32, i32, i32) {
    %c0_i32 = arith.constant 0 : i32
    %c0_i32_0 = arith.constant 0 : i32
    %c0_i32_1 = arith.constant 0 : i32
    return %arg0, %c0_i32, %c0_i32_0 : i32, i32, i32
  }
  func.func @transform_1(%arg0: i32) -> (i32, i32, i32) {
    %c0_i32 = arith.constant 0 : i32
    %c0_i32_0 = arith.constant 0 : i32
    %c0_i32_1 = arith.constant 0 : i32
    return %arg0, %c0_i32, %c0_i32_0 : i32, i32, i32
  }
  func.func @transform_2(%arg0: i32) -> (i32, i32) {
    %c0_i32 = arith.constant 0 : i32
    %c0_i32_0 = arith.constant 0 : i32
    %c0_i32_1 = arith.constant 0 : i32
    return %c0_i32, %c0_i32_0 : i32, i32
  }
  func.func @transform_3(%arg0: i32) -> (i32, i32) {
    %c0_i32 = arith.constant 0 : i32
    %c0_i32_0 = arith.constant 0 : i32
    return %arg0, %c0_i32 : i32, i32
  }
}

</mosaic_0001>

<bundles_post_ra>
// kernel: ssim_loss.1
= control target key start
LH: loop header
LB: loop body
LE: loop exit
PB: predicated region body
PF: predicated region fallthrough
CT: control target
= control target key end

     0   :  { %8 = vsyncpa [#allocation4], 0  ;;  %s4573_s0 = inlined_call_operand.hbm [shape: f32[8,16,16], index: 0, kind: input, shape index: {}]   ;;  %s4574_s1 = inlined_call_operand.hbm [shape: f32[8,16,16], index: 1, kind: input, shape index: {}]   ;;  %s4575_s2 = inlined_call_operand.hbm [shape: f32[16,6], index: 2, kind: input, shape index: {}]   ;;  %s4576_s3 = inlined_call_operand.hbm [shape: f32[1,128], index: 3, kind: output, shape index: {}]  }
   0x1   :  { %9 = vsyncpa [#allocation7], 0 }
   0x2   :  { %10 = vsyncpa [#allocation5], 0  ;;  %s2803_s12 = smov [#allocation6]   ;;  %s2804_s14 = smov [#allocation3]  }
   0x3   :  { %s28_s13 = sshll.u32 %s2803_s12, 4  ;;  %s16_s15 = sshll.u32 %s2804_s14, 4  ;;  %s29_s13 = int_to_ptr.vmem [resolvable:$true] %s28_s13  ;;  %s2829_s15 = int_to_ptr.vmem [resolvable:$true] %s16_s15 }
   0x4   :  { %s2709_s18 = scalar_lea.hbm %s4574_s1, 2048 }
   0x5   :  { %p2710_p0 = scmp.ne.s32.totalorder %s4574_s1, %s2709_s18  ;;  %p2713_p1 = scmp.lt.u32.totalorder %s2709_s18, %s4574_s1 }
   0x7   :  { %p2715_p2 = pnand %p2713_p1, %p2710_p0 }
   0x9   :  { %2718 = shalt.err (!%p2715_p2)
}
   0xa   :  { %s2719_s23 = scalar_lea.vmem %s29_s13, 2048  ;;  %p2724_p4 = scmp.lt.s32.totalorder %s29_s13, %s29_s13 }
   0xb   :  { %p2720_p3 = scmp.ne.s32.totalorder %s29_s13, %s2719_s23  ;;  %p2725_p5 = scmp.lt.s32.totalorder %s2719_s23, %s2719_s23 }
   0xd   :  { %p2726_p6 = por %p2725_p5, %p2724_p4 }
   0xf   :  { %p2727_p7 = pnand %p2726_p6, %p2720_p3 }
  0x11   :  { %2730 = shalt.err (!%p2727_p7)
}
  0x12   :  { %s2805_s24 = smov 128   ;;  %s2806_s25 = smov 8  }
  0x13   :  { %34 = dma.hbm_to_vmem [thread:$0]  %s4574_s1, 2048, %s29_s13, [#allocation7], %s2805_s24, %s2805_s24, %s2806_s25  }
  0x14   :  { %s2731_s30 = scalar_lea.hbm %s4573_s0, 2048 }
  0x15   :  { %p2732_p8 = scmp.ne.s32.totalorder %s4573_s0, %s2731_s30  ;;  %p2735_p9 = scmp.lt.u32.totalorder %s2731_s30, %s4573_s0 }
  0x17   :  { %p2737_p10 = pnand %p2735_p9, %p2732_p8 }
  0x19   :  { %2740 = shalt.err (!%p2737_p10)
}
  0x1a   :  { %s2741_s8 = scalar_lea.vmem %s2829_s15, 2048  ;;  %p2746_p12 = scmp.lt.s32.totalorder %s2829_s15, %s2829_s15 }
  0x1b   :  { %p2742_p11 = scmp.ne.s32.totalorder %s2829_s15, %s2741_s8  ;;  %p2747_p13 = scmp.lt.s32.totalorder %s2741_s8, %s2741_s8 }
  0x1d   :  { %p2748_p0 = por %p2747_p13, %p2746_p12 }
  0x1f   :  { %p2749_p1 = pnand %p2748_p0, %p2742_p11 }
  0x21   :  { %2752 = shalt.err (!%p2749_p1)
}
  0x22   :  { %22 = dma.hbm_to_vmem [thread:$0]  %s4573_s0, 2048, %s2829_s15, [#allocation4], %s2805_s24, %s2805_s24, %s2806_s25  }
  0x23   :  { %s2807_s10 = smov [#allocation8]   ;;  %s2753_s14 = scalar_lea.hbm %s4575_s2, 256 }
  0x24   :  { %s40_s11 = sshll.u32 %s2807_s10, 4  ;;  %p2754_p2 = scmp.ne.s32.totalorder %s4575_s2, %s2753_s14  ;;  %s41_s11 = int_to_ptr.vmem [resolvable:$true] %s40_s11 }
  0x25   :  { %p2757_p3 = scmp.lt.u32.totalorder %s2753_s14, %s4575_s2 }
  0x27   :  { %p2759_p4 = pnand %p2757_p3, %p2754_p2 }
  0x29   :  { %2762 = shalt.err (!%p2759_p4)
}
  0x2a   :  { %s2763_s20 = scalar_lea.vmem %s41_s11, 256  ;;  %p2768_p6 = scmp.lt.s32.totalorder %s41_s11, %s41_s11 }
  0x2b   :  { %p2764_p5 = scmp.ne.s32.totalorder %s41_s11, %s2763_s20  ;;  %p2769_p7 = scmp.lt.s32.totalorder %s2763_s20, %s2763_s20 }
  0x2d   :  { %p2770_p8 = por %p2769_p7, %p2768_p6 }
  0x2f   :  { %p2771_p9 = pnand %p2770_p8, %p2764_p5 }
  0x31   :  { %2774 = shalt.err (!%p2771_p9)
}
  0x32   :  { %46 = dma.hbm_to_vmem [thread:$0]  %s4575_s2, 256, %s41_s11, [#allocation7], %s2805_s24, %s2805_s24, %s2806_s25  }
  0x33   :  { %2797 = dma.done.wait [#allocation4], 2048  }
  0x34   :  { %2798 = vsyncadd [#allocation4], 4294965248 }
  0x35   :  { %2799 = dma.done.wait [#allocation7], 2304  }
  0x36   :  { %2800 = vsyncadd [#allocation7], 4294964992  ;;  %vm138_vm0 = vcmask 130048   ;;  %v136_v0 = vld [vmem:[#allocation8] sm:$0xff]  ;;  %v137_v1 = vld [vmem:[#allocation8 + $0x8] sm:$0xff]  ;;  %vm844_vm1 = vcmask 48128  }
  0x37   :  { %v2881_v2 = vld [vmem:[#allocation3] sm:$0xff]  ;;  %v2679_v3 = vpack.c.bf16 %v137_v1, %v136_v0  ;;  %v2889_v6 = vld [vmem:[#allocation3 + $0x48] sm:$0xff]  ;;  %v2893_v8 = vld [vmem:[#allocation3 + $0x50] sm:$0xff]  ;;  %vm2349_vm2 = vcmask 46080   ;;  %s2808_s2 = smov [#allocation9]  }
  0x38   :  { %2559 = vmatprep.mubr.msk.f32.mxu0 %vm138_vm0, %v2881_v2  ;;  %v2885_v4 = vld [vmem:[#allocation3 + $0x40] sm:$0xff]  ;;  %v97_v7 = vmul.f32 %v2889_v6, %v2889_v6  ;;  %v2895_v9 = vld [vmem:[#allocation3 + $0x8] sm:$0xff]  ;;  %v98_v10 = vmul.f32 %v2893_v8, %v2893_v8  ;;  %v2899_v11 = vld [vmem:[#allocation3 + $0x58] sm:$0xff]  ;;  %s2383_s21 = sshll.u32 %s2808_s2, 4  ;;  %s2384_s21 = int_to_ptr.vmem [resolvable:$true] %s2383_s21 }
  0x39   :  { %v96_v5 = vmul.f32 %v2885_v4, %v2885_v4  ;;  %2680 = vmatprep.subr.bf16.mxu0 %v2679_v3  ;;  %2683 = vmatprep.subr.bf16.mxu1 %v2679_v3  ;;  %v2902_v12 = vld [vmem:[#allocation3 + $0x10] sm:$0xff]  ;;  %v2904_v13 = vld [vmem:[#allocation3 + $0x60] sm:$0xff]  ;;  %v99_v14 = vmul.f32 %v2899_v11, %v2899_v11  ;;  %v2914_v15 = vld [vmem:[#allocation3 + $0x18] sm:$0xff]  ;;  %s2775_s23 = scalar_lea.vmem %s2384_s21, 16  ;;  %s2779_s24 = scalar_lea.vmem %s2384_s21, 32 }
  0x3a   :  { %2682 = vmatpush3.bf16.msra.mxu0 %v2679_v3  ;;  %2684 = vmatpush3.bf16.msra.mxu1 %v2679_v3  ;;  %v100_v16 = vmul.f32 %v2904_v13, %v2904_v13  ;;  %v2918_v17 = vld [vmem:[#allocation3 + $0x68] sm:$0xff]  ;;  %v2920_v18 = vld [vmem:[#allocation3 + $0x20] sm:$0xff]  ;;  %v2922_v19 = vld [vmem:[#allocation3 + $0x70] sm:$0xff]  ;;  %p2776_p10 = scmp.ne.s32.totalorder %s2384_s21, %s2775_s23  ;;  %p2780_p11 = scmp.lt.s32.totalorder %s2384_s21, %s2384_s21 }
  0x3b   :  { %2619 = vmatprep.mubr.msk.f32.mxu1 %vm138_vm0, %v96_v5  ;;  %v101_v20 = vmul.f32 %v2918_v17, %v2918_v17  ;;  %v2932_v21 = vld [vmem:[#allocation3 + $0x28] sm:$0xff]  ;;  %v102_v22 = vmul.f32 %v2922_v19, %v2922_v19  ;;  %v2936_v23 = vld [vmem:[#allocation3 + $0x78] sm:$0xff]  ;;  %v2938_v24 = vld [vmem:[#allocation6] sm:$0xff]  ;;  %v88_v5 = vmul.f32 %v2881_v2, %v2881_v2  ;;  %p2781_p12 = scmp.lt.s32.totalorder %s2779_s24, %s2775_s23 }
  0x3c   :  { %v2940_v25 = vld [vmem:[#allocation3 + $0x30] sm:$0xff]  ;;  %v103_v26 = vmul.f32 %v2936_v23, %v2936_v23  ;;  %v2947_v27 = vld [vmem:[#allocation6 + $0x8] sm:$0xff]  ;;  %v2952_v28 = vld [vmem:[#allocation3 + $0x38] sm:$0xff]  ;;  %v104_v29 = vmul.f32 %v2938_v24, %v2938_v24  ;;  %v120_v59 = vmul.f32 %v2938_v24, %v2881_v2 }
  0x3d   :  { %2560 = vmatmul.mubr.msk.f32.vlgmr.msra.gmra.mrb[0].mxu0 %vm138_vm0, %v2895_v9  ;;  %2620 = vmatmul.mubr.msk.f32.vlgmr.msra.gmra.mrb[0].mxu1 %vm138_vm0, %v97_v7  ;;  %v2956_v30 = vld [vmem:[#allocation6 + $0x10] sm:$0xff]  ;;  %v105_v31 = vmul.f32 %v2947_v27, %v2947_v27  ;;  %v2963_v32 = vld [vmem:[#allocation6 + $0x18] sm:$0xff]  ;;  %v2970_v34 = vld [vmem:[#allocation6 + $0x20] sm:$0xff]  ;;  %v121_v60 = vmul.f32 %v2947_v27, %v2895_v9  ;;  %p2782_p13 = por %p2781_p12, %p2780_p11 }
  0x3e   :  { %2562 = vmatprep.mubr.msk.f32.mxu0 %vm138_vm0, %v2902_v12  ;;  %2622 = vmatprep.mubr.msk.f32.mxu1 %vm138_vm0, %v98_v10  ;;  %v106_v33 = vmul.f32 %v2956_v30, %v2956_v30  ;;  %v107_v35 = vmul.f32 %v2963_v32, %v2963_v32  ;;  %v77_v36 = vld [vmem:[#allocation6 + $0x28] sm:$0xff]  ;;  %v108_v37 = vmul.f32 %v2970_v34, %v2970_v34  ;;  %v78_v38 = vld [vmem:[#allocation6 + $0x30] sm:$0xff]  ;;  %v79_v40 = vld [vmem:[#allocation6 + $0x38] sm:$0xff] }
  0x3f   :  { %v109_v39 = vmul.f32 %v77_v36, %v77_v36  ;;  %v110_v41 = vmul.f32 %v78_v38, %v78_v38  ;;  %v80_v42 = vld [vmem:[#allocation6 + $0x40] sm:$0xff]  ;;  %v111_v43 = vmul.f32 %v79_v40, %v79_v40  ;;  %v81_v45 = vld [vmem:[#allocation6 + $0x48] sm:$0xff]  ;;  %v82_v46 = vld [vmem:[#allocation6 + $0x50] sm:$0xff]  ;;  %v122_v61 = vmul.f32 %v2956_v30, %v2902_v12  ;;  %p2783_p0 = pnand %p2782_p13, %p2776_p10 }
  0x40   :  { %v112_v44 = vmul.f32 %v80_v42, %v80_v42  ;;  %v113_v47 = vmul.f32 %v81_v45, %v81_v45  ;;  %v114_v48 = vmul.f32 %v82_v46, %v82_v46  ;;  %v83_v49 = vld [vmem:[#allocation6 + $0x58] sm:$0xff]  ;;  %v84_v50 = vld [vmem:[#allocation6 + $0x60] sm:$0xff]  ;;  %v85_v53 = vld [vmem:[#allocation6 + $0x68] sm:$0xff]  ;;  %v123_v62 = vmul.f32 %v2963_v32, %v2914_v15 }
  0x41   :  { %2563 = vmatmul.mubr.msk.f32.gmra.mrb[2].mxu0 %vm138_vm0, %v2914_v15  ;;  %2623 = vmatmul.mubr.msk.f32.gmra.mrb[2].mxu1 %vm138_vm0, %v99_v14  ;;  %v115_v51 = vmul.f32 %v83_v49, %v83_v49  ;;  %v116_v52 = vmul.f32 %v84_v50, %v84_v50  ;;  %v86_v54 = vld [vmem:[#allocation6 + $0x70] sm:$0xff]  ;;  %v117_v55 = vmul.f32 %v85_v53, %v85_v53  ;;  %v87_v57 = vld [vmem:[#allocation6 + $0x78] sm:$0xff] }
  0x42   :  { %2565 = vmatprep.mubr.msk.f32.mxu0 %vm138_vm0, %v2920_v18  ;;  %2625 = vmatprep.mubr.msk.f32.mxu1 %vm138_vm0, %v100_v16  ;;  %v118_v56 = vmul.f32 %v86_v54, %v86_v54  ;;  %v119_v58 = vmul.f32 %v87_v57, %v87_v57  ;;  %v124_v63 = vmul.f32 %v2970_v34, %v2920_v18 }
  0x43   :  { %v125_v0 = vmul.f32 %v77_v36, %v2932_v21  ;;  %v126_v1 = vmul.f32 %v78_v38, %v2940_v25  ;;  %v127_v3 = vmul.f32 %v79_v40, %v2952_v28  ;;  %v128_v7 = vmul.f32 %v80_v42, %v2885_v4 }
  0x44   :  { %v89_v10 = vmul.f32 %v2895_v9, %v2895_v9  ;;  %v129_v14 = vmul.f32 %v81_v45, %v2889_v6  ;;  %v90_v16 = vmul.f32 %v2902_v12, %v2902_v12  ;;  %v130_v2 = vmul.f32 %v82_v46, %v2893_v8 }
  0x45   :  { %2566 = vmatmul.mubr.msk.f32.gmra.mrb[4].mxu0 %vm138_vm0, %v2932_v21  ;;  %2626 = vmatmul.mubr.msk.f32.gmra.mrb[4].mxu1 %vm138_vm0, %v101_v20  ;;  %v131_v9 = vmul.f32 %v83_v49, %v2899_v11  ;;  %v132_v12 = vmul.f32 %v84_v50, %v2904_v13  ;;  %v135_v20 = vmul.f32 %v87_v57, %v2936_v23 }
  0x46   :  { %2568 = vmatprep.mubr.msk.f32.mxu0 %vm138_vm0, %v2940_v25  ;;  %2628 = vmatprep.mubr.msk.f32.mxu1 %vm138_vm0, %v102_v22 }
  0x49   :  { %2569 = vmatmul.mubr.msk.f32.gmra.mrb[6].mxu0 %vm138_vm0, %v2952_v28  ;;  %2629 = vmatmul.mubr.msk.f32.gmra.mrb[6].mxu1 %vm138_vm0, %v103_v26 }
  0x4a   :  { %2571 = vmatprep.mubr.msk.f32.mxu0 %vm138_vm0, %v2885_v4  ;;  %2631 = vmatprep.mubr.msk.f32.mxu1 %vm138_vm0, %v104_v29  ;;  %v91_v4 = vmul.f32 %v2914_v15, %v2914_v15  ;;  %v133_v15 = vmul.f32 %v85_v53, %v2918_v17 }
  0x4d   :  { %2572 = vmatmul.mubr.msk.f32.gmra.mrb[8].mxu0 %vm138_vm0, %v2889_v6  ;;  %2632 = vmatmul.mubr.msk.f32.gmra.mrb[8].mxu1 %vm138_vm0, %v105_v31  ;;  %v92_v6 = vmul.f32 %v2920_v18, %v2920_v18  ;;  %v134_v18 = vmul.f32 %v86_v54, %v2922_v19 }
  0x4e   :  { %2574 = vmatprep.mubr.msk.f32.mxu0 %vm138_vm0, %v2893_v8  ;;  %2634 = vmatprep.mubr.msk.f32.mxu1 %vm138_vm0, %v106_v33  ;;  %v93_v8 = vmul.f32 %v2932_v21, %v2932_v21 }
  0x51   :  { %2575 = vmatmul.mubr.msk.f32.gmra.mrb[10].mxu0 %vm138_vm0, %v2899_v11  ;;  %2635 = vmatmul.mubr.msk.f32.gmra.mrb[10].mxu1 %vm138_vm0, %v107_v35  ;;  %v94_v11 = vmul.f32 %v2940_v25, %v2940_v25 }
  0x52   :  { %2577 = vmatprep.mubr.msk.f32.mxu0 %vm138_vm0, %v2904_v13  ;;  %2637 = vmatprep.mubr.msk.f32.mxu1 %vm138_vm0, %v108_v37  ;;  %v95_v13 = vmul.f32 %v2952_v28, %v2952_v28 }
  0x55   :  { %2578 = vmatmul.mubr.msk.f32.gmra.mrb[12].mxu0 %vm138_vm0, %v2918_v17  ;;  %2638 = vmatmul.mubr.msk.f32.gmra.mrb[12].mxu1 %vm138_vm0, %v109_v39 }
  0x56   :  { %2580 = vmatprep.mubr.msk.f32.mxu0 %vm138_vm0, %v2922_v19  ;;  %2640 = vmatprep.mubr.msk.f32.mxu1 %vm138_vm0, %v110_v41 }
  0x59   :  { %2581 = vmatmul.mubr.msk.f32.gmra.mrb[14].mxu0 %vm138_vm0, %v2936_v23  ;;  %2641 = vmatmul.mubr.msk.f32.gmra.mrb[14].mxu1 %vm138_vm0, %v111_v43 }
  0x5a   :  { %2583 = vmatprep.mubr.msk.f32.mxu0 %vm138_vm0, %v2938_v24  ;;  %2643 = vmatprep.mubr.msk.f32.mxu1 %vm138_vm0, %v112_v44 }
  0x5d   :  { %2584 = vmatmul.mubr.msk.f32.gmra.mrb[16].mxu0 %vm138_vm0, %v2947_v27  ;;  %2644 = vmatmul.mubr.msk.f32.gmra.mrb[16].mxu1 %vm138_vm0, %v113_v47 }
  0x5e   :  { %2586 = vmatprep.mubr.msk.f32.mxu0 %vm138_vm0, %v2956_v30  ;;  %2646 = vmatprep.mubr.msk.f32.mxu1 %vm138_vm0, %v114_v48 }
  0x61   :  { %2587 = vmatmul.mubr.msk.f32.gmra.mrb[18].mxu0 %vm138_vm0, %v2963_v32  ;;  %2647 = vmatmul.mubr.msk.f32.gmra.mrb[18].mxu1 %vm138_vm0, %v115_v51 }
  0x62   :  { %2589 = vmatprep.mubr.msk.f32.mxu0 %vm138_vm0, %v2970_v34  ;;  %2649 = vmatprep.mubr.msk.f32.mxu1 %vm138_vm0, %v116_v52 }
  0x65   :  { %2590 = vmatmul.mubr.msk.f32.gmra.mrb[20].mxu0 %vm138_vm0, %v77_v36  ;;  %2650 = vmatmul.mubr.msk.f32.gmra.mrb[20].mxu1 %vm138_vm0, %v117_v55 }
  0x66   :  { %2592 = vmatprep.mubr.msk.f32.mxu0 %vm138_vm0, %v78_v38  ;;  %2652 = vmatprep.mubr.msk.f32.mxu1 %vm138_vm0, %v118_v56 }
  0x69   :  { %2593 = vmatmul.mubr.msk.f32.gmra.mrb[22].mxu0 %vm138_vm0, %v79_v40  ;;  %2653 = vmatmul.mubr.msk.f32.gmra.mrb[22].mxu1 %vm138_vm0, %v119_v58 }
  0x6a   :  { %2595 = vmatprep.mubr.msk.f32.mxu0 %vm138_vm0, %v80_v42  ;;  %2655 = vmatprep.mubr.msk.f32.mxu1 %vm138_vm0, %v120_v59 }
  0x6d   :  { %2596 = vmatmul.mubr.msk.f32.gmra.mrb[24].mxu0 %vm138_vm0, %v81_v45  ;;  %2656 = vmatmul.mubr.msk.f32.gmra.mrb[24].mxu1 %vm138_vm0, %v121_v60 }
  0x6e   :  { %2598 = vmatprep.mubr.msk.f32.mxu0 %vm138_vm0, %v82_v46  ;;  %2658 = vmatprep.mubr.msk.f32.mxu1 %vm138_vm0, %v122_v61 }
  0x71   :  { %2599 = vmatmul.mubr.msk.f32.gmra.mrb[26].mxu0 %vm138_vm0, %v83_v49  ;;  %2659 = vmatmul.mubr.msk.f32.gmra.mrb[26].mxu1 %vm138_vm0, %v123_v62 }
  0x72   :  { %2601 = vmatprep.mubr.msk.f32.mxu0 %vm138_vm0, %v84_v50  ;;  %2661 = vmatprep.mubr.msk.f32.mxu1 %vm138_vm0, %v124_v63 }
  0x75   :  { %2602 = vmatmul.mubr.msk.f32.gmra.mrb[28].mxu0 %vm138_vm0, %v85_v53  ;;  %2662 = vmatmul.mubr.msk.f32.gmra.mrb[28].mxu1 %vm138_vm0, %v125_v0 }
  0x76   :  { %2604 = vmatprep.mubr.msk.f32.mxu0 %vm138_vm0, %v86_v54  ;;  %2664 = vmatprep.mubr.msk.f32.mxu1 %vm138_vm0, %v126_v1 }
  0x79   :  { %2605 = vmatmul.mubr.msk.f32.gmra.mrb[30].mxu0 %vm138_vm0, %v87_v57  ;;  %2665 = vmatmul.mubr.msk.f32.gmra.mrb[30].mxu1 %vm138_vm0, %v127_v3 }
  0x7a   :  { %2607 = vmatprep.mubr.msk.f32.mxu0 %vm138_vm0, %v88_v5  ;;  %2667 = vmatprep.mubr.msk.f32.mxu1 %vm138_vm0, %v128_v7 }
  0x7d   :  { %2608 = vmatmul.mubr.msk.f32.gmra.mrb[32].mxu0 %vm138_vm0, %v89_v10  ;;  %2668 = vmatmul.mubr.msk.f32.gmra.mrb[32].mxu1 %vm138_vm0, %v129_v14 }
  0x7e   :  { %2610 = vmatprep.mubr.msk.f32.mxu0 %vm138_vm0, %v90_v16  ;;  %2670 = vmatprep.mubr.msk.f32.mxu1 %vm138_vm0, %v130_v2 }
  0x81   :  { %2611 = vmatmul.mubr.msk.f32.gmra.mrb[34].mxu0 %vm138_vm0, %v91_v4  ;;  %2671 = vmatmul.mubr.msk.f32.gmra.mrb[34].mxu1 %vm138_vm0, %v131_v9 }
  0x82   :  { %2613 = vmatprep.mubr.msk.f32.mxu0 %vm138_vm0, %v92_v6  ;;  %2673 = vmatprep.mubr.msk.f32.mxu1 %vm138_vm0, %v132_v12 }
  0x85   :  { %2614 = vmatmul.mubr.msk.f32.gmra.mrb[36].mxu0 %vm138_vm0, %v93_v8  ;;  %2674 = vmatmul.mubr.msk.f32.gmra.mrb[36].mxu1 %vm138_vm0, %v133_v15 }
  0x86   :  { %2616 = vmatprep.mubr.msk.f32.mxu0 %vm138_vm0, %v94_v11  ;;  %2676 = vmatprep.mubr.msk.f32.mxu1 %vm138_vm0, %v134_v18 }
  0x89   :  { %2617 = vmatmul.mubr.msk.f32.gmra.mrb[38].mxu0 %vm138_vm0, %v95_v13  ;;  %2677 = vmatmul.mubr.msk.f32.gmra.mrb[38].mxu1 %vm138_vm0, %v135_v20 }
 0x110   :  { %v2561_v17 = vpop.f32.mrb[0].mxu0  ;;  %v2621_v19 = vpop.f32.mrb[0].mxu1 }
 0x111   :  { %846 = vst.msk [vmem:[#allocation2 + $0x8] sm:$0xff] %vm844_vm1, %v2561_v17  ;;  %886 = vst.msk [vmem:[#allocation2 + $0x148] sm:$0xff] %vm844_vm1, %v2621_v19  ;;  %v445_v21 = vpop.f32.mrb[1].mxu0  ;;  %v645_v22 = vpop.f32.mrb[1].mxu1 }
 0x112   :  { %845 = vst.msk [vmem:[#allocation2] sm:$0xff] %vm844_vm1, %v445_v21  ;;  %885 = vst.msk [vmem:[#allocation2 + $0x140] sm:$0xff] %vm844_vm1, %v645_v22 }
 0x114   :  { %v2564_v23 = vpop.f32.mrb[2].mxu0  ;;  %v2624_v24 = vpop.f32.mrb[2].mxu1 }
 0x115   :  { %848 = vst.msk [vmem:[#allocation2 + $0x18] sm:$0xff] %vm844_vm1, %v2564_v23  ;;  %888 = vst.msk [vmem:[#allocation2 + $0x158] sm:$0xff] %vm844_vm1, %v2624_v24  ;;  %v455_v25 = vpop.f32.mrb[3].mxu0  ;;  %v655_v26 = vpop.f32.mrb[3].mxu1 }
 0x116   :  { %847 = vst.msk [vmem:[#allocation2 + $0x10] sm:$0xff] %vm844_vm1, %v455_v25  ;;  %887 = vst.msk [vmem:[#allocation2 + $0x150] sm:$0xff] %vm844_vm1, %v655_v26 }
 0x118   :  { %v2567_v27 = vpop.f32.mrb[4].mxu0  ;;  %v2627_v28 = vpop.f32.mrb[4].mxu1 }
 0x119   :  { %850 = vst.msk [vmem:[#allocation2 + $0x28] sm:$0xff] %vm844_vm1, %v2567_v27  ;;  %890 = vst.msk [vmem:[#allocation2 + $0x168] sm:$0xff] %vm844_vm1, %v2627_v28  ;;  %v465_v29 = vpop.f32.mrb[5].mxu0  ;;  %v665_v30 = vpop.f32.mrb[5].mxu1  ;;  %v925_v61 = vld [vmem:[#allocation2] sm:$0x3f] }
 0x11a   :  { %849 = vst.msk [vmem:[#allocation2 + $0x20] sm:$0xff] %vm844_vm1, %v465_v29  ;;  %889 = vst.msk [vmem:[#allocation2 + $0x160] sm:$0xff] %vm844_vm1, %v665_v30  ;;  %v1005_v62 = vld [vmem:[#allocation2 + $0x1] sm:$0x3f]  ;;  %v3129_v3 = vmul.f32 0.0010283801, %v925_v61 }
 0x11b   :  { %v1125_v63 = vld [vmem:[#allocation2 + $0x2] sm:$0x3f]  ;;  %v3131_v5 = vmul.f32 0.007598758, %v1005_v62 }
 0x11c   :  { %v2570_v31 = vpop.f32.mrb[6].mxu0  ;;  %v2630_v32 = vpop.f32.mrb[6].mxu1  ;;  %v1245_v0 = vld [vmem:[#allocation2 + $0x3] sm:$0x3f]  ;;  %v3133_v7 = vmul.f32 0.036000773, %v1125_v63 }
 0x11d   :  { %852 = vst.msk [vmem:[#allocation2 + $0x38] sm:$0xff] %vm844_vm1, %v2570_v31  ;;  %892 = vst.msk [vmem:[#allocation2 + $0x178] sm:$0xff] %vm844_vm1, %v2630_v32  ;;  %v475_v33 = vpop.f32.mrb[7].mxu0  ;;  %v675_v34 = vpop.f32.mrb[7].mxu1  ;;  %v1365_v1 = vld [vmem:[#allocation2 + $0x4] sm:$0x3f] }
 0x11e   :  { %851 = vst.msk [vmem:[#allocation2 + $0x30] sm:$0xff] %vm844_vm1, %v475_v33  ;;  %891 = vst.msk [vmem:[#allocation2 + $0x170] sm:$0xff] %vm844_vm1, %v675_v34  ;;  %v1485_v10 = vld [vmem:[#allocation2 + $0x5] sm:$0x3f]  ;;  %v3135_v14 = vmul.f32 0.10936069, %v1245_v0 }
 0x11f   :  { %v3137_v16 = vmul.f32 0.21300554, %v1365_v1  ;;  %v945_v2 = vld [vmem:[#allocation2 + $0x140] sm:$0x3f]  ;;  %v3139_v12 = vmul.f32 0.26601171, %v1485_v10 }
 0x120   :  { %v2573_v35 = vpop.f32.mrb[8].mxu0  ;;  %v2633_v36 = vpop.f32.mrb[8].mxu1  ;;  %v1025_v4 = vld [vmem:[#allocation2 + $0x141] sm:$0x3f]  ;;  %v3141_v11 = vmul.f32 0.0010283801, %v945_v2 }
 0x121   :  { %854 = vst.msk [vmem:[#allocation2 + $0x48] sm:$0xff] %vm844_vm1, %v2573_v35  ;;  %894 = vst.msk [vmem:[#allocation2 + $0x188] sm:$0xff] %vm844_vm1, %v2633_v36  ;;  %v485_v37 = vpop.f32.mrb[9].mxu0  ;;  %v685_v38 = vpop.f32.mrb[9].mxu1  ;;  %v1145_v9 = vld [vmem:[#allocation2 + $0x142] sm:$0x3f] }
 0x122   :  { %853 = vst.msk [vmem:[#allocation2 + $0x40] sm:$0xff] %vm844_vm1, %v485_v37  ;;  %893 = vst.msk [vmem:[#allocation2 + $0x180] sm:$0xff] %vm844_vm1, %v685_v38  ;;  %v1265_v6 = vld [vmem:[#allocation2 + $0x143] sm:$0x3f]  ;;  %v926_v18 = vld [vmem:[#allocation2 + $0x10] sm:$0x3f] }
 0x123   :  { %4583 = vst [vmem:[#allocation13_spill] sm:$0xff] %v3139_v12  ;;  %v1385_v8 = vld [vmem:[#allocation2 + $0x144] sm:$0x3f]  ;;  %v1006_v13 = vld [vmem:[#allocation2 + $0x11] sm:$0x3f] }
 0x124   :  { %v2576_v39 = vpop.f32.mrb[10].mxu0  ;;  %v2636_v40 = vpop.f32.mrb[10].mxu1  ;;  %v1505_v15 = vld [vmem:[#allocation2 + $0x145] sm:$0x3f]  ;;  %v3143_v20 = vmul.f32 0.007598758, %v1025_v4 }
 0x125   :  { %856 = vst.msk [vmem:[#allocation2 + $0x58] sm:$0xff] %vm844_vm1, %v2576_v39  ;;  %896 = vst.msk [vmem:[#allocation2 + $0x198] sm:$0xff] %vm844_vm1, %v2636_v40  ;;  %v495_v41 = vpop.f32.mrb[11].mxu0  ;;  %v695_v42 = vpop.f32.mrb[11].mxu1  ;;  %v3145_v17 = vmul.f32 0.036000773, %v1145_v9 }
 0x126   :  { %855 = vst.msk [vmem:[#allocation2 + $0x50] sm:$0xff] %vm844_vm1, %v495_v41  ;;  %895 = vst.msk [vmem:[#allocation2 + $0x190] sm:$0xff] %vm844_vm1, %v695_v42  ;;  %v3147_v19 = vmul.f32 0.10936069, %v1265_v6  ;;  %v3149_v21 = vmul.f32 0.21300554, %v1385_v8 }
 0x127   :  { %v3151_v22 = vmul.f32 0.26601171, %v1505_v15  ;;  %v1126_v23 = vld [vmem:[#allocation2 + $0x12] sm:$0x3f]  ;;  %v3153_v24 = vmul.f32 0.0010283801, %v926_v18 }
 0x128   :  { %v2579_v43 = vpop.f32.mrb[12].mxu0  ;;  %v2639_v44 = vpop.f32.mrb[12].mxu1  ;;  %v3155_v25 = vmul.f32 0.007598758, %v1006_v13  ;;  %v1246_v26 = vld [vmem:[#allocation2 + $0x13] sm:$0x3f] }
 0x129   :  { %858 = vst.msk [vmem:[#allocation2 + $0x68] sm:$0xff] %vm844_vm1, %v2579_v43  ;;  %898 = vst.msk [vmem:[#allocation2 + $0x1a8] sm:$0xff] %vm844_vm1, %v2639_v44  ;;  %v505_v45 = vpop.f32.mrb[13].mxu0  ;;  %v705_v46 = vpop.f32.mrb[13].mxu1  ;;  %v1366_v27 = vld [vmem:[#allocation2 + $0x14] sm:$0x3f] }
 0x12a   :  { %857 = vst.msk [vmem:[#allocation2 + $0x60] sm:$0xff] %vm844_vm1, %v505_v45  ;;  %897 = vst.msk [vmem:[#allocation2 + $0x1a0] sm:$0xff] %vm844_vm1, %v705_v46  ;;  %v1486_v28 = vld [vmem:[#allocation2 + $0x15] sm:$0x3f]  ;;  %v3157_v30 = vmul.f32 0.036000773, %v1126_v23 }
 0x12b   :  { %4584 = vst [vmem:[#allocation14_spill] sm:$0xff] %v3151_v22  ;;  %v946_v29 = vld [vmem:[#allocation2 + $0x150] sm:$0x3f]  ;;  %v3159_v33 = vmul.f32 0.10936069, %v1246_v26 }
 0x12c   :  { %v2582_v47 = vpop.f32.mrb[14].mxu0  ;;  %v2642_v48 = vpop.f32.mrb[14].mxu1  ;;  %v1026_v31 = vld [vmem:[#allocation2 + $0x151] sm:$0x3f]  ;;  %v3161_v36 = vmul.f32 0.21300554, %v1366_v27 }
 0x12d   :  { %860 = vst.msk [vmem:[#allocation2 + $0x78] sm:$0xff] %vm844_vm1, %v2582_v47  ;;  %900 = vst.msk [vmem:[#allocation2 + $0x1b8] sm:$0xff] %vm844_vm1, %v2642_v48  ;;  %v515_v49 = vpop.f32.mrb[15].mxu0  ;;  %v715_v50 = vpop.f32.mrb[15].mxu1  ;;  %v1146_v32 = vld [vmem:[#allocation2 + $0x152] sm:$0x3f] }
 0x12e   :  { %859 = vst.msk [vmem:[#allocation2 + $0x70] sm:$0xff] %vm844_vm1, %v515_v49  ;;  %899 = vst.msk [vmem:[#allocation2 + $0x1b0] sm:$0xff] %vm844_vm1, %v715_v50  ;;  %v1266_v34 = vld [vmem:[#allocation2 + $0x153] sm:$0x3f]  ;;  %v3163_v37 = vmul.f32 0.26601171, %v1486_v28 }
 0x12f   :  { %v1386_v35 = vld [vmem:[#allocation2 + $0x154] sm:$0x3f]  ;;  %4585 = vst [vmem:[#allocation15_spill] sm:$0xff] %v3161_v36  ;;  %v3165_v38 = vmul.f32 0.0010283801, %v946_v29 }
 0x130   :  { %v2585_v51 = vpop.f32.mrb[16].mxu0  ;;  %v2645_v52 = vpop.f32.mrb[16].mxu1  ;;  %4586 = vst [vmem:[#allocation16_spill] sm:$0xff] %v3163_v37  ;;  %v3167_v39 = vmul.f32 0.007598758, %v1026_v31 }
 0x131   :  { %862 = vst.msk [vmem:[#allocation2 + $0x88] sm:$0xff] %vm844_vm1, %v2585_v51  ;;  %902 = vst.msk [vmem:[#allocation2 + $0x1c8] sm:$0xff] %vm844_vm1, %v2645_v52  ;;  %v525_v53 = vpop.f32.mrb[17].mxu0  ;;  %v725_v54 = vpop.f32.mrb[17].mxu1  ;;  %v3169_v40 = vmul.f32 0.036000773, %v1146_v32 }
 0x132   :  { %861 = vst.msk [vmem:[#allocation2 + $0x80] sm:$0xff] %vm844_vm1, %v525_v53  ;;  %901 = vst.msk [vmem:[#allocation2 + $0x1c0] sm:$0xff] %vm844_vm1, %v725_v54  ;;  %v927_v41 = vld [vmem:[#allocation2 + $0x20] sm:$0x3f]  ;;  %v3171_v42 = vmul.f32 0.10936069, %v1266_v34 }
 0x133   :  { %v3173_v43 = vmul.f32 0.21300554, %v1386_v35  ;;  %v1007_v44 = vld [vmem:[#allocation2 + $0x21] sm:$0x3f]  ;;  %v3175_v49 = vmul.f32 0.0010283801, %v927_v41 }
 0x134   :  { %v2588_v55 = vpop.f32.mrb[18].mxu0  ;;  %v2648_v56 = vpop.f32.mrb[18].mxu1  ;;  %v1127_v45 = vld [vmem:[#allocation2 + $0x22] sm:$0x3f]  ;;  %v3179_v53 = vmul.f32 0.007598758, %v1007_v44 }
 0x135   :  { %864 = vst.msk [vmem:[#allocation2 + $0x98] sm:$0xff] %vm844_vm1, %v2588_v55  ;;  %904 = vst.msk [vmem:[#allocation2 + $0x1d8] sm:$0xff] %vm844_vm1, %v2648_v56  ;;  %v535_v57 = vpop.f32.mrb[19].mxu0  ;;  %v735_v58 = vpop.f32.mrb[19].mxu1  ;;  %v1247_v46 = vld [vmem:[#allocation2 + $0x23] sm:$0x3f] }
 0x136   :  { %863 = vst.msk [vmem:[#allocation2 + $0x90] sm:$0xff] %vm844_vm1, %v535_v57  ;;  %903 = vst.msk [vmem:[#allocation2 + $0x1d0] sm:$0xff] %vm844_vm1, %v735_v58  ;;  %v1367_v50 = vld [vmem:[#allocation2 + $0x24] sm:$0x3f]  ;;  %v3183_v57 = vmul.f32 0.036000773, %v1127_v45 }
 0x137   :  { %4587 = vst [vmem:[#allocation17_spill] sm:$0xff] %v3173_v43  ;;  %v947_v54 = vld [vmem:[#allocation2 + $0x160] sm:$0x3f]  ;;  %v3185_v58 = vmul.f32 0.10936069, %v1247_v46 }
 0x138   :  { %v2591_v59 = vpop.f32.mrb[20].mxu0  ;;  %v2651_v60 = vpop.f32.mrb[20].mxu1  ;;  %v3189_v61 = vmul.f32 0.21300554, %v1367_v50  ;;  %v1027_v62 = vld [vmem:[#allocation2 + $0x161] sm:$0x3f] }
 0x139   :  { %866 = vst.msk [vmem:[#allocation2 + $0xa8] sm:$0xff] %vm844_vm1, %v2591_v59  ;;  %906 = vst.msk [vmem:[#allocation2 + $0x1e8] sm:$0xff] %vm844_vm1, %v2651_v60  ;;  %v545_v47 = vpop.f32.mrb[21].mxu0  ;;  %v745_v48 = vpop.f32.mrb[21].mxu1  ;;  %v3193_v1 = vmul.f32 0.0010283801, %v947_v54 }
 0x13a   :  { %865 = vst.msk [vmem:[#allocation2 + $0xa0] sm:$0xff] %vm844_vm1, %v545_v47  ;;  %905 = vst.msk [vmem:[#allocation2 + $0x1e0] sm:$0xff] %vm844_vm1, %v745_v48  ;;  %v1147_v10 = vld [vmem:[#allocation2 + $0x162] sm:$0x3f]  ;;  %v928_v6 = vld [vmem:[#allocation2 + $0x30] sm:$0x3f] }
 0x13b   :  { %4588 = vst [vmem:[#allocation18_spill] sm:$0xff] %v3189_v61  ;;  %v1267_v9 = vld [vmem:[#allocation2 + $0x163] sm:$0x3f]  ;;  %v3199_v18 = vmul.f32 0.007598758, %v1027_v62 }
 0x13c   :  { %v2594_v51 = vpop.f32.mrb[22].mxu0  ;;  %v2654_v52 = vpop.f32.mrb[22].mxu1  ;;  %v1008_v13 = vld [vmem:[#allocation2 + $0x31] sm:$0x3f]  ;;  %v3203_v27 = vmul.f32 0.036000773, %v1147_v10 }
 0x13d   :  { %868 = vst.msk [vmem:[#allocation2 + $0xb8] sm:$0xff] %vm844_vm1, %v2594_v51  ;;  %908 = vst.msk [vmem:[#allocation2 + $0x1f8] sm:$0xff] %vm844_vm1, %v2654_v52  ;;  %v555_v55 = vpop.f32.mrb[23].mxu0  ;;  %v755_v56 = vpop.f32.mrb[23].mxu1  ;;  %v1128_v28 = vld [vmem:[#allocation2 + $0x32] sm:$0x3f] }
 0x13e   :  { %867 = vst.msk [vmem:[#allocation2 + $0xb0] sm:$0xff] %vm844_vm1, %v555_v55  ;;  %907 = vst.msk [vmem:[#allocation2 + $0x1f0] sm:$0xff] %vm844_vm1, %v755_v56  ;;  %v1248_v29 = vld [vmem:[#allocation2 + $0x33] sm:$0x3f]  ;;  %v3207_v31 = vmul.f32 0.10936069, %v1267_v9 }
 0x13f   :  { %v3209_v32 = vmul.f32 0.0010283801, %v928_v6  ;;  %v948_v34 = vld [vmem:[#allocation2 + $0x170] sm:$0x3f]  ;;  %v3211_v35 = vmul.f32 0.007598758, %v1008_v13 }
 0x140   :  { %v2597_v59 = vpop.f32.mrb[24].mxu0  ;;  %v2657_v60 = vpop.f32.mrb[24].mxu1  ;;  %v1028_v41 = vld [vmem:[#allocation2 + $0x171] sm:$0x3f]  ;;  %v3213_v45 = vmul.f32 0.036000773, %v1128_v28 }
 0x141   :  { %870 = vst.msk [vmem:[#allocation2 + $0xc8] sm:$0xff] %vm844_vm1, %v2597_v59  ;;  %910 = vst.msk [vmem:[#allocation2 + $0x208] sm:$0xff] %vm844_vm1, %v2657_v60  ;;  %v565_v63 = vpop.f32.mrb[25].mxu0  ;;  %v765_v0 = vpop.f32.mrb[25].mxu1  ;;  %v1148_v44 = vld [vmem:[#allocation2 + $0x172] sm:$0x3f] }
 0x142   :  { %869 = vst.msk [vmem:[#allocation2 + $0xc0] sm:$0xff] %vm844_vm1, %v565_v63  ;;  %909 = vst.msk [vmem:[#allocation2 + $0x200] sm:$0xff] %vm844_vm1, %v765_v0  ;;  %v3215_v46 = vmul.f32 0.10936069, %v1248_v29  ;;  %v1869_v47 = vld [vmem:[#allocation2 + $0x188] sm:$0x3f] }
 0x143   :  { %v3217_v48 = vmul.f32 0.0010283801, %v948_v34  ;;  %v929_v50 = vld [vmem:[#allocation2 + $0x40] sm:$0x3f]  ;;  %v3219_v52 = vmul.f32 0.007598758, %v1028_v41 }
 0x144   :  { %v2600_v2 = vpop.f32.mrb[26].mxu0  ;;  %v2660_v4 = vpop.f32.mrb[26].mxu1  ;;  %v1009_v51 = vld [vmem:[#allocation2 + $0x41] sm:$0x3f]  ;;  %v3221_v54 = vmul.f32 0.036000773, %v1148_v44 }
 0x145   :  { %872 = vst.msk [vmem:[#allocation2 + $0xd8] sm:$0xff] %vm844_vm1, %v2600_v2  ;;  %912 = vst.msk [vmem:[#allocation2 + $0x218] sm:$0xff] %vm844_vm1, %v2660_v4  ;;  %v575_v8 = vpop.f32.mrb[27].mxu0  ;;  %v775_v15 = vpop.f32.mrb[27].mxu1  ;;  %v1129_v55 = vld [vmem:[#allocation2 + $0x42] sm:$0x3f] }
 0x146   :  { %871 = vst.msk [vmem:[#allocation2 + $0xd0] sm:$0xff] %vm844_vm1, %v575_v8  ;;  %911 = vst.msk [vmem:[#allocation2 + $0x210] sm:$0xff] %vm844_vm1, %v775_v15  ;;  %v3223_v56 = vmul.f32 0.036000773, %v1869_v47  ;;  %v949_v59 = vld [vmem:[#allocation2 + $0x180] sm:$0x3f] }
 0x147   :  { %v1029_v60 = vld [vmem:[#allocation2 + $0x181] sm:$0x3f]  ;;  %v3225_v62 = vmul.f32 0.0010283801, %v929_v50  ;;  %v3227_v63 = vmul.f32 0.007598758, %v1009_v51 }
 0x148   :  { %v2603_v23 = vpop.f32.mrb[28].mxu0  ;;  %v2663_v26 = vpop.f32.mrb[28].mxu1  ;;  %4589 = vst [vmem:[#allocation19_spill] sm:$0xff] %v3223_v56  ;;  %v1149_v0 = vld [vmem:[#allocation2 + $0x182] sm:$0x3f] }
 0x149   :  { %874 = vst.msk [vmem:[#allocation2 + $0xe8] sm:$0xff] %vm844_vm1, %v2603_v23  ;;  %914 = vst.msk [vmem:[#allocation2 + $0x228] sm:$0xff] %vm844_vm1, %v2663_v26  ;;  %v3229_v10 = vmul.f32 0.036000773, %v1129_v55  ;;  %v1269_v2 = vld [vmem:[#allocation2 + $0x183] sm:$0x3f] }
 0x14a   :  { %4590 = vst [vmem:[#allocation20_spill] sm:$0xff] %v3225_v62  ;;  %4591 = vst [vmem:[#allocation21_spill] sm:$0xff] %v3227_v63  ;;  %v1389_v4 = vld [vmem:[#allocation2 + $0x184] sm:$0x3f]  ;;  %v3231_v9 = vmul.f32 0.0010283801, %v949_v59 }
 0x14b   :  { %4592 = vst [vmem:[#allocation22_spill] sm:$0xff] %v3229_v10  ;;  %v3233_v6 = vmul.f32 0.007598758, %v1029_v60  ;;  %v1509_v8 = vld [vmem:[#allocation2 + $0x185] sm:$0x3f]  ;;  %v785_v10 = vpop.f32.mrb[29].mxu1 }
 0x14c   :  { %v3235_v15 = vmul.f32 0.036000773, %v1149_v0  ;;  %v1629_v13 = vld [vmem:[#allocation2 + $0x186] sm:$0x3f]  ;;  %v3237_v26 = vmul.f32 0.10936069, %v1269_v2 }
 0x14d   :  { %v1749_v23 = vld [vmem:[#allocation2 + $0x187] sm:$0x3f]  ;;  %v3239_v28 = vmul.f32 0.21300554, %v1389_v4  ;;  %v1870_v29 = vld [vmem:[#allocation2 + $0x198] sm:$0x3f] }
 0x14e   :  { %v3241_v34 = vmul.f32 0.26601171, %v1509_v8  ;;  %v930_v41 = vld [vmem:[#allocation2 + $0x50] sm:$0x3f]  ;;  %v3243_v47 = vmul.f32 0.21300554, %v1629_v13 }
 0x14f   :  { %4593 = vst [vmem:[#allocation23_spill] sm:$0xff] %v3239_v28  ;;  %v1010_v44 = vld [vmem:[#allocation2 + $0x51] sm:$0x3f]  ;;  %v3245_v50 = vmul.f32 0.10936069, %v1749_v23  ;;  %913 = vst.msk [vmem:[#allocation2 + $0x220] sm:$0xff] %vm844_vm1, %v785_v10 }
 0x150   :  { %4594 = vst [vmem:[#allocation24_spill] sm:$0xff] %v3241_v34  ;;  %4595 = vst [vmem:[#allocation25_spill] sm:$0xff] %v3243_v47  ;;  %v950_v51 = vld [vmem:[#allocation2 + $0x190] sm:$0x3f]  ;;  %v3247_v55 = vmul.f32 0.036000773, %v1870_v29 }
 0x151   :  { %4596 = vst [vmem:[#allocation26_spill] sm:$0xff] %v3245_v50  ;;  %v1030_v59 = vld [vmem:[#allocation2 + $0x191] sm:$0x3f]  ;;  %v3249_v0 = vmul.f32 0.0010283801, %v930_v41 }
 0x152   :  { %4597 = vst [vmem:[#allocation27_spill] sm:$0xff] %v3247_v55  ;;  %v1150_v60 = vld [vmem:[#allocation2 + $0x192] sm:$0x3f]  ;;  %v3251_v2 = vmul.f32 0.007598758, %v1010_v44 }
 0x153   :  { %4598 = vst [vmem:[#allocation28_spill] sm:$0xff] %v3249_v0  ;;  %v1270_v4 = vld [vmem:[#allocation2 + $0x193] sm:$0x3f]  ;;  %v3253_v56 = vmul.f32 0.0010283801, %v950_v51 }
 0x154   :  { %4599 = vst [vmem:[#allocation29_spill] sm:$0xff] %v3251_v2  ;;  %v1390_v8 = vld [vmem:[#allocation2 + $0x194] sm:$0x3f]  ;;  %v3255_v22 = vmul.f32 0.007598758, %v1030_v59  ;;  %v585_v59 = vpop.f32.mrb[29].mxu0 }
 0x155   :  { %v1510_v37 = vld [vmem:[#allocation2 + $0x195] sm:$0x3f]  ;;  %v3257_v13 = vmul.f32 0.036000773, %v1150_v60  ;;  %v3259_v50 = vmul.f32 0.10936069, %v1270_v4 }
 0x156   :  { %v1630_v23 = vld [vmem:[#allocation2 + $0x196] sm:$0x3f]  ;;  %v3261_v12 = vmul.f32 0.21300554, %v1390_v8  ;;  %v3263_v41 = vmul.f32 0.26601171, %v1510_v37 }
 0x157   :  { %4600 = vst [vmem:[#allocation30_spill] sm:$0xff] %v3259_v50  ;;  %v1750_v29 = vld [vmem:[#allocation2 + $0x197] sm:$0x3f]  ;;  %v1249_v44 = vld [vmem:[#allocation2 + $0x43] sm:$0x3f]  ;;  %873 = vst.msk [vmem:[#allocation2 + $0xe0] sm:$0xff] %vm844_vm1, %v585_v59 }
 0x158   :  { %v1130_v55 = vld [vmem:[#allocation2 + $0x52] sm:$0x3f]  ;;  %4601 = vst [vmem:[#allocation31_spill] sm:$0xff] %v3261_v12  ;;  %4602 = vst [vmem:[#allocation32_spill] sm:$0xff] %v3263_v41  ;;  %v3265_v47 = vmul.f32 0.21300554, %v1630_v23 }
 0x159   :  { %v1250_v51 = vld [vmem:[#allocation2 + $0x53] sm:$0x3f]  ;;  %v3267_v61 = vmul.f32 0.10936069, %v1750_v29  ;;  %v3269_v60 = vmul.f32 0.036000773, %v1130_v55 }
 0x15a   :  { %4603 = vst [vmem:[#allocation33_spill] sm:$0xff] %v3265_v47  ;;  %v1268_v34 = vld [vmem:[#allocation2 + $0x173] sm:$0x3f]  ;;  %v951_v43 = vld [vmem:[#allocation2 + $0x1a0] sm:$0x3f]  ;;  %v2606_v4 = vpop.f32.mrb[30].mxu0 }
 0x15b   :  { %4604 = vst [vmem:[#allocation34_spill] sm:$0xff] %v3267_v61  ;;  %4605 = vst [vmem:[#allocation35_spill] sm:$0xff] %v3269_v60  ;;  %v2666_v8 = vpop.f32.mrb[30].mxu1  ;;  %v3273_v37 = vmul.f32 0.10936069, %v1249_v44  ;;  %v595_v23 = vpop.f32.mrb[31].mxu0 }
 0x15c   :  { %876 = vst.msk [vmem:[#allocation2 + $0xf8] sm:$0xff] %vm844_vm1, %v2606_v4  ;;  %916 = vst.msk [vmem:[#allocation2 + $0x238] sm:$0xff] %vm844_vm1, %v2666_v8  ;;  %v795_v29 = vpop.f32.mrb[31].mxu1  ;;  %v3277_v61 = vmul.f32 0.10936069, %v1250_v51  ;;  %v2609_v10 = vpop.f32.mrb[32].mxu0 }
 0x15d   :  { %4606 = vst [vmem:[#allocation36_spill] sm:$0xff] %v3273_v37  ;;  %v3279_v47 = vmul.f32 0.10936069, %v1268_v34  ;;  %v1031_v55 = vld [vmem:[#allocation2 + $0x1a1] sm:$0x3f]  ;;  %875 = vst.msk [vmem:[#allocation2 + $0xf0] sm:$0xff] %vm844_vm1, %v595_v23 }
 0x15e   :  { %4607 = vst [vmem:[#allocation37_spill] sm:$0xff] %v3277_v61  ;;  %v1151_v41 = vld [vmem:[#allocation2 + $0x1a2] sm:$0x3f]  ;;  %915 = vst.msk [vmem:[#allocation2 + $0x230] sm:$0xff] %vm844_vm1, %v795_v29  ;;  %v2669_v59 = vpop.f32.mrb[32].mxu1  ;;  %v605_v4 = vpop.f32.mrb[33].mxu0 }
 0x15f   :  { %4608 = vst [vmem:[#allocation38_spill] sm:$0xff] %v3279_v47  ;;  %v3283_v44 = vmul.f32 0.0010283801, %v951_v43  ;;  %v1271_v37 = vld [vmem:[#allocation2 + $0x1a3] sm:$0x3f]  ;;  %878 = vst.msk [vmem:[#allocation2 + $0x108] sm:$0xff] %vm844_vm1, %v2609_v10 }
 0x160   :  { %918 = vst.msk [vmem:[#allocation2 + $0x248] sm:$0xff] %vm844_vm1, %v2669_v59  ;;  %v805_v51 = vpop.f32.mrb[33].mxu1  ;;  %v1391_v8 = vld [vmem:[#allocation2 + $0x1a4] sm:$0x3f]  ;;  %877 = vst.msk [vmem:[#allocation2 + $0x100] sm:$0xff] %vm844_vm1, %v605_v4  ;;  %v2612_v23 = vpop.f32.mrb[34].mxu0 }
 0x161   :  { %v1511_v34 = vld [vmem:[#allocation2 + $0x1a5] sm:$0x3f]  ;;  %917 = vst.msk [vmem:[#allocation2 + $0x240] sm:$0xff] %vm844_vm1, %v805_v51  ;;  %v2672_v47 = vpop.f32.mrb[34].mxu1  ;;  %v3289_v29 = vmul.f32 0.007598758, %v1031_v55 }
 0x162   :  { %v1631_v61 = vld [vmem:[#allocation2 + $0x1a6] sm:$0x3f]  ;;  %880 = vst.msk [vmem:[#allocation2 + $0x118] sm:$0xff] %vm844_vm1, %v2612_v23  ;;  %920 = vst.msk [vmem:[#allocation2 + $0x258] sm:$0xff] %vm844_vm1, %v2672_v47  ;;  %v615_v43 = vpop.f32.mrb[35].mxu0  ;;  %v815_v10 = vpop.f32.mrb[35].mxu1 }
 0x163   :  { %v3293_v59 = vmul.f32 0.036000773, %v1151_v41  ;;  %v1751_v60 = vld [vmem:[#allocation2 + $0x1a7] sm:$0x3f]  ;;  %879 = vst.msk [vmem:[#allocation2 + $0x110] sm:$0xff] %vm844_vm1, %v615_v43  ;;  %919 = vst.msk [vmem:[#allocation2 + $0x250] sm:$0xff] %vm844_vm1, %v815_v10 }
 0x164   :  { %v2615_v4 = vpop.f32.mrb[36].mxu0  ;;  %v2675_v51 = vpop.f32.mrb[36].mxu1  ;;  %v3297_v12 = vmul.f32 0.10936069, %v1271_v37  ;;  %v3299_v55 = vmul.f32 0.21300554, %v1391_v8 }
 0x165   :  { %4609 = vst [vmem:[#allocation39_spill] sm:$0xff] %v3293_v59  ;;  %v3301_v2 = vmul.f32 0.26601171, %v1511_v34  ;;  %882 = vst.msk [vmem:[#allocation2 + $0x128] sm:$0xff] %vm844_vm1, %v2615_v4  ;;  %v3305_v47 = vmul.f32 0.21300554, %v1631_v61 }
 0x166   :  { %4610 = vst [vmem:[#allocation40_spill] sm:$0xff] %v3297_v12  ;;  %4611 = vst [vmem:[#allocation41_spill] sm:$0xff] %v3299_v55  ;;  %v952_v41 = vld [vmem:[#allocation2 + $0x1b0] sm:$0x3f]  ;;  %v3307_v0 = vmul.f32 0.10936069, %v1751_v60 }
 0x167   :  { %4612 = vst [vmem:[#allocation42_spill] sm:$0xff] %v3301_v2  ;;  %922 = vst.msk [vmem:[#allocation2 + $0x268] sm:$0xff] %vm844_vm1, %v2675_v51  ;;  %v1032_v23 = vld [vmem:[#allocation2 + $0x1b1] sm:$0x3f]  ;;  %v3309_v12 = vmul.f32 0.0010283801, %v952_v41 }
 0x168   :  { %4613 = vst [vmem:[#allocation43_spill] sm:$0xff] %v3305_v47  ;;  %4614 = vst [vmem:[#allocation44_spill] sm:$0xff] %v3307_v0  ;;  %v1152_v43 = vld [vmem:[#allocation2 + $0x1b2] sm:$0x3f]  ;;  %v3311_v8 = vmul.f32 0.007598758, %v1032_v23 }
 0x169   :  { %v1272_v10 = vld [vmem:[#allocation2 + $0x1b3] sm:$0x3f]  ;;  %v933_v34 = vld [vmem:[#allocation2 + $0x80] sm:$0x3f]  ;;  %v3313_v2 = vmul.f32 0.036000773, %v1152_v43 }
 0x16a   :  { %v1392_v59 = vld [vmem:[#allocation2 + $0x1b4] sm:$0x3f]  ;;  %v3315_v4 = vmul.f32 0.10936069, %v1272_v10  ;;  %v1013_v61 = vld [vmem:[#allocation2 + $0x81] sm:$0x3f] }
 0x16b   :  { %v1512_v50 = vld [vmem:[#allocation2 + $0x1b5] sm:$0x3f]  ;;  %4615 = vst [vmem:[#allocation45_spill] sm:$0xff] %v3313_v2  ;;  %v3317_v51 = vmul.f32 0.21300554, %v1392_v59 }
 0x16c   :  { %v1632_v37 = vld [vmem:[#allocation2 + $0x1b6] sm:$0x3f]  ;;  %4616 = vst [vmem:[#allocation46_spill] sm:$0xff] %v3315_v4  ;;  %v3319_v47 = vmul.f32 0.26601171, %v1512_v50 }
 0x16d   :  { %4617 = vst [vmem:[#allocation47_spill] sm:$0xff] %v3317_v51  ;;  %v3321_v60 = vmul.f32 0.21300554, %v1632_v37  ;;  %v3323_v0 = vmul.f32 0.0010283801, %v933_v34 }
 0x16e   :  { %4618 = vst [vmem:[#allocation48_spill] sm:$0xff] %v3319_v47  ;;  %v1133_v55 = vld [vmem:[#allocation2 + $0x82] sm:$0x3f]  ;;  %v3325_v41 = vmul.f32 0.007598758, %v1013_v61 }
 0x16f   :  { %4619 = vst [vmem:[#allocation49_spill] sm:$0xff] %v3321_v60  ;;  %v1253_v28 = vld [vmem:[#allocation2 + $0x83] sm:$0x3f]  ;;  %v3327_v10 = vmul.f32 0.036000773, %v1133_v55 }
 0x170   :  { %4620 = vst [vmem:[#allocation50_spill] sm:$0xff] %v3325_v41  ;;  %v1373_v23 = vld [vmem:[#allocation2 + $0x84] sm:$0x3f]  ;;  %v3329_v4 = vmul.f32 0.10936069, %v1253_v28 }
 0x171   :  { %v1493_v36 = vld [vmem:[#allocation2 + $0x85] sm:$0x3f]  ;;  %4621 = vst [vmem:[#allocation51_spill] sm:$0xff] %v3327_v10  ;;  %v3331_v50 = vmul.f32 0.21300554, %v1373_v23 }
 0x172   :  { %v953_v63 = vld [vmem:[#allocation2 + $0x1c0] sm:$0x3f]  ;;  %4622 = vst [vmem:[#allocation52_spill] sm:$0xff] %v3329_v4  ;;  %v3333_v37 = vmul.f32 0.26601171, %v1493_v36 }
 0x173   :  { %v1033_v43 = vld [vmem:[#allocation2 + $0x1c1] sm:$0x3f]  ;;  %4623 = vst [vmem:[#allocation53_spill] sm:$0xff] %v3331_v50  ;;  %v3335_v60 = vmul.f32 0.0010283801, %v953_v63 }
 0x174   :  { %v1153_v2 = vld [vmem:[#allocation2 + $0x1c2] sm:$0x3f]  ;;  %4624 = vst [vmem:[#allocation54_spill] sm:$0xff] %v3333_v37  ;;  %v3337_v47 = vmul.f32 0.007598758, %v1033_v43 }
 0x175   :  { %v1273_v59 = vld [vmem:[#allocation2 + $0x1c3] sm:$0x3f]  ;;  %4625 = vst [vmem:[#allocation55_spill] sm:$0xff] %v3335_v60  ;;  %v3339_v61 = vmul.f32 0.036000773, %v1153_v2  ;;  %v625_v60 = vpop.f32.mrb[37].mxu0 }
 0x176   :  { %v1393_v34 = vld [vmem:[#allocation2 + $0x1c4] sm:$0x3f]  ;;  %4626 = vst [vmem:[#allocation56_spill] sm:$0xff] %v3337_v47  ;;  %v3341_v51 = vmul.f32 0.10936069, %v1273_v59  ;;  %881 = vst.msk [vmem:[#allocation2 + $0x120] sm:$0xff] %vm844_vm1, %v625_v60 }
 0x177   :  { %4627 = vst [vmem:[#allocation57_spill] sm:$0xff] %v3339_v61  ;;  %v1513_v62 = vld [vmem:[#allocation2 + $0x1c5] sm:$0x3f]  ;;  %v934_v41 = vld [vmem:[#allocation2 + $0x90] sm:$0x3f] }
 0x178   :  { %4628 = vst [vmem:[#allocation58_spill] sm:$0xff] %v3341_v51  ;;  %v3343_v55 = vmul.f32 0.21300554, %v1393_v34  ;;  %v1014_v28 = vld [vmem:[#allocation2 + $0x91] sm:$0x3f] }
 0x179   :  { %v1134_v4 = vld [vmem:[#allocation2 + $0x92] sm:$0x3f]  ;;  %v3345_v36 = vmul.f32 0.26601171, %v1513_v62  ;;  %v3347_v37 = vmul.f32 0.0010283801, %v934_v41 }
 0x17a   :  { %4629 = vst [vmem:[#allocation59_spill] sm:$0xff] %v3343_v55  ;;  %v1254_v10 = vld [vmem:[#allocation2 + $0x93] sm:$0x3f]  ;;  %v3349_v43 = vmul.f32 0.007598758, %v1014_v28  ;;  %v825_v62 = vpop.f32.mrb[37].mxu1 }
 0x17b   :  { %v1374_v23 = vld [vmem:[#allocation2 + $0x94] sm:$0x3f]  ;;  %4630 = vst [vmem:[#allocation60_spill] sm:$0xff] %v3345_v36  ;;  %v3351_v2 = vmul.f32 0.036000773, %v1134_v4  ;;  %921 = vst.msk [vmem:[#allocation2 + $0x260] sm:$0xff] %vm844_vm1, %v825_v62 }
 0x17c   :  { %v1494_v50 = vld [vmem:[#allocation2 + $0x95] sm:$0x3f]  ;;  %v3353_v51 = vmul.f32 0.10936069, %v1254_v10  ;;  %v3355_v61 = vmul.f32 0.21300554, %v1374_v23 }
 0x17d   :  { %v954_v63 = vld [vmem:[#allocation2 + $0x1d0] sm:$0x3f]  ;;  %4631 = vst [vmem:[#allocation61_spill] sm:$0xff] %v3351_v2  ;;  %v3357_v34 = vmul.f32 0.26601171, %v1494_v50  ;;  %v2618_v4 = vpop.f32.mrb[38].mxu0 }
 0x17e   :  { %v1034_v59 = vld [vmem:[#allocation2 + $0x1d1] sm:$0x3f]  ;;  %4632 = vst [vmem:[#allocation62_spill] sm:$0xff] %v3353_v51  ;;  %4633 = vst [vmem:[#allocation63_spill] sm:$0xff] %v3355_v61  ;;  %v3359_v55 = vmul.f32 0.0010283801, %v954_v63 }
 0x17f   :  { %4634 = vst [vmem:[#allocation64_spill] sm:$0xff] %v3357_v34  ;;  %v1154_v47 = vld [vmem:[#allocation2 + $0x1d2] sm:$0x3f]  ;;  %v3361_v36 = vmul.f32 0.007598758, %v1034_v59  ;;  %v2678_v28 = vpop.f32.mrb[38].mxu1 }
 0x180   :  { %4635 = vst [vmem:[#allocation65_spill] sm:$0xff] %v3359_v55  ;;  %v1274_v41 = vld [vmem:[#allocation2 + $0x1d3] sm:$0x3f]  ;;  %884 = vst.msk [vmem:[#allocation2 + $0x138] sm:$0xff] %vm844_vm1, %v2618_v4  ;;  %v635_v50 = vpop.f32.mrb[39].mxu0  ;;  %v835_v23 = vpop.f32.mrb[39].mxu1  ;;  %v1085_v55 = vadd.f32 %v3131_v5, %v3129_v3 }
 0x181   :  { %4636 = vst [vmem:[#allocation66_spill] sm:$0xff] %v3361_v36  ;;  %v1394_v10 = vld [vmem:[#allocation2 + $0x1d4] sm:$0x3f]  ;;  %924 = vst.msk [vmem:[#allocation2 + $0x278] sm:$0xff] %vm844_vm1, %v2678_v28  ;;  %v931_v63 = vld [vmem:[#allocation2 + $0x60] sm:$0x3f] }
 0x182   :  { %v3367_v34 = vmul.f32 0.036000773, %v1154_v47  ;;  %883 = vst.msk [vmem:[#allocation2 + $0x130] sm:$0xff] %vm844_vm1, %v635_v50  ;;  %923 = vst.msk [vmem:[#allocation2 + $0x270] sm:$0xff] %vm844_vm1, %v835_v23  ;;  %v932_v59 = vld [vmem:[#allocation2 + $0x70] sm:$0x3f]  ;;  %v1105_v23 = vadd.f32 %v3143_v20, %v3141_v11  ;;  %v1106_v11 = vadd.f32 %v3167_v39, %v3165_v38  ;;  %v1087_v20 = vadd.f32 %v3179_v53, %v3175_v49 }
 0x183   :  { %v1011_v60 = vld [vmem:[#allocation2 + $0x61] sm:$0x3f]  ;;  %v3371_v61 = vmul.f32 0.10936069, %v1274_v41  ;;  %v1012_v62 = vld [vmem:[#allocation2 + $0x71] sm:$0x3f]  ;;  %v1109_v38 = vadd.f32 %v3233_v6, %v3231_v9 }
 0x184   :  { %4637 = vst [vmem:[#allocation67_spill] sm:$0xff] %v3367_v34  ;;  %v1131_v51 = vld [vmem:[#allocation2 + $0x62] sm:$0x3f]  ;;  %v3373_v36 = vmul.f32 0.21300554, %v1394_v10  ;;  %v1086_v10 = vadd.f32 %v3155_v25, %v3153_v24  ;;  %v1225_v25 = vadd.f32 %v3145_v17, %v1105_v23  ;;  %v1088_v17 = vadd.f32 %v3211_v35, %v3209_v32 }
 0x185   :  { %4638 = vst [vmem:[#allocation68_spill] sm:$0xff] %v3371_v61  ;;  %v3375_v4 = vmul.f32 0.0010283801, %v931_v63  ;;  %v1132_v28 = vld [vmem:[#allocation2 + $0x72] sm:$0x3f] }
 0x186   :  { %4639 = vst [vmem:[#allocation69_spill] sm:$0xff] %v3373_v36  ;;  %v3379_v47 = vmul.f32 0.0010283801, %v932_v59  ;;  %v3381_v34 = vmul.f32 0.007598758, %v1011_v60  ;;  %v1205_v60 = vadd.f32 %v3133_v7, %v1085_v55  ;;  %v1206_v55 = vadd.f32 %v3157_v30, %v1086_v10 }
 0x187   :  { %4640 = vst [vmem:[#allocation70_spill] sm:$0xff] %v3375_v4  ;;  %v1251_v50 = vld [vmem:[#allocation2 + $0x63] sm:$0x3f]  ;;  %v3385_v61 = vmul.f32 0.007598758, %v1012_v62  ;;  %v1207_v30 = vadd.f32 %v3183_v57, %v1087_v20  ;;  %v1110_v57 = vadd.f32 %v3255_v22, %v3253_v56 }
 0x188   :  { %v935_v41 = vld [vmem:[#allocation2 + $0xa0] sm:$0x3f]  ;;  %v3387_v2 = vmul.f32 0.036000773, %v1131_v51  ;;  %v3391_v4 = vmul.f32 0.036000773, %v1132_v28  ;;  %v1107_v28 = vadd.f32 %v3199_v18, %v3193_v1  ;;  %v1325_v10 = vadd.f32 %v3135_v14, %v1205_v60 }
 0x189   :  { %v1015_v63 = vld [vmem:[#allocation2 + $0xa1] sm:$0x3f]  ;;  %v3393_v59 = vmul.f32 0.10936069, %v1251_v50  ;;  %v3400_v51 = vmul.f32 0.0010283801, %v935_v41  ;;  %v1327_v22 = vadd.f32 %v3185_v58, %v1207_v30 }
 0x18a   :  { %v1135_v36 = vld [vmem:[#allocation2 + $0xa2] sm:$0x3f]  ;;  %4641 = vst [vmem:[#allocation71_spill] sm:$0xff] %v3391_v4  ;;  %v3405_v4 = vmul.f32 0.007598758, %v1015_v63  ;;  %v1345_v63 = vadd.f32 %v3147_v19, %v1225_v25  ;;  %v1108_v25 = vadd.f32 %v3219_v52, %v3217_v48  ;;  %v3458_v48 = vadd.f32 %v3137_v16, %v1325_v10 }
 0x18b   :  { %v1255_v3 = vld [vmem:[#allocation2 + $0xa3] sm:$0x3f]  ;;  %v3407_v50 = vmul.f32 0.036000773, %v1135_v36  ;;  %v936_v18 = vld [vmem:[#allocation2 + $0xb0] sm:$0x3f]  ;;  %v1226_v36 = vadd.f32 %v3169_v40, %v1106_v11  ;;  %v1229_v40 = vadd.f32 %v3235_v15, %v1109_v38  ;;  %v1230_v52 = vadd.f32 %v3257_v13, %v1110_v57 }
 0x18c   :  { %v1375_v5 = vld [vmem:[#allocation2 + $0xa4] sm:$0x3f]  ;;  %v3412_v39 = vmul.f32 0.10936069, %v1255_v3  ;;  %v1016_v9 = vld [vmem:[#allocation2 + $0xb1] sm:$0x3f]  ;;  %v3472_v16 = vadd.f32 %v3221_v54, %v1108_v25  ;;  %v1112_v13 = vadd.f32 %v3311_v8, %v3309_v12 }
 0x18d   :  { %v955_v62 = vld [vmem:[#allocation2 + $0x1e0] sm:$0x3f]  ;;  %v3414_v49 = vmul.f32 0.21300554, %v1375_v5  ;;  %v1136_v6 = vld [vmem:[#allocation2 + $0xb2] sm:$0x3f]  ;;  %v1227_v5 = vadd.f32 %v3203_v27, %v1107_v28  ;;  %v1208_v27 = vadd.f32 %v3213_v45, %v1088_v17  ;;  %v1346_v56 = vadd.f32 %v3171_v42, %v1226_v36 }
 0x18e   :  { %v1035_v24 = vld [vmem:[#allocation2 + $0x1e1] sm:$0x3f]  ;;  %v3418_v23 = vmul.f32 0.0010283801, %v955_v62  ;;  %v1256_v32 = vld [vmem:[#allocation2 + $0xb3] sm:$0x3f]  ;;  %v1326_v62 = vadd.f32 %v3159_v33, %v1206_v55  ;;  %v1349_v45 = vadd.f32 %v3237_v26, %v1229_v40  ;;  %v3465_v42 = vadd.f32 %v3149_v21, %v1345_v63 }
 0x18f   :  { %v1155_v7 = vld [vmem:[#allocation2 + $0x1e2] sm:$0x3f]  ;;  %v3420_v1 = vmul.f32 0.007598758, %v1035_v24  ;;  %v956_v35 = vld [vmem:[#allocation2 + $0x1f0] sm:$0x3f]  ;;  %v1111_v36 = vadd.f32 %v3289_v29, %v3283_v44  ;;  %v3475_v26 = vadd.f32 %v3215_v46, %v1208_v27 }
 0x190   :  { %v1275_v53 = vld [vmem:[#allocation2 + $0x1e3] sm:$0x3f]  ;;  %v3424_v41 = vmul.f32 0.036000773, %v1155_v7  ;;  %v3435_v11 = vmul.f32 0.0010283801, %v936_v18 }
 0x191   :  { %v3428_v3 = vmul.f32 0.10936069, %v1275_v53  ;;  %v1036_v20 = vld [vmem:[#allocation2 + $0x1f1] sm:$0x3f]  ;;  %v3437_v14 = vmul.f32 0.007598758, %v1016_v9  ;;  %v3455_v53 = vadd.f32 %v3207_v31, %v1227_v5 }
 0x192   :  { %v1156_v24 = vld [vmem:[#allocation2 + $0x1f2] sm:$0x3f]  ;;  %v3439_v19 = vmul.f32 0.036000773, %v1136_v6  ;;  %v937_v60 = vld [vmem:[#allocation2 + $0xc0] sm:$0x3f] }
 0x193   :  { %4642 = vst [vmem:[#allocation72_spill] sm:$0xff] %v3428_v3  ;;  %v3444_v33 = vmul.f32 0.10936069, %v1256_v32  ;;  %v3446_v15 = vmul.f32 0.0010283801, %v956_v35  ;;  %4643 = vst [vmem:[#allocation73_spill] sm:$0xff] %v3455_v53 }
 0x194   :  { %v1017_v28 = vld [vmem:[#allocation2 + $0xc1] sm:$0x3f]  ;;  %v3450_v7 = vmul.f32 0.007598758, %v1036_v20  ;;  %v3452_v55 = vmul.f32 0.036000773, %v1156_v24 }
 0x195   :  { %v1137_v38 = vld [vmem:[#allocation2 + $0xc2] sm:$0x3f]  ;;  %v3462_v17 = vmul.f32 0.0010283801, %v937_v60  ;;  %v3469_v30 = vmul.f32 0.007598758, %v1017_v28 }
 0x196   :  { %v957_v58 = vld [vmem:[#allocation2 + $0x200] sm:$0x3f]  ;;  %4644 = vst [vmem:[#allocation74_spill] sm:$0xff] %v3475_v26  ;;  %v3481_v10 = vmul.f32 0.036000773, %v1137_v38  ;;  %v4647_v29 = vld [vmem:[#allocation20_spill] sm:$0xff] }
 0x197   :  { %v1037_v18 = vld [vmem:[#allocation2 + $0x201] sm:$0x3f]  ;;  %v938_v44 = vld [vmem:[#allocation2 + $0xd0] sm:$0x3f]  ;;  %v3487_v57 = vmul.f32 0.0010283801, %v957_v58 }
 0x198   :  { %v1157_v31 = vld [vmem:[#allocation2 + $0x202] sm:$0x3f]  ;;  %v4645_v6 = vld [vmem:[#allocation50_spill] sm:$0xff]  ;;  %v4648_v32 = vld [vmem:[#allocation21_spill] sm:$0xff]  ;;  %v3489_v46 = vmul.f32 0.007598758, %v1037_v18 }
 0x199   :  { %v1277_v9 = vld [vmem:[#allocation2 + $0x203] sm:$0x3f]  ;;  %v1093_v21 = vadd.f32 %v4645_v6, %v3323_v0  ;;  %4646 = vst [vmem:[#allocation50_spill] sm:$0xff] %v3481_v10  ;;  %v1089_v35 = vadd.f32 %v4648_v32, %v4647_v29  ;;  %v4650_v40 = vld [vmem:[#allocation56_spill] sm:$0xff]  ;;  %v4653_v60 = vld [vmem:[#allocation30_spill] sm:$0xff] }
 0x19a   :  { %v1397_v63 = vld [vmem:[#allocation2 + $0x204] sm:$0x3f]  ;;  %v1018_v20 = vld [vmem:[#allocation2 + $0xd1] sm:$0x3f]  ;;  %v1350_v25 = vadd.f32 %v4653_v60, %v1230_v52  ;;  %v3496_v27 = vmul.f32 0.036000773, %v1157_v31 }
 0x19b   :  { %v4649_v5 = vld [vmem:[#allocation55_spill] sm:$0xff]  ;;  %v3498_v28 = vmul.f32 0.10936069, %v1277_v9  ;;  %v958_v38 = vld [vmem:[#allocation2 + $0x210] sm:$0x3f] }
 0x19c   :  { %v1113_v54 = vadd.f32 %v4650_v40, %v4649_v5  ;;  %v4651_v24 = vld [vmem:[#allocation15_spill] sm:$0xff]  ;;  %v3501_v32 = vmul.f32 0.21300554, %v1397_v63  ;;  %v3503_v58 = vmul.f32 0.0010283801, %v938_v44  ;;  %v4658_v5 = vld [vmem:[#allocation28_spill] sm:$0xff] }
 0x19d   :  { %v3492_v12 = vadd.f32 %v4651_v24, %v1326_v62  ;;  %v4652_v8 = vld [vmem:[#allocation23_spill] sm:$0xff]  ;;  %4654 = vst [vmem:[#allocation20_spill] sm:$0xff] %v3498_v28  ;;  %v1038_v18 = vld [vmem:[#allocation2 + $0x211] sm:$0x3f]  ;;  %v3509_v52 = vmul.f32 0.007598758, %v1018_v20 }
 0x19e   :  { %v1469_v0 = vadd.f32 %v4652_v8, %v1349_v45  ;;  %v4655_v6 = vld [vmem:[#allocation39_spill] sm:$0xff]  ;;  %4656 = vst [vmem:[#allocation21_spill] sm:$0xff] %v3501_v32  ;;  %4657 = vst [vmem:[#allocation55_spill] sm:$0xff] %v3503_v58  ;;  %v4659_v40 = vld [vmem:[#allocation29_spill] sm:$0xff]  ;;  %v3515_v44 = vmul.f32 0.0010283801, %v958_v38 }
 0x19f   :  { %v1231_v29 = vadd.f32 %v4655_v6, %v1111_v36  ;;  %v1090_v62 = vadd.f32 %v4659_v40, %v4658_v5  ;;  %v4660_v24 = vld [vmem:[#allocation45_spill] sm:$0xff]  ;;  %v4661_v45 = vld [vmem:[#allocation51_spill] sm:$0xff]  ;;  %4662 = vst [vmem:[#allocation56_spill] sm:$0xff] %v3509_v52  ;;  %v4666_v58 = vld [vmem:[#allocation22_spill] sm:$0xff]  ;;  %v1094_v52 = vadd.f32 %v3349_v43, %v3347_v37 }
 0x1a0   :  { %v1232_v53 = vadd.f32 %v4660_v24, %v1112_v13  ;;  %v1213_v8 = vadd.f32 %v4661_v45, %v1093_v21  ;;  %v1158_v31 = vld [vmem:[#allocation2 + $0x212] sm:$0x3f]  ;;  %v1209_v5 = vadd.f32 %v4666_v58, %v1089_v35  ;;  %v4667_v40 = vld [vmem:[#allocation18_spill] sm:$0xff]  ;;  %v4669_v21 = vld [vmem:[#allocation24_spill] sm:$0xff] }
 0x1a1   :  { %v1278_v9 = vld [vmem:[#allocation2 + $0x213] sm:$0x3f]  ;;  %v3519_v13 = vadd.f32 %v4667_v40, %v1327_v22  ;;  %v1589_v20 = vadd.f32 %v4669_v21, %v1469_v0  ;;  %v4670_v24 = vld [vmem:[#allocation31_spill] sm:$0xff]  ;;  %v4671_v38 = vld [vmem:[#allocation40_spill] sm:$0xff] }
 0x1a2   :  { %v1252_v60 = vld [vmem:[#allocation2 + $0x73] sm:$0x3f]  ;;  %v1470_v45 = vadd.f32 %v4670_v24, %v1350_v25  ;;  %v3530_v10 = vmul.f32 0.10936069, %v1278_v9  ;;  %v4673_v35 = vld [vmem:[#allocation35_spill] sm:$0xff]  ;;  %v4674_v40 = vld [vmem:[#allocation46_spill] sm:$0xff] }
 0x1a3   :  { %v4663_v26 = vld [vmem:[#allocation17_spill] sm:$0xff]  ;;  %4668 = vst [vmem:[#allocation23_spill] sm:$0xff] %v3519_v13  ;;  %v1210_v22 = vadd.f32 %v4673_v35, %v1090_v62  ;;  %v1352_v0 = vadd.f32 %v4674_v40, %v1232_v53  ;;  %v4675_v21 = vld [vmem:[#allocation52_spill] sm:$0xff]  ;;  %v959_v37 = vld [vmem:[#allocation2 + $0x220] sm:$0x3f] }
 0x1a4   :  { %v3512_v28 = vadd.f32 %v4663_v26, %v1346_v56  ;;  %v4665_v36 = vld [vmem:[#allocation57_spill] sm:$0xff]  ;;  %v3525_v56 = vmul.f32 0.007598758, %v1038_v18  ;;  %v1257_v26 = vld [vmem:[#allocation2 + $0xc3] sm:$0x3f]  ;;  %4672 = vst [vmem:[#allocation30_spill] sm:$0xff] %v3530_v10  ;;  %v1333_v25 = vadd.f32 %v4675_v21, %v1213_v8 }
 0x1a5   :  { %v1233_v63 = vadd.f32 %v4665_v36, %v1113_v54  ;;  %v1398_v6 = vld [vmem:[#allocation2 + $0x214] sm:$0x3f]  ;;  %v1351_v36 = vadd.f32 %v4671_v38, %v1231_v29  ;;  %v4678_v18 = vld [vmem:[#allocation58_spill] sm:$0xff]  ;;  %v3540_v3 = vmul.f32 0.10936069, %v1252_v60 }
 0x1a6   :  { %4664 = vst [vmem:[#allocation15_spill] sm:$0xff] %v3512_v28  ;;  %v1138_v32 = vld [vmem:[#allocation2 + $0xd2] sm:$0x3f]  ;;  %v3528_v28 = vmul.f32 0.036000773, %v1158_v31  ;;  %v4685_v8 = vld [vmem:[#allocation66_spill] sm:$0xff] }
 0x1a7   :  { %v1258_v54 = vld [vmem:[#allocation2 + $0xd3] sm:$0x3f]  ;;  %v3535_v24 = vmul.f32 0.21300554, %v1398_v6  ;;  %v3537_v43 = vmul.f32 0.036000773, %v1138_v32  ;;  %v1353_v13 = vadd.f32 %v4678_v18, %v1233_v63 }
 0x1a8   :  { %v1276_v58 = vld [vmem:[#allocation2 + $0x1f3] sm:$0x3f]  ;;  %4679 = vst [vmem:[#allocation29_spill] sm:$0xff] %v3540_v3  ;;  %v3542_v29 = vmul.f32 0.10936069, %v1257_v26 }
 0x1a9   :  { %4676 = vst [vmem:[#allocation39_spill] sm:$0xff] %v3535_v24  ;;  %4677 = vst [vmem:[#allocation28_spill] sm:$0xff] %v3537_v43  ;;  %v3544_v31 = vmul.f32 0.10936069, %v1258_v54  ;;  %v4682_v9 = vld [vmem:[#allocation25_spill] sm:$0xff]  ;;  %v4687_v24 = vld [vmem:[#allocation32_spill] sm:$0xff] }
 0x1aa   :  { %4680 = vst [vmem:[#allocation45_spill] sm:$0xff] %v3542_v29  ;;  %v3547_v62 = vadd.f32 %v4682_v9, %v1589_v20  ;;  %v4683_v38 = vld [vmem:[#allocation61_spill] sm:$0xff]  ;;  %v1039_v40 = vld [vmem:[#allocation2 + $0x221] sm:$0x3f]  ;;  %v3552_v32 = vmul.f32 0.10936069, %v1276_v58  ;;  %v1590_v63 = vadd.f32 %v4687_v24, %v1470_v45 }
 0x1ab   :  { %4681 = vst [vmem:[#allocation51_spill] sm:$0xff] %v3544_v31  ;;  %v1214_v53 = vadd.f32 %v4683_v38, %v1094_v52  ;;  %v4684_v35 = vld [vmem:[#allocation65_spill] sm:$0xff]  ;;  %v1159_v21 = vld [vmem:[#allocation2 + $0x222] sm:$0x3f]  ;;  %v3555_v60 = vmul.f32 0.0010283801, %v959_v37 }
 0x1ac   :  { %v1114_v6 = vadd.f32 %v4685_v8, %v4684_v35  ;;  %4686 = vst [vmem:[#allocation17_spill] sm:$0xff] %v3552_v32  ;;  %v1279_v26 = vld [vmem:[#allocation2 + $0x223] sm:$0x3f]  ;;  %v960_v18 = vld [vmem:[#allocation2 + $0x230] sm:$0x3f]  ;;  %v4694_v32 = vld [vmem:[#allocation38_spill] sm:$0xff] }
 0x1ad   :  { %v4688_v54 = vld [vmem:[#allocation36_spill] sm:$0xff]  ;;  %v4690_v20 = vld [vmem:[#allocation37_spill] sm:$0xff]  ;;  %v4693_v29 = vld [vmem:[#allocation47_spill] sm:$0xff]  ;;  %v3567_v45 = vadd.f32 %v4694_v32, %v3472_v16  ;;  %v3581_v43 = vmul.f32 0.10936069, %v1279_v26 }
 0x1ae   :  { %v3558_v31 = vadd.f32 %v4688_v54, %v1209_v5  ;;  %v3561_v9 = vadd.f32 %v4690_v20, %v1210_v22  ;;  %v4692_v52 = vld [vmem:[#allocation41_spill] sm:$0xff]  ;;  %v1472_v35 = vadd.f32 %v4693_v29, %v1352_v0  ;;  %v941_v3 = vld [vmem:[#allocation2 + $0x100] sm:$0x3f]  ;;  %v3573_v5 = vmul.f32 0.007598758, %v1039_v40 }
 0x1af   :  { %v1471_v38 = vadd.f32 %v4692_v52, %v1351_v36  ;;  %v1040_v8 = vld [vmem:[#allocation2 + $0x231] sm:$0x3f]  ;;  %v1021_v58 = vld [vmem:[#allocation2 + $0x101] sm:$0x3f]  ;;  %4695 = vst [vmem:[#allocation18_spill] sm:$0xff] %v3567_v45  ;;  %4702 = vst [vmem:[#allocation31_spill] sm:$0xff] %v3581_v43 }
 0x1b0   :  { %4689 = vst [vmem:[#allocation57_spill] sm:$0xff] %v3558_v31  ;;  %4691 = vst [vmem:[#allocation22_spill] sm:$0xff] %v3561_v9  ;;  %v4696_v24 = vld [vmem:[#allocation13_spill] sm:$0xff]  ;;  %v3575_v54 = vmul.f32 0.036000773, %v1159_v21  ;;  %v4699_v52 = vld [vmem:[#allocation59_spill] sm:$0xff] }
 0x1b1   :  { %v3571_v37 = vadd.f32 %v4696_v24, %v3458_v48  ;;  %v1160_v22 = vld [vmem:[#allocation2 + $0x232] sm:$0x3f]  ;;  %v1473_v0 = vadd.f32 %v4699_v52, %v1353_v13  ;;  %v4700_v29 = vld [vmem:[#allocation62_spill] sm:$0xff]  ;;  %v4701_v31 = vld [vmem:[#allocation67_spill] sm:$0xff]  ;;  %v3583_v16 = vmul.f32 0.0010283801, %v960_v18  ;;  %v1095_v13 = vadd.f32 %v3405_v4, %v3400_v51 }
 0x1b2   :  { %v4698_v20 = vld [vmem:[#allocation53_spill] sm:$0xff]  ;;  %v1334_v9 = vadd.f32 %v4700_v29, %v1214_v53  ;;  %v1234_v10 = vadd.f32 %v4701_v31, %v1114_v6  ;;  %v1861_v32 = vld [vmem:[#allocation2 + $0x108] sm:$0x3f]  ;;  %v3585_v48 = vmul.f32 0.007598758, %v1040_v8  ;;  %v4704_v21 = vld [vmem:[#allocation14_spill] sm:$0xff] }
 0x1b3   :  { %4697 = vst [vmem:[#allocation24_spill] sm:$0xff] %v3571_v37  ;;  %v1453_v36 = vadd.f32 %v4698_v20, %v1333_v25  ;;  %v981_v40 = vmul.f32 0.0010283801, %v941_v3  ;;  %v1061_v24 = vmul.f32 0.007598758, %v1021_v58  ;;  %v3589_v37 = vadd.f32 %v4704_v21, %v3465_v42  ;;  %v4706_v25 = vld [vmem:[#allocation33_spill] sm:$0xff] }
 0x1b4   :  { %4703 = vst [vmem:[#allocation40_spill] sm:$0xff] %v3585_v48  ;;  %v3592_v20 = vadd.f32 %v4706_v25, %v1590_v63  ;;  %v3596_v31 = vmul.f32 0.036000773, %v1160_v22  ;;  %v1141_v53 = vld [vmem:[#allocation2 + $0x102] sm:$0x3f]  ;;  %v4708_v26 = vld [vmem:[#allocation70_spill] sm:$0xff] }
 0x1b5   :  { %4705 = vst [vmem:[#allocation35_spill] sm:$0xff] %v3589_v37  ;;  %v1261_v6 = vld [vmem:[#allocation2 + $0x103] sm:$0x3f]  ;;  %v1091_v18 = vadd.f32 %v3381_v34, %v4708_v26  ;;  %v4709_v8 = vld [vmem:[#allocation42_spill] sm:$0xff]  ;;  %v3601_v58 = vmul.f32 0.036000773, %v1861_v32 }
 0x1b6   :  { %4707 = vst [vmem:[#allocation46_spill] sm:$0xff] %v3596_v31  ;;  %v1591_v3 = vadd.f32 %v4709_v8, %v1471_v38  ;;  %v942_v52 = vld [vmem:[#allocation2 + $0x110] sm:$0x3f]  ;;  %v1381_v4 = vld [vmem:[#allocation2 + $0x104] sm:$0x3f]  ;;  %v4716_v34 = vld [vmem:[#allocation54_spill] sm:$0xff]  ;;  %v1101_v8 = vadd.f32 %v1061_v24, %v981_v40  ;;  %v1096_v24 = vadd.f32 %v3437_v14, %v3435_v11  ;;  %v1117_v14 = vadd.f32 %v3489_v46, %v3487_v57 }
 0x1b7   :  { %4710 = vst [vmem:[#allocation52_spill] sm:$0xff] %v3601_v58  ;;  %v1022_v42 = vld [vmem:[#allocation2 + $0x111] sm:$0x3f]  ;;  %v1501_v51 = vld [vmem:[#allocation2 + $0x105] sm:$0x3f]  ;;  %v3611_v26 = vadd.f32 %v4716_v34, %v1453_v36 }
 0x1b8   :  { %v4711_v29 = vld [vmem:[#allocation16_spill] sm:$0xff]  ;;  %v4715_v31 = vld [vmem:[#allocation63_spill] sm:$0xff]  ;;  %v1181_v58 = vmul.f32 0.036000773, %v1141_v53  ;;  %v1301_v48 = vmul.f32 0.10936069, %v1261_v6 }
 0x1b9   :  { %v3605_v63 = vadd.f32 %v4711_v29, %v3492_v12  ;;  %v4713_v21 = vld [vmem:[#allocation48_spill] sm:$0xff]  ;;  %v1454_v43 = vadd.f32 %v4715_v31, %v1334_v9  ;;  %4717 = vst [vmem:[#allocation25_spill] sm:$0xff] %v3611_v26  ;;  %v1215_v29 = vadd.f32 %v3407_v50, %v1095_v13  ;;  %v1211_v9 = vadd.f32 %v3387_v2, %v1091_v18  ;;  %v4720_v50 = vld [vmem:[#allocation43_spill] sm:$0xff]  ;;  %v4721_v53 = vld [vmem:[#allocation49_spill] sm:$0xff] }
 0x1ba   :  { %v1592_v25 = vadd.f32 %v4713_v21, %v1472_v35  ;;  %v1621_v22 = vld [vmem:[#allocation2 + $0x106] sm:$0x3f]  ;;  %v1092_v35 = vadd.f32 %v3385_v61, %v3379_v47  ;;  %v961_v21 = vld [vmem:[#allocation2 + $0x240] sm:$0x3f]  ;;  %v1421_v36 = vmul.f32 0.21300554, %v1381_v4  ;;  %v3631_v13 = vadd.f32 %v4720_v50, %v1591_v3 }
 0x1bb   :  { %4712 = vst [vmem:[#allocation58_spill] sm:$0xff] %v3605_v63  ;;  %v4714_v37 = vld [vmem:[#allocation68_spill] sm:$0xff]  ;;  %v982_v63 = vmul.f32 0.0010283801, %v942_v52  ;;  %v3624_v40 = vmul.f32 0.21300554, %v1621_v22  ;;  %v1221_v6 = vadd.f32 %v1181_v58, %v1101_v8  ;;  %v3650_v58 = vadd.f32 %v3393_v59, %v1211_v9 }
 0x1bc   :  { %v1354_v45 = vadd.f32 %v4714_v37, %v1234_v10  ;;  %v4718_v38 = vld [vmem:[#allocation60_spill] sm:$0xff]  ;;  %v1062_v10 = vmul.f32 0.007598758, %v1022_v42  ;;  %v1115_v37 = vadd.f32 %v3420_v1, %v3418_v23  ;;  %v943_v61 = vld [vmem:[#allocation2 + $0x120] sm:$0x3f]  ;;  %v3634_v2 = vadd.f32 %v4721_v53, %v1592_v25  ;;  %v4723_v52 = vld [vmem:[#allocation69_spill] sm:$0xff] }
 0x1bd   :  { %v3614_v32 = vadd.f32 %v4718_v38, %v1473_v0  ;;  %v1741_v12 = vld [vmem:[#allocation2 + $0x107] sm:$0x3f]  ;;  %v3622_v0 = vmul.f32 0.26601171, %v1501_v51  ;;  %v1023_v47 = vld [vmem:[#allocation2 + $0x121] sm:$0x3f] }
 0x1be   :  { %v3628_v31 = vmul.f32 0.10936069, %v1741_v12  ;;  %4722 = vst [vmem:[#allocation65_spill] sm:$0xff] %v3634_v2  ;;  %v3636_v23 = vmul.f32 0.0010283801, %v961_v21  ;;  %v3639_v42 = vadd.f32 %v4723_v52, %v1354_v45  ;;  %v4725_v4 = vld [vmem:[#allocation64_spill] sm:$0xff]  ;;  %v1102_v3 = vadd.f32 %v1062_v10, %v982_v63 }
 0x1bf   :  { %4719 = vst [vmem:[#allocation61_spill] sm:$0xff] %v3614_v32  ;;  %v1041_v1 = vld [vmem:[#allocation2 + $0x241] sm:$0x3f]  ;;  %v1142_v18 = vld [vmem:[#allocation2 + $0x112] sm:$0x3f]  ;;  %v3642_v11 = vadd.f32 %v4725_v4, %v1454_v43  ;;  %v1235_v21 = vadd.f32 %v3424_v41, %v1115_v37  ;;  %v1335_v43 = vadd.f32 %v3412_v39, %v1215_v29  ;;  %v1116_v63 = vadd.f32 %v3450_v7, %v3446_v15  ;;  %v4729_v52 = vld [vmem:[#allocation72_spill] sm:$0xff] }
 0x1c0   :  { %4724 = vst [vmem:[#allocation66_spill] sm:$0xff] %v3639_v42  ;;  %v1862_v51 = vld [vmem:[#allocation2 + $0x118] sm:$0x3f]  ;;  %v4727_v25 = vld [vmem:[#allocation71_spill] sm:$0xff]  ;;  %v983_v12 = vmul.f32 0.0010283801, %v943_v61  ;;  %v1341_v10 = vadd.f32 %v1301_v48, %v1221_v6  ;;  %v1097_v61 = vadd.f32 %v3469_v30, %v3462_v17  ;;  %v1237_v41 = vadd.f32 %v3496_v27, %v1117_v14 }
 0x1c1   :  { %4726 = vst [vmem:[#allocation32_spill] sm:$0xff] %v3642_v11  ;;  %v1262_v22 = vld [vmem:[#allocation2 + $0x113] sm:$0x3f]  ;;  %v3647_v38 = vadd.f32 %v4727_v25, %v1092_v35  ;;  %v1063_v45 = vmul.f32 0.007598758, %v1023_v47  ;;  %v1216_v35 = vadd.f32 %v3439_v19, %v1096_v24  ;;  %v1118_v15 = vadd.f32 %v3525_v56, %v3515_v44 }
 0x1c2   :  { %v1382_v34 = vld [vmem:[#allocation2 + $0x114] sm:$0x3f]  ;;  %v3654_v50 = vmul.f32 0.007598758, %v1041_v1  ;;  %v1182_v57 = vmul.f32 0.036000773, %v1142_v18  ;;  %v3671_v6 = vadd.f32 %v3414_v49, %v1335_v43  ;;  %v3676_v27 = vadd.f32 %v3452_v55, %v1116_v63 }
 0x1c3   :  { %v1502_v8 = vld [vmem:[#allocation2 + $0x115] sm:$0x3f]  ;;  %v3659_v53 = vmul.f32 0.036000773, %v1862_v51  ;;  %v1302_v59 = vmul.f32 0.10936069, %v1262_v22  ;;  %v1103_v19 = vadd.f32 %v1063_v45, %v983_v12  ;;  %v3679_v18 = vadd.f32 %v3444_v33, %v1216_v35 }
 0x1c4   :  { %v1622_v46 = vld [vmem:[#allocation2 + $0x116] sm:$0x3f]  ;;  %v1222_v39 = vadd.f32 %v1182_v57, %v1102_v3  ;;  %v1422_v29 = vmul.f32 0.21300554, %v1382_v34  ;;  %v3664_v37 = vmul.f32 0.26601171, %v1502_v8  ;;  %v3682_v44 = vadd.f32 %v4729_v52, %v1235_v21 }
 0x1c5   :  { %v1742_v9 = vld [vmem:[#allocation2 + $0x117] sm:$0x3f]  ;;  %v1143_v47 = vld [vmem:[#allocation2 + $0x122] sm:$0x3f]  ;;  %v3668_v7 = vmul.f32 0.21300554, %v1622_v46  ;;  %v1461_v56 = vadd.f32 %v1421_v36, %v1341_v10  ;;  %v1238_v21 = vadd.f32 %v3528_v28, %v1118_v15 }
 0x1c6   :  { %v939_v48 = vld [vmem:[#allocation2 + $0xe0] sm:$0x3f]  ;;  %v940_v24 = vld [vmem:[#allocation2 + $0xf0] sm:$0x3f]  ;;  %4728 = vst [vmem:[#allocation36_spill] sm:$0xff] %v3671_v6  ;;  %v1342_v25 = vadd.f32 %v1302_v59, %v1222_v39 }
 0x1c7   :  { %v3673_v1 = vmul.f32 0.10936069, %v1742_v9  ;;  %v962_v17 = vld [vmem:[#allocation2 + $0x250] sm:$0x3f]  ;;  %v1183_v4 = vmul.f32 0.036000773, %v1143_v47  ;;  %v1581_v28 = vadd.f32 %v3622_v0, %v1461_v56 }
 0x1c8   :  { %v1042_v30 = vld [vmem:[#allocation2 + $0x251] sm:$0x3f]  ;;  %v1019_v14 = vld [vmem:[#allocation2 + $0xe1] sm:$0x3f]  ;;  %v3689_v55 = vmul.f32 0.0010283801, %v939_v48 }
 0x1c9   :  { %v1020_v51 = vld [vmem:[#allocation2 + $0xf1] sm:$0x3f]  ;;  %v4730_v3 = vld [vmem:[#allocation50_spill] sm:$0xff]  ;;  %v1263_v8 = vld [vmem:[#allocation2 + $0x123] sm:$0x3f]  ;;  %v1223_v36 = vadd.f32 %v1183_v4, %v1103_v19 }
 0x1ca   :  { %v1217_v49 = vadd.f32 %v4730_v3, %v1097_v61  ;;  %v4731_v22 = vld [vmem:[#allocation26_spill] sm:$0xff]  ;;  %v3691_v12 = vmul.f32 0.0010283801, %v940_v24  ;;  %v4732_v33 = vld [vmem:[#allocation20_spill] sm:$0xff]  ;;  %v3695_v46 = vmul.f32 0.0010283801, %v962_v17 }
 0x1cb   :  { %v3687_v34 = vadd.f32 %v4731_v22, %v3547_v62  ;;  %v1357_v45 = vadd.f32 %v4732_v33, %v1237_v41  ;;  %v944_v43 = vld [vmem:[#allocation2 + $0x130] sm:$0x3f]  ;;  %v4733_v63 = vld [vmem:[#allocation55_spill] sm:$0xff]  ;;  %v1119_v62 = vadd.f32 %v3573_v5, %v3555_v60  ;;  %v1059_v9 = vmul.f32 0.007598758, %v1019_v14  ;;  %v4735_v41 = vld [vmem:[#allocation34_spill] sm:$0xff] }
 0x1cc   :  { %v1024_v57 = vld [vmem:[#allocation2 + $0x131] sm:$0x3f]  ;;  %v1161_v59 = vld [vmem:[#allocation2 + $0x242] sm:$0x3f]  ;;  %v3701_v61 = vmul.f32 0.007598758, %v1020_v51  ;;  %v3705_v47 = vadd.f32 %v4735_v41, %v3592_v20  ;;  %v1462_v60 = vadd.f32 %v1422_v29, %v1342_v25 }
 0x1cd   :  { %v4734_v35 = vld [vmem:[#allocation56_spill] sm:$0xff]  ;;  %v1139_v39 = vld [vmem:[#allocation2 + $0xe2] sm:$0x3f]  ;;  %v1303_v15 = vmul.f32 0.10936069, %v1263_v8  ;;  %v4738_v14 = vld [vmem:[#allocation21_spill] sm:$0xff] }
 0x1ce   :  { %v1098_v10 = vadd.f32 %v4734_v35, %v4733_v63  ;;  %v3708_v19 = vmul.f32 0.007598758, %v1042_v30  ;;  %v1140_v48 = vld [vmem:[#allocation2 + $0xf2] sm:$0x3f]  ;;  %v4736_v24 = vld [vmem:[#allocation44_spill] sm:$0xff]  ;;  %v3715_v51 = vadd.f32 %v4738_v14, %v1357_v45  ;;  %v4741_v30 = vld [vmem:[#allocation30_spill] sm:$0xff] }
 0x1cf   :  { %v3712_v17 = vadd.f32 %v4736_v24, %v3631_v13  ;;  %v1383_v5 = vld [vmem:[#allocation2 + $0x124] sm:$0x3f]  ;;  %v984_v52 = vmul.f32 0.0010283801, %v944_v43  ;;  %v1064_v4 = vmul.f32 0.007598758, %v1024_v57  ;;  %v1343_v3 = vadd.f32 %v1303_v15, %v1223_v36 }
 0x1d0   :  { %4739 = vst [vmem:[#allocation41_spill] sm:$0xff] %v3715_v51  ;;  %v1503_v20 = vld [vmem:[#allocation2 + $0x125] sm:$0x3f]  ;;  %v1162_v22 = vld [vmem:[#allocation2 + $0x252] sm:$0x3f]  ;;  %v1358_v8 = vadd.f32 %v4741_v30, %v1238_v21  ;;  %v1239_v13 = vadd.f32 %v3575_v54, %v1119_v62  ;;  %v1701_v36 = vadd.f32 %v3624_v40, %v1581_v28 }
 0x1d1   :  { %4737 = vst [vmem:[#allocation37_spill] sm:$0xff] %v3712_v17  ;;  %v1179_v33 = vmul.f32 0.036000773, %v1139_v39  ;;  %v4740_v0 = vld [vmem:[#allocation28_spill] sm:$0xff]  ;;  %v3719_v41 = vmul.f32 0.036000773, %v1140_v48  ;;  %v1582_v48 = vadd.f32 %v3664_v37, %v1462_v60  ;;  %v1104_v54 = vadd.f32 %v1064_v4, %v984_v52 }
 0x1d2   :  { %v1218_v56 = vadd.f32 %v4740_v0, %v1098_v10  ;;  %v1623_v63 = vld [vmem:[#allocation2 + $0x126] sm:$0x3f]  ;;  %v4742_v29 = vld [vmem:[#allocation29_spill] sm:$0xff]  ;;  %v1423_v57 = vmul.f32 0.21300554, %v1383_v5 }
 0x1d3   :  { %v1743_v35 = vld [vmem:[#allocation2 + $0x127] sm:$0x3f]  ;;  %v3724_v25 = vadd.f32 %v4742_v29, %v3647_v38  ;;  %v4743_v45 = vld [vmem:[#allocation45_spill] sm:$0xff]  ;;  %v3732_v15 = vmul.f32 0.036000773, %v1161_v59 }
 0x1d4   :  { %v3727_v43 = vadd.f32 %v4743_v45, %v1217_v49  ;;  %v1144_v39 = vld [vmem:[#allocation2 + $0x132] sm:$0x3f]  ;;  %v4744_v10 = vld [vmem:[#allocation40_spill] sm:$0xff]  ;;  %v1543_v24 = vmul.f32 0.26601171, %v1503_v20  ;;  %v1463_v38 = vadd.f32 %v1423_v57, %v1343_v3  ;;  %v4745_v40 = vld [vmem:[#allocation51_spill] sm:$0xff] }
 0x1d5   :  { %v1120_v21 = vadd.f32 %v4744_v10, %v3583_v16  ;;  %v1264_v62 = vld [vmem:[#allocation2 + $0x133] sm:$0x3f]  ;;  %v3735_v14 = vmul.f32 0.036000773, %v1162_v22  ;;  %v1663_v0 = vmul.f32 0.21300554, %v1623_v63  ;;  %v3740_v28 = vadd.f32 %v4745_v40, %v1218_v56 }
 0x1d6   :  { %v3737_v49 = vmul.f32 0.10936069, %v1743_v35  ;;  %v1384_v30 = vld [vmem:[#allocation2 + $0x134] sm:$0x3f]  ;;  %v1184_v5 = vmul.f32 0.036000773, %v1144_v39  ;;  %v1821_v56 = vadd.f32 %v3628_v31, %v1701_v36  ;;  %v1100_v31 = vadd.f32 %v3701_v61, %v3691_v12 }
 0x1d7   :  { %v1504_v29 = vld [vmem:[#allocation2 + $0x135] sm:$0x3f]  ;;  %v4747_v37 = vld [vmem:[#allocation31_spill] sm:$0xff]  ;;  %v1304_v3 = vmul.f32 0.10936069, %v1264_v62 }
 0x1d8   :  { %v1624_v16 = vld [vmem:[#allocation2 + $0x136] sm:$0x3f]  ;;  %v3747_v60 = vadd.f32 %v4747_v37, %v1239_v13  ;;  %v4749_v52 = vld [vmem:[#allocation39_spill] sm:$0xff]  ;;  %v1224_v10 = vadd.f32 %v1184_v5, %v1104_v54  ;;  %v1424_v13 = vmul.f32 0.21300554, %v1384_v30  ;;  %v1122_v30 = vadd.f32 %v3708_v19, %v3695_v46 }
 0x1d9   :  { %v4746_v59 = vld [vmem:[#allocation17_spill] sm:$0xff]  ;;  %v3750_v4 = vadd.f32 %v4749_v52, %v1358_v8  ;;  %v963_v20 = vld [vmem:[#allocation2 + $0x260] sm:$0x3f]  ;;  %v1099_v8 = vadd.f32 %v1059_v9, %v3689_v55  ;;  %v1583_v52 = vadd.f32 %v1543_v24, %v1463_v38  ;;  %v3762_v17 = vmul.f32 0.26601171, %v1504_v29  ;;  %v4756_v29 = vld [vmem:[#allocation52_spill] sm:$0xff] }
 0x1da   :  { %v3744_v45 = vadd.f32 %v4746_v59, %v3676_v27  ;;  %4748 = vst [vmem:[#allocation47_spill] sm:$0xff] %v3747_v60  ;;  %v1043_v22 = vld [vmem:[#allocation2 + $0x261] sm:$0x3f]  ;;  %v1702_v27 = vadd.f32 %v3668_v7, %v1582_v48  ;;  %v964_v40 = vld [vmem:[#allocation2 + $0x270] sm:$0x3f]  ;;  %v1121_v48 = vadd.f32 %v3654_v50, %v3636_v23  ;;  %v3777_v12 = vadd.f32 %v4756_v29, %v1821_v56 }
 0x1db   :  { %4750 = vst [vmem:[#allocation38_spill] sm:$0xff] %v3750_v4  ;;  %v4751_v63 = vld [vmem:[#allocation46_spill] sm:$0xff]  ;;  %v4752_v57 = vld [vmem:[#allocation19_spill] sm:$0xff]  ;;  %v1044_v59 = vld [vmem:[#allocation2 + $0x271] sm:$0x3f]  ;;  %v1344_v61 = vadd.f32 %v1304_v3, %v1224_v10  ;;  %v1703_v56 = vadd.f32 %v1663_v0, %v1583_v52  ;;  %v1242_v26 = vadd.f32 %v3735_v14, %v1122_v30 }
 0x1dc   :  { %v3753_v35 = vadd.f32 %v4751_v63, %v1120_v21  ;;  %v3758_v39 = vadd.f32 %v4752_v57, %v3687_v34  ;;  %v1259_v62 = vld [vmem:[#allocation2 + $0xe3] sm:$0x3f]  ;;  %v1280_v37 = vld [vmem:[#allocation2 + $0x233] sm:$0x3f]  ;;  %v3764_v21 = vmul.f32 0.21300554, %v1624_v16  ;;  %v1241_v32 = vadd.f32 %v3732_v15, %v1121_v48 }
 0x1dd   :  { %v1163_v34 = vld [vmem:[#allocation2 + $0x262] sm:$0x3f]  ;;  %v1260_v36 = vld [vmem:[#allocation2 + $0xf3] sm:$0x3f]  ;;  %v1003_v63 = vmul.f32 0.0010283801, %v963_v20  ;;  %v1219_v20 = vadd.f32 %v1179_v33, %v1099_v8 }
 0x1de   :  { %4753 = vst [vmem:[#allocation13_spill] sm:$0xff] %v3758_v39  ;;  %v1083_v7 = vmul.f32 0.007598758, %v1043_v22  ;;  %v1164_v54 = vld [vmem:[#allocation2 + $0x272] sm:$0x3f]  ;;  %v4754_v55 = vld [vmem:[#allocation27_spill] sm:$0xff] }
 0x1df   :  { %v3772_v9 = vadd.f32 %v4754_v55, %v3705_v47  ;;  %v1004_v24 = vmul.f32 0.0010283801, %v964_v40  ;;  %v1084_v38 = vmul.f32 0.007598758, %v1044_v59  ;;  %v1281_v5 = vld [vmem:[#allocation2 + $0x243] sm:$0x3f]  ;;  %v1822_v47 = vadd.f32 %v3673_v1, %v1702_v27 }
 0x1e0   :  { %4757 = vst [vmem:[#allocation59_spill] sm:$0xff] %v3777_v12  ;;  %v1203_v16 = vmul.f32 0.036000773, %v1163_v34  ;;  %v1282_v22 = vld [vmem:[#allocation2 + $0x253] sm:$0x3f]  ;;  %v1220_v40 = vadd.f32 %v3719_v41, %v1100_v31  ;;  %v1123_v29 = vadd.f32 %v1083_v7, %v1003_v63 }
 0x1e1   :  { %4755 = vst [vmem:[#allocation53_spill] sm:$0xff] %v3772_v9  ;;  %v1283_v57 = vld [vmem:[#allocation2 + $0x263] sm:$0x3f]  ;;  %v1368_v23 = vld [vmem:[#allocation2 + $0x34] sm:$0x3f]  ;;  %v1124_v12 = vadd.f32 %v1084_v38, %v1004_v24 }
 0x1e2   :  { %v1369_v50 = vld [vmem:[#allocation2 + $0x44] sm:$0x3f]  ;;  %v1370_v39 = vld [vmem:[#allocation2 + $0x54] sm:$0x3f]  ;;  %v1204_v55 = vmul.f32 0.036000773, %v1164_v54 }
 0x1e3   :  { %v1284_v59 = vld [vmem:[#allocation2 + $0x273] sm:$0x3f]  ;;  %v1299_v9 = vmul.f32 0.10936069, %v1259_v62  ;;  %v1371_v46 = vld [vmem:[#allocation2 + $0x64] sm:$0x3f]  ;;  %v1464_v62 = vadd.f32 %v1424_v13, %v1344_v61 }
 0x1e4   :  { %v1372_v19 = vld [vmem:[#allocation2 + $0x74] sm:$0x3f]  ;;  %v1300_v3 = vmul.f32 0.10936069, %v1260_v36  ;;  %v1320_v10 = vmul.f32 0.10936069, %v1280_v37  ;;  %v3784_v37 = vadd.f32 %v3659_v53, %v1822_v47 }
 0x1e5   :  { %v1376_v2 = vld [vmem:[#allocation2 + $0xb4] sm:$0x3f]  ;;  %v1321_v33 = vmul.f32 0.10936069, %v1281_v5  ;;  %v1377_v8 = vld [vmem:[#allocation2 + $0xc4] sm:$0x3f]  ;;  %v3787_v5 = vadd.f32 %v3737_v49, %v1703_v56 }
 0x1e6   :  { %v1378_v34 = vld [vmem:[#allocation2 + $0xd4] sm:$0x3f]  ;;  %v1322_v11 = vmul.f32 0.10936069, %v1282_v22  ;;  %v1323_v1 = vmul.f32 0.10936069, %v1283_v57  ;;  %v1243_v22 = vadd.f32 %v1203_v16, %v1123_v29  ;;  %v1340_v56 = vadd.f32 %v1300_v3, %v1220_v40 }
 0x1e7   :  { %v1379_v27 = vld [vmem:[#allocation2 + $0xe4] sm:$0x3f]  ;;  %v1388_v41 = vld [vmem:[#allocation2 + $0x174] sm:$0x3f]  ;;  %v1324_v4 = vmul.f32 0.10936069, %v1284_v59  ;;  %v1244_v59 = vadd.f32 %v1204_v55, %v1124_v12 }
 0x1e8   :  { %v1387_v54 = vld [vmem:[#allocation2 + $0x164] sm:$0x3f]  ;;  %v1380_v0 = vld [vmem:[#allocation2 + $0xf4] sm:$0x3f]  ;;  %4758 = vst [vmem:[#allocation62_spill] sm:$0xff] %v3784_v37  ;;  %4759 = vst [vmem:[#allocation67_spill] sm:$0xff] %v3787_v5 }
 0x1e9   :  { %v1399_v31 = vld [vmem:[#allocation2 + $0x224] sm:$0x3f]  ;;  %v1396_v36 = vld [vmem:[#allocation2 + $0x1f4] sm:$0x3f]  ;;  %v1408_v15 = vmul.f32 0.21300554, %v1368_v23  ;;  %v1584_v23 = vadd.f32 %v3762_v17, %v1464_v62 }
 0x1ea   :  { %v1395_v52 = vld [vmem:[#allocation2 + $0x1e4] sm:$0x3f]  ;;  %v1400_v63 = vld [vmem:[#allocation2 + $0x234] sm:$0x3f]  ;;  %v1409_v48 = vmul.f32 0.21300554, %v1369_v50  ;;  %v1339_v50 = vadd.f32 %v1299_v9, %v1219_v20 }
 0x1eb   :  { %v1401_v7 = vld [vmem:[#allocation2 + $0x244] sm:$0x3f]  ;;  %v1402_v24 = vld [vmem:[#allocation2 + $0x254] sm:$0x3f]  ;;  %v1410_v38 = vmul.f32 0.21300554, %v1370_v39  ;;  %v3794_v20 = vadd.f32 %v3764_v21, %v1584_v23 }
 0x1ec   :  { %v1403_v13 = vld [vmem:[#allocation2 + $0x264] sm:$0x3f]  ;;  %v1404_v61 = vld [vmem:[#allocation2 + $0x274] sm:$0x3f]  ;;  %v1411_v14 = vmul.f32 0.21300554, %v1371_v46  ;;  %v1360_v46 = vadd.f32 %v1320_v10, %v3753_v35 }
 0x1ed   :  { %v1412_v30 = vmul.f32 0.21300554, %v1372_v19  ;;  %v1416_v57 = vmul.f32 0.21300554, %v1376_v2  ;;  %v1417_v51 = vmul.f32 0.21300554, %v1377_v8  ;;  %v1361_v2 = vadd.f32 %v1321_v33, %v1241_v32 }
 0x1ee   :  { %v1418_v42 = vmul.f32 0.21300554, %v1378_v34  ;;  %v1419_v53 = vmul.f32 0.21300554, %v1379_v27  ;;  %v1420_v47 = vmul.f32 0.21300554, %v1380_v0  ;;  %v1362_v8 = vadd.f32 %v1322_v11, %v1242_v26 }
 0x1ef   :  { %v1427_v37 = vmul.f32 0.21300554, %v1387_v54  ;;  %v1428_v6 = vmul.f32 0.21300554, %v1388_v41  ;;  %v1435_v39 = vmul.f32 0.21300554, %v1395_v52  ;;  %v1363_v34 = vadd.f32 %v1323_v1, %v1243_v22 }
 0x1f0   :  { %v1436_v60 = vmul.f32 0.21300554, %v1396_v36  ;;  %v1439_v49 = vmul.f32 0.21300554, %v1399_v31  ;;  %v1440_v16 = vmul.f32 0.21300554, %v1400_v63  ;;  %v1364_v27 = vadd.f32 %v1324_v4, %v1244_v59 }
 0x1f1   :  { %v1441_v29 = vmul.f32 0.21300554, %v1401_v7  ;;  %v1442_v5 = vmul.f32 0.21300554, %v1402_v24  ;;  %v1443_v12 = vmul.f32 0.21300554, %v1403_v13  ;;  %v3806_v10 = vadd.f32 %v1411_v14, %v3650_v58 }
 0x1f2   :  { %v3791_v55 = vmul.f32 0.21300554, %v1404_v61  ;;  %v1487_v19 = vld [vmem:[#allocation2 + $0x25] sm:$0x3f]  ;;  %v1488_v54 = vld [vmem:[#allocation2 + $0x35] sm:$0x3f]  ;;  %v3809_v33 = vadd.f32 %v1412_v30, %v3724_v25  ;;  %v3812_v21 = vadd.f32 %v1416_v57, %v3679_v18  ;;  %v3815_v1 = vadd.f32 %v1417_v51, %v3727_v43 }
 0x1f3   :  { %v1489_v17 = vld [vmem:[#allocation2 + $0x45] sm:$0x3f]  ;;  %v1490_v9 = vld [vmem:[#allocation2 + $0x55] sm:$0x3f]  ;;  %4760 = vst [vmem:[#allocation14_spill] sm:$0xff] %v3794_v20  ;;  %v3818_v62 = vadd.f32 %v1418_v42, %v3740_v28  ;;  %v3820_v58 = vadd.f32 %v1419_v53, %v1339_v50  ;;  %v3822_v63 = vadd.f32 %v1420_v47, %v1340_v56  ;;  %v3831_v43 = vadd.f32 %v1435_v39, %v3682_v44 }
 0x1f4   :  { %v4761_v40 = vld [vmem:[#allocation74_spill] sm:$0xff]  ;;  %v4762_v41 = vld [vmem:[#allocation57_spill] sm:$0xff]  ;;  %v1491_v26 = vld [vmem:[#allocation2 + $0x65] sm:$0x3f]  ;;  %v3834_v42 = vadd.f32 %v1436_v60, %v3744_v45  ;;  %v3839_v30 = vadd.f32 %v1440_v16, %v1360_v46  ;;  %v1528_v59 = vmul.f32 0.26601171, %v1488_v54  ;;  %v3841_v23 = vadd.f32 %v1441_v29, %v1361_v2 }
 0x1f5   :  { %v3797_v3 = vadd.f32 %v1408_v15, %v4761_v40  ;;  %v3800_v31 = vadd.f32 %v1409_v48, %v4762_v41  ;;  %v4763_v32 = vld [vmem:[#allocation22_spill] sm:$0xff]  ;;  %v1495_v4 = vld [vmem:[#allocation2 + $0xa5] sm:$0x3f]  ;;  %v4764_v7 = vld [vmem:[#allocation73_spill] sm:$0xff]  ;;  %v1529_v53 = vmul.f32 0.26601171, %v1489_v17  ;;  %v3843_v56 = vadd.f32 %v1442_v5, %v1362_v8 }
 0x1f6   :  { %v3803_v35 = vadd.f32 %v1410_v38, %v4763_v32  ;;  %v1492_v11 = vld [vmem:[#allocation2 + $0x75] sm:$0x3f]  ;;  %v1497_v52 = vld [vmem:[#allocation2 + $0xc5] sm:$0x3f]  ;;  %v3825_v24 = vadd.f32 %v1427_v37, %v4764_v7  ;;  %v1527_v37 = vmul.f32 0.26601171, %v1487_v19  ;;  %v1483_v7 = vadd.f32 %v1443_v12, %v1363_v34 }
 0x1f7   :  { %v1496_v0 = vld [vmem:[#allocation2 + $0xb5] sm:$0x3f]  ;;  %v1499_v18 = vld [vmem:[#allocation2 + $0xe5] sm:$0x3f]  ;;  %v1530_v47 = vmul.f32 0.26601171, %v1490_v9  ;;  %v3846_v29 = vadd.f32 %v3791_v55, %v1364_v27  ;;  %v3852_v12 = vadd.f32 %v1528_v59, %v3797_v3  ;;  %v3855_v55 = vadd.f32 %v1529_v53, %v3800_v31 }
 0x1f8   :  { %v1498_v36 = vld [vmem:[#allocation2 + $0xd5] sm:$0x3f]  ;;  %v4766_v28 = vld [vmem:[#allocation47_spill] sm:$0xff]  ;;  %v1531_v50 = vmul.f32 0.26601171, %v1491_v26  ;;  %v4768_v3 = vld [vmem:[#allocation36_spill] sm:$0xff] }
 0x1f9   :  { %v4765_v25 = vld [vmem:[#allocation18_spill] sm:$0xff]  ;;  %v3837_v38 = vadd.f32 %v1439_v49, %v4766_v28  ;;  %v1507_v22 = vld [vmem:[#allocation2 + $0x165] sm:$0x3f]  ;;  %v1532_v39 = vmul.f32 0.26601171, %v1492_v11 }
 0x1fa   :  { %v3828_v15 = vadd.f32 %v1428_v6, %v4765_v25  ;;  %v1500_v48 = vld [vmem:[#allocation2 + $0xf5] sm:$0x3f]  ;;  %v1517_v14 = vld [vmem:[#allocation2 + $0x205] sm:$0x3f]  ;;  %v1535_v49 = vmul.f32 0.26601171, %v1495_v4 }
 0x1fb   :  { %v1506_v51 = vld [vmem:[#allocation2 + $0x155] sm:$0x3f]  ;;  %v1515_v6 = vld [vmem:[#allocation2 + $0x1e5] sm:$0x3f]  ;;  %v1536_v16 = vmul.f32 0.26601171, %v1496_v0 }
 0x1fc   :  { %v1508_v13 = vld [vmem:[#allocation2 + $0x175] sm:$0x3f]  ;;  %v1519_v45 = vld [vmem:[#allocation2 + $0x225] sm:$0x3f]  ;;  %v1537_v46 = vmul.f32 0.26601171, %v1497_v52 }
 0x1fd   :  { %v1514_v61 = vld [vmem:[#allocation2 + $0x1d5] sm:$0x3f]  ;;  %v1521_v40 = vld [vmem:[#allocation2 + $0x245] sm:$0x3f]  ;;  %v1538_v32 = vmul.f32 0.26601171, %v1498_v36 }
 0x1fe   :  { %v1516_v57 = vld [vmem:[#allocation2 + $0x1f5] sm:$0x3f]  ;;  %v1523_v41 = vld [vmem:[#allocation2 + $0x265] sm:$0x3f]  ;;  %v1539_v17 = vmul.f32 0.26601171, %v1499_v18  ;;  %v3873_v31 = vadd.f32 %v1537_v46, %v3815_v1 }
 0x1ff   :  { %v1518_v44 = vld [vmem:[#allocation2 + $0x215] sm:$0x3f]  ;;  %v1540_v9 = vmul.f32 0.26601171, %v1500_v48  ;;  %v1546_v25 = vmul.f32 0.26601171, %v1506_v51  ;;  %v3858_v51 = vadd.f32 %v1530_v47, %v3803_v35  ;;  %v3876_v35 = vadd.f32 %v1538_v32, %v3818_v62 }
 0x200   :  { %v1520_v60 = vld [vmem:[#allocation2 + $0x235] sm:$0x3f]  ;;  %v1547_v2 = vmul.f32 0.26601171, %v1507_v22  ;;  %v1548_v26 = vmul.f32 0.26601171, %v1508_v13  ;;  %v3861_v22 = vadd.f32 %v1531_v50, %v3806_v10  ;;  %v3864_v13 = vadd.f32 %v1532_v39, %v3809_v33 }
 0x201   :  { %v1522_v19 = vld [vmem:[#allocation2 + $0x255] sm:$0x3f]  ;;  %v1554_v11 = vmul.f32 0.26601171, %v1514_v61  ;;  %v1555_v4 = vmul.f32 0.26601171, %v1515_v6  ;;  %v3870_v6 = vadd.f32 %v1536_v16, %v3812_v21  ;;  %v3879_v33 = vadd.f32 %v1539_v17, %v3820_v58 }
 0x202   :  { %v1524_v54 = vld [vmem:[#allocation2 + $0x275] sm:$0x3f]  ;;  %v1556_v5 = vmul.f32 0.26601171, %v1516_v57  ;;  %v1557_v8 = vmul.f32 0.26601171, %v1517_v14  ;;  %v3867_v14 = vadd.f32 %v1535_v49, %v4768_v3  ;;  %v3882_v53 = vadd.f32 %v1540_v9, %v3822_v63 }
 0x203   :  { %v4767_v28 = vld [vmem:[#allocation23_spill] sm:$0xff]  ;;  %v1558_v0 = vmul.f32 0.26601171, %v1518_v44  ;;  %v1559_v52 = vmul.f32 0.26601171, %v1519_v45  ;;  %v3888_v21 = vadd.f32 %v1547_v2, %v3825_v24  ;;  %v3891_v62 = vadd.f32 %v1548_v26, %v3828_v15  ;;  %v4770_v50 = vld [vmem:[#allocation66_spill] sm:$0xff] }
 0x204   :  { %v3849_v20 = vadd.f32 %v1527_v37, %v4767_v28  ;;  %v1560_v36 = vmul.f32 0.26601171, %v1520_v60  ;;  %v1561_v34 = vmul.f32 0.26601171, %v1521_v40  ;;  %v1562_v18 = vmul.f32 0.26601171, %v1522_v19 }
 0x205   :  { %v1563_v48 = vmul.f32 0.26601171, %v1523_v41  ;;  %v1564_v27 = vmul.f32 0.26601171, %v1524_v54  ;;  %v1605_v61 = vld [vmem:[#allocation2 + $0x6] sm:$0x3f]  ;;  %v3894_v39 = vadd.f32 %v1554_v11, %v4770_v50  ;;  %v3897_v58 = vadd.f32 %v1555_v4, %v3831_v43 }
 0x206   :  { %v1606_v37 = vld [vmem:[#allocation2 + $0x16] sm:$0x3f]  ;;  %v1607_v57 = vld [vmem:[#allocation2 + $0x26] sm:$0x3f]  ;;  %v3900_v63 = vadd.f32 %v1556_v5, %v3834_v42  ;;  %v3909_v15 = vadd.f32 %v1559_v52, %v3837_v38  ;;  %v3912_v32 = vadd.f32 %v1560_v36, %v3839_v30  ;;  %v3915_v42 = vadd.f32 %v1561_v34, %v3841_v23 }
 0x207   :  { %v1608_v10 = vld [vmem:[#allocation2 + $0x36] sm:$0x3f]  ;;  %v1609_v59 = vld [vmem:[#allocation2 + $0x46] sm:$0x3f]  ;;  %v3918_v9 = vadd.f32 %v1562_v18, %v3843_v56  ;;  %v1645_v11 = vmul.f32 0.21300554, %v1605_v61  ;;  %v3920_v5 = vadd.f32 %v1563_v48, %v1483_v7  ;;  %v3923_v36 = vadd.f32 %v1564_v27, %v3846_v29 }
 0x208   :  { %v4769_v47 = vld [vmem:[#allocation15_spill] sm:$0xff]  ;;  %v1610_v1 = vld [vmem:[#allocation2 + $0x56] sm:$0x3f]  ;;  %4773 = vst [vmem:[#allocation33_spill] sm:$0xff] %v3909_v15  ;;  %4774 = vst [vmem:[#allocation70_spill] sm:$0xff] %v3912_v32 }
 0x209   :  { %v3885_v44 = vadd.f32 %v1546_v25, %v4769_v47  ;;  %v1611_v45 = vld [vmem:[#allocation2 + $0x66] sm:$0x3f]  ;;  %v1612_v60 = vld [vmem:[#allocation2 + $0x76] sm:$0x3f]  ;;  %4775 = vst [vmem:[#allocation42_spill] sm:$0xff] %v3915_v42  ;;  %4776 = vst [vmem:[#allocation16_spill] sm:$0xff] %v3918_v9 }
 0x20a   :  { %v1613_v49 = vld [vmem:[#allocation2 + $0x86] sm:$0x3f]  ;;  %v1614_v40 = vld [vmem:[#allocation2 + $0x96] sm:$0x3f]  ;;  %v1646_v4 = vmul.f32 0.21300554, %v1606_v37 }
 0x20b   :  { %v1615_v19 = vld [vmem:[#allocation2 + $0xa6] sm:$0x3f]  ;;  %v4771_v24 = vld [vmem:[#allocation41_spill] sm:$0xff]  ;;  %v4772_v16 = vld [vmem:[#allocation38_spill] sm:$0xff]  ;;  %4777 = vst [vmem:[#allocation48_spill] sm:$0xff] %v3920_v5 }
 0x20c   :  { %v3903_v41 = vadd.f32 %v1557_v8, %v4771_v24  ;;  %v3906_v46 = vadd.f32 %v1558_v0, %v4772_v16  ;;  %v1616_v43 = vld [vmem:[#allocation2 + $0xb6] sm:$0x3f]  ;;  %v1617_v54 = vld [vmem:[#allocation2 + $0xc6] sm:$0x3f]  ;;  %v1647_v28 = vmul.f32 0.21300554, %v1607_v57 }
 0x20d   :  { %v1618_v17 = vld [vmem:[#allocation2 + $0xd6] sm:$0x3f]  ;;  %v1619_v25 = vld [vmem:[#allocation2 + $0xe6] sm:$0x3f]  ;;  %v1648_v0 = vmul.f32 0.21300554, %v1608_v10 }
 0x20e   :  { %v1620_v2 = vld [vmem:[#allocation2 + $0xf6] sm:$0x3f]  ;;  %v1625_v26 = vld [vmem:[#allocation2 + $0x146] sm:$0x3f]  ;;  %v1649_v52 = vmul.f32 0.21300554, %v1609_v59 }
 0x20f   :  { %v1626_v38 = vld [vmem:[#allocation2 + $0x156] sm:$0x3f]  ;;  %v1627_v8 = vld [vmem:[#allocation2 + $0x166] sm:$0x3f]  ;;  %4778 = vst [vmem:[#allocation68_spill] sm:$0xff] %v3923_v36 }
 0x210   :  { %v1628_v30 = vld [vmem:[#allocation2 + $0x176] sm:$0x3f]  ;;  %v1633_v23 = vld [vmem:[#allocation2 + $0x1c6] sm:$0x3f]  ;;  %v1650_v18 = vmul.f32 0.21300554, %v1610_v1 }
 0x211   :  { %v1634_v34 = vld [vmem:[#allocation2 + $0x1d6] sm:$0x3f]  ;;  %v1635_v56 = vld [vmem:[#allocation2 + $0x1e6] sm:$0x3f]  ;;  %v1651_v3 = vmul.f32 0.21300554, %v1611_v45 }
 0x212   :  { %v1652_v47 = vmul.f32 0.21300554, %v1612_v60  ;;  %v1636_v50 = vld [vmem:[#allocation2 + $0x1f6] sm:$0x3f]  ;;  %v1637_v61 = vld [vmem:[#allocation2 + $0x206] sm:$0x3f] }
 0x213   :  { %v1638_v37 = vld [vmem:[#allocation2 + $0x216] sm:$0x3f]  ;;  %v1653_v7 = vmul.f32 0.21300554, %v1613_v49  ;;  %v1654_v48 = vmul.f32 0.21300554, %v1614_v40  ;;  %v3932_v40 = vadd.f32 %v1647_v28, %v3849_v20 }
 0x214   :  { %v1655_v24 = vmul.f32 0.21300554, %v1615_v19  ;;  %v4779_v16 = vld [vmem:[#allocation24_spill] sm:$0xff]  ;;  %v1640_v10 = vld [vmem:[#allocation2 + $0x236] sm:$0x3f] }
 0x215   :  { %v3926_v5 = vadd.f32 %v1645_v11, %v4779_v16  ;;  %v1639_v57 = vld [vmem:[#allocation2 + $0x226] sm:$0x3f]  ;;  %v1656_v29 = vmul.f32 0.21300554, %v1616_v43  ;;  %v1657_v27 = vmul.f32 0.21300554, %v1617_v54 }
 0x216   :  { %v1641_v59 = vld [vmem:[#allocation2 + $0x246] sm:$0x3f]  ;;  %v1658_v36 = vmul.f32 0.21300554, %v1618_v17  ;;  %v4781_v9 = vld [vmem:[#allocation58_spill] sm:$0xff] }
 0x217   :  { %4780 = vst [vmem:[#allocation63_spill] sm:$0xff] %v3926_v5  ;;  %v3929_v42 = vadd.f32 %v1646_v4, %v4781_v9  ;;  %v1642_v1 = vld [vmem:[#allocation2 + $0x256] sm:$0x3f]  ;;  %v1643_v45 = vld [vmem:[#allocation2 + $0x266] sm:$0x3f]  ;;  %v3935_v5 = vadd.f32 %v1648_v0, %v3852_v12  ;;  %v3938_v9 = vadd.f32 %v1649_v52, %v3855_v55  ;;  %v3947_v0 = vadd.f32 %v1652_v47, %v3864_v13 }
 0x218   :  { %v1644_v60 = vld [vmem:[#allocation2 + $0x276] sm:$0x3f]  ;;  %v1659_v32 = vmul.f32 0.21300554, %v1619_v25  ;;  %v1660_v15 = vmul.f32 0.21300554, %v1620_v2  ;;  %v3941_v2 = vadd.f32 %v1650_v18, %v3858_v51  ;;  %v3956_v51 = vadd.f32 %v1655_v24, %v3867_v14 }
 0x219   :  { %4782 = vst [vmem:[#allocation54_spill] sm:$0xff] %v3929_v42  ;;  %v1665_v49 = vmul.f32 0.21300554, %v1625_v26  ;;  %v1666_v19 = vmul.f32 0.21300554, %v1626_v38  ;;  %v4783_v55 = vld [vmem:[#allocation25_spill] sm:$0xff]  ;;  %v3965_v13 = vadd.f32 %v1658_v36, %v3876_v35 }
 0x21a   :  { %v1667_v11 = vmul.f32 0.21300554, %v1627_v8  ;;  %v1668_v16 = vmul.f32 0.21300554, %v1628_v30  ;;  %v1673_v43 = vmul.f32 0.21300554, %v1633_v23  ;;  %v3944_v8 = vadd.f32 %v1651_v3, %v3861_v22 }
 0x21b   :  { %v1674_v54 = vmul.f32 0.21300554, %v1634_v34  ;;  %v1675_v17 = vmul.f32 0.21300554, %v1635_v56  ;;  %v1676_v4 = vmul.f32 0.21300554, %v1636_v50  ;;  %v3950_v52 = vadd.f32 %v1653_v7, %v4783_v55 }
 0x21c   :  { %v1677_v42 = vmul.f32 0.21300554, %v1637_v61  ;;  %v1678_v25 = vmul.f32 0.21300554, %v1638_v37  ;;  %v1679_v20 = vmul.f32 0.21300554, %v1639_v57  ;;  %v3959_v56 = vadd.f32 %v1656_v29, %v3870_v6 }
 0x21d   :  { %v1680_v26 = vmul.f32 0.21300554, %v1640_v10  ;;  %v1681_v38 = vmul.f32 0.21300554, %v1641_v59  ;;  %v1682_v12 = vmul.f32 0.21300554, %v1642_v1  ;;  %v3962_v3 = vadd.f32 %v1657_v27, %v3873_v31 }
 0x21e   :  { %v1683_v30 = vmul.f32 0.21300554, %v1643_v45  ;;  %v1684_v28 = vmul.f32 0.21300554, %v1644_v60  ;;  %v4784_v23 = vld [vmem:[#allocation32_spill] sm:$0xff]  ;;  %v3968_v47 = vadd.f32 %v1659_v32, %v3879_v33  ;;  %v3971_v50 = vadd.f32 %v1660_v15, %v3882_v53  ;;  %v4785_v7 = vld [vmem:[#allocation35_spill] sm:$0xff] }
 0x21f   :  { %v3953_v34 = vadd.f32 %v1654_v48, %v4784_v23  ;;  %v1725_v22 = vld [vmem:[#allocation2 + $0x7] sm:$0x3f]  ;;  %v1726_v18 = vld [vmem:[#allocation2 + $0x17] sm:$0x3f]  ;;  %v3974_v6 = vadd.f32 %v1665_v49, %v4785_v7  ;;  %v3977_v48 = vadd.f32 %v1666_v19, %v3885_v44  ;;  %v3980_v31 = vadd.f32 %v1667_v11, %v3888_v21 }
 0x220   :  { %v1727_v61 = vld [vmem:[#allocation2 + $0x27] sm:$0x3f]  ;;  %v1728_v14 = vld [vmem:[#allocation2 + $0x37] sm:$0x3f]  ;;  %v3983_v35 = vadd.f32 %v1668_v16, %v3891_v62  ;;  %v3989_v24 = vadd.f32 %v1674_v54, %v3894_v39  ;;  %v3992_v57 = vadd.f32 %v1675_v17, %v3897_v58  ;;  %v3995_v44 = vadd.f32 %v1676_v4, %v3900_v63 }
 0x221   :  { %v1729_v37 = vld [vmem:[#allocation2 + $0x47] sm:$0x3f]  ;;  %v1730_v33 = vld [vmem:[#allocation2 + $0x57] sm:$0x3f]  ;;  %v3998_v62 = vadd.f32 %v1677_v42, %v3903_v41  ;;  %v4001_v29 = vadd.f32 %v1678_v25, %v3906_v46  ;;  %v1765_v46 = vmul.f32 0.10936069, %v1725_v22 }
 0x222   :  { %v1731_v32 = vld [vmem:[#allocation2 + $0x67] sm:$0x3f]  ;;  %v1732_v36 = vld [vmem:[#allocation2 + $0x77] sm:$0x3f]  ;;  %4787 = vst [vmem:[#allocation60_spill] sm:$0xff] %v3989_v24  ;;  %4788 = vst [vmem:[#allocation43_spill] sm:$0xff] %v3992_v57 }
 0x223   :  { %v4786_v53 = vld [vmem:[#allocation61_spill] sm:$0xff]  ;;  %4789 = vst [vmem:[#allocation49_spill] sm:$0xff] %v3995_v44  ;;  %v1733_v21 = vld [vmem:[#allocation2 + $0x87] sm:$0x3f]  ;;  %4790 = vst [vmem:[#allocation69_spill] sm:$0xff] %v3998_v62 }
 0x224   :  { %v3986_v15 = vadd.f32 %v1673_v43, %v4786_v53  ;;  %v1734_v10 = vld [vmem:[#allocation2 + $0x97] sm:$0x3f]  ;;  %v1735_v59 = vld [vmem:[#allocation2 + $0xa7] sm:$0x3f]  ;;  %4791 = vst [vmem:[#allocation64_spill] sm:$0xff] %v4001_v29 }
 0x225   :  { %v4792_v27 = vld [vmem:[#allocation33_spill] sm:$0xff]  ;;  %v4794_v39 = vld [vmem:[#allocation70_spill] sm:$0xff]  ;;  %v1737_v60 = vld [vmem:[#allocation2 + $0xc7] sm:$0x3f]  ;;  %v1766_v54 = vmul.f32 0.10936069, %v1726_v18 }
 0x226   :  { %v4004_v1 = vadd.f32 %v1679_v20, %v4792_v27  ;;  %v4007_v45 = vadd.f32 %v1680_v26, %v4794_v39  ;;  %v1736_v58 = vld [vmem:[#allocation2 + $0xb7] sm:$0x3f]  ;;  %v4798_v11 = vld [vmem:[#allocation16_spill] sm:$0xff]  ;;  %v1767_v55 = vmul.f32 0.10936069, %v1727_v61 }
 0x227   :  { %v1738_v49 = vld [vmem:[#allocation2 + $0xd7] sm:$0x3f]  ;;  %v4013_v16 = vadd.f32 %v1682_v12, %v4798_v11  ;;  %v1739_v41 = vld [vmem:[#allocation2 + $0xe7] sm:$0x3f]  ;;  %v1768_v23 = vmul.f32 0.10936069, %v1728_v14 }
 0x228   :  { %4793 = vst [vmem:[#allocation71_spill] sm:$0xff] %v4004_v1  ;;  %4795 = vst [vmem:[#allocation72_spill] sm:$0xff] %v4007_v45  ;;  %v4796_v63 = vld [vmem:[#allocation42_spill] sm:$0xff]  ;;  %v4800_v17 = vld [vmem:[#allocation48_spill] sm:$0xff]  ;;  %v1769_v7 = vmul.f32 0.10936069, %v1729_v37 }
 0x229   :  { %v4010_v19 = vadd.f32 %v1681_v38, %v4796_v63  ;;  %4799 = vst [vmem:[#allocation26_spill] sm:$0xff] %v4013_v16  ;;  %v1740_v42 = vld [vmem:[#allocation2 + $0xf7] sm:$0x3f]  ;;  %v4016_v4 = vadd.f32 %v1683_v30, %v4800_v17  ;;  %v1745_v25 = vld [vmem:[#allocation2 + $0x147] sm:$0x3f] }
 0x22a   :  { %v1744_v43 = vld [vmem:[#allocation2 + $0x137] sm:$0x3f]  ;;  %v1747_v26 = vld [vmem:[#allocation2 + $0x167] sm:$0x3f]  ;;  %v1770_v63 = vmul.f32 0.10936069, %v1730_v33 }
 0x22b   :  { %4797 = vst [vmem:[#allocation50_spill] sm:$0xff] %v4010_v19  ;;  %4801 = vst [vmem:[#allocation20_spill] sm:$0xff] %v4016_v4  ;;  %v1746_v20 = vld [vmem:[#allocation2 + $0x157] sm:$0x3f]  ;;  %v4802_v53 = vld [vmem:[#allocation68_spill] sm:$0xff] }
 0x22c   :  { %v4019_v38 = vadd.f32 %v1684_v28, %v4802_v53  ;;  %v1748_v27 = vld [vmem:[#allocation2 + $0x177] sm:$0x3f]  ;;  %v1753_v39 = vld [vmem:[#allocation2 + $0x1c7] sm:$0x3f]  ;;  %v1771_v11 = vmul.f32 0.10936069, %v1731_v32 }
 0x22d   :  { %v1752_v12 = vld [vmem:[#allocation2 + $0x1b7] sm:$0x3f]  ;;  %v1772_v16 = vmul.f32 0.10936069, %v1732_v36  ;;  %v1755_v18 = vld [vmem:[#allocation2 + $0x1e7] sm:$0x3f] }
 0x22e   :  { %4803 = vst [vmem:[#allocation55_spill] sm:$0xff] %v4019_v38  ;;  %v1754_v22 = vld [vmem:[#allocation2 + $0x1d7] sm:$0x3f]  ;;  %v1773_v30 = vmul.f32 0.10936069, %v1733_v21  ;;  %v4804_v45 = vld [vmem:[#allocation63_spill] sm:$0xff] }
 0x22f   :  { %v1756_v19 = vld [vmem:[#allocation2 + $0x1f7] sm:$0x3f]  ;;  %v1774_v17 = vmul.f32 0.10936069, %v1734_v10  ;;  %v1775_v4 = vmul.f32 0.10936069, %v1735_v59  ;;  %v4022_v1 = vadd.f32 %v1765_v46, %v4804_v45  ;;  %v4028_v10 = vadd.f32 %v1767_v55, %v3932_v40 }
 0x230   :  { %v1757_v61 = vld [vmem:[#allocation2 + $0x207] sm:$0x3f]  ;;  %v1758_v14 = vld [vmem:[#allocation2 + $0x217] sm:$0x3f]  ;;  %v1776_v28 = vmul.f32 0.10936069, %v1736_v58  ;;  %v4031_v58 = vadd.f32 %v1768_v23, %v3935_v5  ;;  %v4037_v40 = vadd.f32 %v1770_v63, %v3941_v2 }
 0x231   :  { %4805 = vst [vmem:[#allocation56_spill] sm:$0xff] %v4022_v1  ;;  %v1759_v37 = vld [vmem:[#allocation2 + $0x227] sm:$0x3f]  ;;  %v1777_v53 = vmul.f32 0.10936069, %v1737_v60  ;;  %v4806_v29 = vld [vmem:[#allocation54_spill] sm:$0xff]  ;;  %v4049_v2 = vadd.f32 %v1774_v17, %v3953_v34 }
 0x232   :  { %v1778_v38 = vmul.f32 0.10936069, %v1738_v49  ;;  %v4025_v62 = vadd.f32 %v1766_v54, %v4806_v29  ;;  %v1760_v33 = vld [vmem:[#allocation2 + $0x237] sm:$0x3f]  ;;  %v1761_v32 = vld [vmem:[#allocation2 + $0x247] sm:$0x3f]  ;;  %v4034_v54 = vadd.f32 %v1769_v7, %v3938_v9 }
 0x233   :  { %v1762_v36 = vld [vmem:[#allocation2 + $0x257] sm:$0x3f]  ;;  %v1779_v44 = vmul.f32 0.10936069, %v1739_v41  ;;  %v1780_v57 = vmul.f32 0.10936069, %v1740_v42 }
 0x234   :  { %v1784_v21 = vmul.f32 0.10936069, %v1744_v43  ;;  %4807 = vst [vmem:[#allocation34_spill] sm:$0xff] %v4028_v10  ;;  %v1763_v59 = vld [vmem:[#allocation2 + $0x267] sm:$0x3f]  ;;  %v4808_v34 = vld [vmem:[#allocation14_spill] sm:$0xff] }
 0x235   :  { %v1764_v45 = vld [vmem:[#allocation2 + $0x277] sm:$0x3f]  ;;  %v1785_v46 = vmul.f32 0.10936069, %v1745_v25  ;;  %v1786_v1 = vmul.f32 0.10936069, %v1746_v20  ;;  %v4040_v20 = vadd.f32 %v1771_v11, %v3944_v8  ;;  %v4055_v8 = vadd.f32 %v1776_v28, %v3959_v56 }
 0x236   :  { %v1787_v24 = vmul.f32 0.10936069, %v1747_v26  ;;  %v1788_v60 = vmul.f32 0.10936069, %v1748_v27  ;;  %v1792_v29 = vmul.f32 0.10936069, %v1752_v12  ;;  %v4043_v27 = vadd.f32 %v1772_v16, %v3947_v0 }
 0x237   :  { %v1793_v49 = vmul.f32 0.10936069, %v1753_v39  ;;  %v1794_v41 = vmul.f32 0.10936069, %v1754_v22  ;;  %v1795_v42 = vmul.f32 0.10936069, %v1755_v18  ;;  %v4046_v12 = vadd.f32 %v1773_v30, %v3950_v52 }
 0x238   :  { %v1796_v43 = vmul.f32 0.10936069, %v1756_v19  ;;  %v1797_v55 = vmul.f32 0.10936069, %v1757_v61  ;;  %v1798_v10 = vmul.f32 0.10936069, %v1758_v14  ;;  %v4052_v19 = vadd.f32 %v1775_v4, %v3956_v51 }
 0x239   :  { %v1799_v25 = vmul.f32 0.10936069, %v1759_v37  ;;  %v1800_v5 = vmul.f32 0.10936069, %v1760_v33  ;;  %v1801_v26 = vmul.f32 0.10936069, %v1761_v32  ;;  %v4058_v39 = vadd.f32 %v1777_v53, %v3962_v3 }
 0x23a   :  { %v1802_v23 = vmul.f32 0.10936069, %v1762_v36  ;;  %v1803_v9 = vmul.f32 0.10936069, %v1763_v59  ;;  %v1804_v7 = vmul.f32 0.10936069, %v1764_v45  ;;  %v4061_v0 = vadd.f32 %v1778_v38, %v3965_v13 }
 0x23b   :  { %v1845_v16 = vld [vmem:[#allocation2 + $0x8] sm:$0x3f]  ;;  %v4064_v63 = vadd.f32 %v1779_v44, %v3968_v47  ;;  %v4067_v52 = vadd.f32 %v1780_v57, %v3971_v50  ;;  %v4070_v11 = vadd.f32 %v1784_v21, %v4808_v34  ;;  %v4073_v51 = vadd.f32 %v1785_v46, %v3974_v6  ;;  %v1846_v56 = vld [vmem:[#allocation2 + $0x18] sm:$0x3f] }
 0x23c   :  { %v1847_v4 = vld [vmem:[#allocation2 + $0x28] sm:$0x3f]  ;;  %v1848_v3 = vld [vmem:[#allocation2 + $0x38] sm:$0x3f]  ;;  %v4076_v22 = vadd.f32 %v1786_v1, %v3977_v48  ;;  %v4079_v13 = vadd.f32 %v1787_v24, %v3980_v31  ;;  %v4082_v47 = vadd.f32 %v1788_v60, %v3983_v35  ;;  %v4088_v6 = vadd.f32 %v1793_v49, %v3986_v15 }
 0x23d   :  { %v4809_v50 = vld [vmem:[#allocation65_spill] sm:$0xff]  ;;  %v1849_v44 = vld [vmem:[#allocation2 + $0x48] sm:$0x3f]  ;;  %v4824_v60 = vld [vmem:[#allocation50_spill] sm:$0xff] }
 0x23e   :  { %v4085_v57 = vadd.f32 %v1792_v29, %v4809_v50  ;;  %v1850_v38 = vld [vmem:[#allocation2 + $0x58] sm:$0x3f]  ;;  %v1851_v18 = vld [vmem:[#allocation2 + $0x68] sm:$0x3f]  ;;  %v4112_v29 = vadd.f32 %v1801_v26, %v4824_v60  ;;  %v1888_v26 = vmul.f32 0.036000773, %v1848_v3 }
 0x23f   :  { %v4810_v30 = vld [vmem:[#allocation60_spill] sm:$0xff]  ;;  %v4812_v48 = vld [vmem:[#allocation43_spill] sm:$0xff]  ;;  %v4814_v31 = vld [vmem:[#allocation49_spill] sm:$0xff]  ;;  %v1889_v60 = vmul.f32 0.036000773, %v1849_v44 }
 0x240   :  { %v4091_v17 = vadd.f32 %v1794_v41, %v4810_v30  ;;  %v4094_v1 = vadd.f32 %v1795_v42, %v4812_v48  ;;  %v4097_v24 = vadd.f32 %v1796_v43, %v4814_v31  ;;  %v1852_v35 = vld [vmem:[#allocation2 + $0x78] sm:$0x3f]  ;;  %v1853_v61 = vld [vmem:[#allocation2 + $0x88] sm:$0x3f]  ;;  %4825 = vst [vmem:[#allocation51_spill] sm:$0xff] %v4112_v29 }
 0x241   :  { %v1854_v14 = vld [vmem:[#allocation2 + $0x98] sm:$0x3f]  ;;  %v4818_v53 = vld [vmem:[#allocation64_spill] sm:$0xff]  ;;  %v4820_v15 = vld [vmem:[#allocation71_spill] sm:$0xff] }
 0x242   :  { %4811 = vst [vmem:[#allocation44_spill] sm:$0xff] %v4091_v17  ;;  %4813 = vst [vmem:[#allocation21_spill] sm:$0xff] %v4094_v1  ;;  %v4816_v37 = vld [vmem:[#allocation69_spill] sm:$0xff]  ;;  %v4103_v33 = vadd.f32 %v1798_v10, %v4818_v53  ;;  %v4106_v32 = vadd.f32 %v1799_v25, %v4820_v15  ;;  %v4822_v36 = vld [vmem:[#allocation72_spill] sm:$0xff]  ;;  %v1885_v25 = vmul.f32 0.036000773, %v1845_v16 }
 0x243   :  { %4815 = vst [vmem:[#allocation28_spill] sm:$0xff] %v4097_v24  ;;  %v4100_v28 = vadd.f32 %v1797_v55, %v4816_v37  ;;  %v4109_v21 = vadd.f32 %v1800_v5, %v4822_v36  ;;  %v1855_v59 = vld [vmem:[#allocation2 + $0xa8] sm:$0x3f]  ;;  %v1856_v45 = vld [vmem:[#allocation2 + $0xb8] sm:$0x3f] }
 0x244   :  { %4819 = vst [vmem:[#allocation29_spill] sm:$0xff] %v4103_v33  ;;  %4821 = vst [vmem:[#allocation45_spill] sm:$0xff] %v4106_v32  ;;  %v1857_v46 = vld [vmem:[#allocation2 + $0xc8] sm:$0x3f]  ;;  %v4826_v49 = vld [vmem:[#allocation26_spill] sm:$0xff] }
 0x245   :  { %4817 = vst [vmem:[#allocation30_spill] sm:$0xff] %v4100_v28  ;;  %4823 = vst [vmem:[#allocation40_spill] sm:$0xff] %v4109_v21  ;;  %v4115_v41 = vadd.f32 %v1802_v23, %v4826_v49  ;;  %v4828_v42 = vld [vmem:[#allocation20_spill] sm:$0xff]  ;;  %v1858_v10 = vld [vmem:[#allocation2 + $0xd8] sm:$0x3f] }
 0x246   :  { %v4118_v43 = vadd.f32 %v1803_v9, %v4828_v42  ;;  %v1859_v55 = vld [vmem:[#allocation2 + $0xe8] sm:$0x3f]  ;;  %v1860_v34 = vld [vmem:[#allocation2 + $0xf8] sm:$0x3f]  ;;  %v1886_v37 = vmul.f32 0.036000773, %v1846_v56 }
 0x247   :  { %4827 = vst [vmem:[#allocation17_spill] sm:$0xff] %v4115_v41  ;;  %v4830_v50 = vld [vmem:[#allocation55_spill] sm:$0xff]  ;;  %v1864_v48 = vld [vmem:[#allocation2 + $0x138] sm:$0x3f]  ;;  %v1887_v53 = vmul.f32 0.036000773, %v1847_v4 }
 0x248   :  { %4829 = vst [vmem:[#allocation31_spill] sm:$0xff] %v4118_v43  ;;  %v4121_v30 = vadd.f32 %v1804_v7, %v4830_v50  ;;  %v1863_v5 = vld [vmem:[#allocation2 + $0x128] sm:$0x3f]  ;;  %v1866_v15 = vld [vmem:[#allocation2 + $0x158] sm:$0x3f]  ;;  %v4127_v21 = vadd.f32 %v1886_v37, %v4025_v62 }
 0x249   :  { %v1865_v31 = vld [vmem:[#allocation2 + $0x148] sm:$0x3f]  ;;  %v1868_v23 = vld [vmem:[#allocation2 + $0x178] sm:$0x3f]  ;;  %v1890_v49 = vmul.f32 0.036000773, %v1850_v38 }
 0x24a   :  { %4831 = vst [vmem:[#allocation39_spill] sm:$0xff] %v4121_v30  ;;  %v1867_v36 = vld [vmem:[#allocation2 + $0x168] sm:$0x3f]  ;;  %v1891_v9 = vmul.f32 0.036000773, %v1851_v18  ;;  %4834 = vst [vmem:[#allocation19_spill] sm:$0xff] %v4127_v21 }
 0x24b   :  { %v4832_v42 = vld [vmem:[#allocation56_spill] sm:$0xff]  ;;  %v1872_v16 = vld [vmem:[#allocation2 + $0x1b8] sm:$0x3f]  ;;  %v1892_v7 = vmul.f32 0.036000773, %v1852_v35 }
 0x24c   :  { %v4124_v43 = vadd.f32 %v1885_v25, %v4832_v42  ;;  %v1871_v41 = vld [vmem:[#allocation2 + $0x1a8] sm:$0x3f]  ;;  %v1893_v50 = vmul.f32 0.036000773, %v1853_v61  ;;  %v1894_v30 = vmul.f32 0.036000773, %v1854_v14  ;;  %v4133_v61 = vadd.f32 %v1888_v26, %v4031_v58 }
 0x24d   :  { %v1873_v29 = vld [vmem:[#allocation2 + $0x1c8] sm:$0x3f]  ;;  %v1874_v56 = vld [vmem:[#allocation2 + $0x1d8] sm:$0x3f]  ;;  %v1895_v32 = vmul.f32 0.036000773, %v1855_v59  ;;  %v4142_v26 = vadd.f32 %v1891_v9, %v4040_v20 }
 0x24e   :  { %4833 = vst [vmem:[#allocation46_spill] sm:$0xff] %v4124_v43  ;;  %v1875_v4 = vld [vmem:[#allocation2 + $0x1e8] sm:$0x3f]  ;;  %v1876_v3 = vld [vmem:[#allocation2 + $0x1f8] sm:$0x3f] }
 0x24f   :  { %v1896_v33 = vmul.f32 0.036000773, %v1856_v45  ;;  %v1897_v44 = vmul.f32 0.036000773, %v1857_v46  ;;  %v4835_v38 = vld [vmem:[#allocation34_spill] sm:$0xff]  ;;  %v4136_v45 = vadd.f32 %v1889_v60, %v4034_v54  ;;  %v4145_v54 = vadd.f32 %v1892_v7, %v4043_v27 }
 0x250   :  { %v4130_v18 = vadd.f32 %v1887_v53, %v4835_v38  ;;  %v1877_v25 = vld [vmem:[#allocation2 + $0x208] sm:$0x3f]  ;;  %v1878_v42 = vld [vmem:[#allocation2 + $0x218] sm:$0x3f]  ;;  %v1898_v28 = vmul.f32 0.036000773, %v1858_v10  ;;  %v4139_v10 = vadd.f32 %v1890_v49, %v4037_v40  ;;  %v4154_v9 = vadd.f32 %v1895_v32, %v4052_v19 }
 0x251   :  { %v1879_v43 = vld [vmem:[#allocation2 + $0x228] sm:$0x3f]  ;;  %v1899_v24 = vmul.f32 0.036000773, %v1859_v55  ;;  %v1900_v35 = vmul.f32 0.036000773, %v1860_v34  ;;  %v4157_v27 = vadd.f32 %v1896_v33, %v4055_v8 }
 0x252   :  { %4836 = vst [vmem:[#allocation27_spill] sm:$0xff] %v4130_v18  ;;  %v1880_v62 = vld [vmem:[#allocation2 + $0x238] sm:$0x3f]  ;;  %v1881_v14 = vld [vmem:[#allocation2 + $0x248] sm:$0x3f]  ;;  %4837 = vst [vmem:[#allocation52_spill] sm:$0xff] %v4136_v45 }
 0x253   :  { %v1882_v37 = vld [vmem:[#allocation2 + $0x258] sm:$0x3f]  ;;  %v1903_v21 = vmul.f32 0.036000773, %v1863_v5  ;;  %v1904_v1 = vmul.f32 0.036000773, %v1864_v48 }
 0x254   :  { %v1905_v59 = vmul.f32 0.036000773, %v1865_v31  ;;  %v1883_v46 = vld [vmem:[#allocation2 + $0x268] sm:$0x3f]  ;;  %v1884_v53 = vld [vmem:[#allocation2 + $0x278] sm:$0x3f] }
 0x255   :  { %v1906_v38 = vmul.f32 0.036000773, %v1866_v15  ;;  %v1907_v18 = vmul.f32 0.036000773, %v1867_v36  ;;  %v1908_v17 = vmul.f32 0.036000773, %v1868_v23  ;;  %v4148_v36 = vadd.f32 %v1893_v50, %v4046_v12 }
 0x256   :  { %v1911_v55 = vmul.f32 0.036000773, %v1871_v41  ;;  %v1912_v58 = vmul.f32 0.036000773, %v1872_v16  ;;  %v1913_v34 = vmul.f32 0.036000773, %v1873_v29  ;;  %v4151_v29 = vadd.f32 %v1894_v30, %v4049_v2 }
 0x257   :  { %v1914_v5 = vmul.f32 0.036000773, %v1874_v56  ;;  %v1915_v48 = vmul.f32 0.036000773, %v1875_v4  ;;  %v1916_v31 = vmul.f32 0.036000773, %v1876_v3  ;;  %v4160_v16 = vadd.f32 %v1897_v44, %v4058_v39 }
 0x258   :  { %v1917_v60 = vmul.f32 0.036000773, %v1877_v25  ;;  %v1918_v45 = vmul.f32 0.036000773, %v1878_v42  ;;  %v1919_v15 = vmul.f32 0.036000773, %v1879_v43  ;;  %v4163_v12 = vadd.f32 %v1898_v28, %v4061_v0 }
 0x259   :  { %v1920_v40 = vmul.f32 0.036000773, %v1880_v62  ;;  %v1921_v23 = vmul.f32 0.036000773, %v1881_v14  ;;  %v1922_v41 = vmul.f32 0.036000773, %v1882_v37  ;;  %v4166_v43 = vadd.f32 %v1899_v24, %v4064_v63 }
 0x25a   :  { %v1923_v20 = vmul.f32 0.036000773, %v1883_v46  ;;  %v1924_v49 = vmul.f32 0.036000773, %v1884_v53  ;;  %v4169_v2 = vadd.f32 %v1900_v35, %v4067_v52  ;;  %v1965_v30 = vld [vmem:[#allocation2 + $0x9] sm:$0x3f]  ;;  %v4175_v8 = vadd.f32 %v1904_v1, %v4070_v11 }
 0x25b   :  { %v1966_v7 = vld [vmem:[#allocation2 + $0x19] sm:$0x3f]  ;;  %v4838_v50 = vld [vmem:[#allocation67_spill] sm:$0xff]  ;;  %v4178_v39 = vadd.f32 %v1905_v59, %v4073_v51  ;;  %v4181_v0 = vadd.f32 %v1906_v38, %v4076_v22  ;;  %v4184_v52 = vadd.f32 %v1907_v18, %v4079_v13  ;;  %v4187_v33 = vadd.f32 %v1908_v17, %v4082_v47  ;;  %v4846_v4 = vld [vmem:[#allocation44_spill] sm:$0xff] }
 0x25c   :  { %v4172_v19 = vadd.f32 %v1903_v21, %v4838_v50  ;;  %v1967_v28 = vld [vmem:[#allocation2 + $0x29] sm:$0x3f]  ;;  %v1968_v63 = vld [vmem:[#allocation2 + $0x39] sm:$0x3f]  ;;  %v4193_v11 = vadd.f32 %v1912_v58, %v4085_v57  ;;  %v4196_v22 = vadd.f32 %v1913_v34, %v4088_v6  ;;  %v4199_v3 = vadd.f32 %v1914_v5, %v4846_v4 }
 0x25d   :  { %4839 = vst [vmem:[#allocation74_spill] sm:$0xff] %v4181_v0  ;;  %v1969_v24 = vld [vmem:[#allocation2 + $0x49] sm:$0x3f]  ;;  %4840 = vst [vmem:[#allocation57_spill] sm:$0xff] %v4184_v52  ;;  %v4842_v32 = vld [vmem:[#allocation37_spill] sm:$0xff] }
 0x25e   :  { %4841 = vst [vmem:[#allocation22_spill] sm:$0xff] %v4187_v33  ;;  %v4190_v21 = vadd.f32 %v1911_v55, %v4842_v32  ;;  %4844 = vst [vmem:[#allocation18_spill] sm:$0xff] %v4193_v11  ;;  %v1970_v51 = vld [vmem:[#allocation2 + $0x59] sm:$0x3f]  ;;  %v1971_v1 = vld [vmem:[#allocation2 + $0x69] sm:$0x3f] }
 0x25f   :  { %v1972_v56 = vld [vmem:[#allocation2 + $0x79] sm:$0x3f]  ;;  %4845 = vst [vmem:[#allocation47_spill] sm:$0xff] %v4196_v22  ;;  %4847 = vst [vmem:[#allocation23_spill] sm:$0xff] %v4199_v3  ;;  %v4850_v47 = vld [vmem:[#allocation28_spill] sm:$0xff] }
 0x260   :  { %4843 = vst [vmem:[#allocation73_spill] sm:$0xff] %v4190_v21  ;;  %v4848_v13 = vld [vmem:[#allocation21_spill] sm:$0xff]  ;;  %v4205_v17 = vadd.f32 %v1916_v31, %v4850_v47  ;;  %v1973_v18 = vld [vmem:[#allocation2 + $0x89] sm:$0x3f]  ;;  %v4852_v57 = vld [vmem:[#allocation30_spill] sm:$0xff] }
 0x261   :  { %v4202_v44 = vadd.f32 %v1915_v48, %v4848_v13  ;;  %v1974_v25 = vld [vmem:[#allocation2 + $0x99] sm:$0x3f]  ;;  %v1975_v42 = vld [vmem:[#allocation2 + $0xa9] sm:$0x3f]  ;;  %v4208_v35 = vadd.f32 %v1917_v60, %v4852_v57  ;;  %v2006_v32 = vmul.f32 0.007598758, %v1966_v7 }
 0x262   :  { %4851 = vst [vmem:[#allocation15_spill] sm:$0xff] %v4205_v17  ;;  %v4854_v62 = vld [vmem:[#allocation29_spill] sm:$0xff]  ;;  %v4858_v59 = vld [vmem:[#allocation40_spill] sm:$0xff]  ;;  %v4860_v58 = vld [vmem:[#allocation51_spill] sm:$0xff]  ;;  %v2007_v57 = vmul.f32 0.007598758, %v1967_v28 }
 0x263   :  { %4849 = vst [vmem:[#allocation36_spill] sm:$0xff] %v4202_v44  ;;  %4853 = vst [vmem:[#allocation66_spill] sm:$0xff] %v4208_v35  ;;  %v4211_v14 = vadd.f32 %v1918_v45, %v4854_v62  ;;  %v4856_v6 = vld [vmem:[#allocation45_spill] sm:$0xff]  ;;  %v4217_v46 = vadd.f32 %v1920_v40, %v4858_v59  ;;  %v1977_v38 = vld [vmem:[#allocation2 + $0xc9] sm:$0x3f]  ;;  %v4220_v34 = vadd.f32 %v1921_v23, %v4860_v58 }
 0x264   :  { %v4214_v37 = vadd.f32 %v1919_v15, %v4856_v6  ;;  %v1976_v53 = vld [vmem:[#allocation2 + $0xb9] sm:$0x3f]  ;;  %v1979_v31 = vld [vmem:[#allocation2 + $0xe9] sm:$0x3f]  ;;  %v2005_v45 = vmul.f32 0.007598758, %v1965_v30 }
 0x265   :  { %4855 = vst [vmem:[#allocation41_spill] sm:$0xff] %v4211_v14  ;;  %4859 = vst [vmem:[#allocation24_spill] sm:$0xff] %v4217_v46  ;;  %v1978_v55 = vld [vmem:[#allocation2 + $0xd9] sm:$0x3f]  ;;  %v1981_v50 = vld [vmem:[#allocation2 + $0x109] sm:$0x3f] }
 0x266   :  { %4857 = vst [vmem:[#allocation38_spill] sm:$0xff] %v4214_v37  ;;  %4861 = vst [vmem:[#allocation58_spill] sm:$0xff] %v4220_v34  ;;  %v4862_v5 = vld [vmem:[#allocation17_spill] sm:$0xff]  ;;  %v4864_v4 = vld [vmem:[#allocation31_spill] sm:$0xff]  ;;  %v2008_v62 = vmul.f32 0.007598758, %v1968_v63 }
 0x267   :  { %v4223_v48 = vadd.f32 %v1922_v41, %v4862_v5  ;;  %v1980_v60 = vld [vmem:[#allocation2 + $0xf9] sm:$0x3f]  ;;  %v4226_v15 = vadd.f32 %v1923_v20, %v4864_v4  ;;  %v1983_v40 = vld [vmem:[#allocation2 + $0x129] sm:$0x3f]  ;;  %v2009_v6 = vmul.f32 0.007598758, %v1969_v24 }
 0x268   :  { %v1982_v13 = vld [vmem:[#allocation2 + $0x119] sm:$0x3f]  ;;  %v4866_v59 = vld [vmem:[#allocation39_spill] sm:$0xff]  ;;  %v2011_v34 = vmul.f32 0.007598758, %v1971_v1 }
 0x269   :  { %4863 = vst [vmem:[#allocation25_spill] sm:$0xff] %v4223_v48  ;;  %4865 = vst [vmem:[#allocation32_spill] sm:$0xff] %v4226_v15  ;;  %v1984_v47 = vld [vmem:[#allocation2 + $0x139] sm:$0x3f]  ;;  %v4229_v23 = vadd.f32 %v1924_v49, %v4866_v59  ;;  %v1985_v58 = vld [vmem:[#allocation2 + $0x149] sm:$0x3f] }
 0x26a   :  { %v1986_v41 = vld [vmem:[#allocation2 + $0x159] sm:$0x3f]  ;;  %v1987_v5 = vld [vmem:[#allocation2 + $0x169] sm:$0x3f]  ;;  %v2010_v48 = vmul.f32 0.007598758, %v1970_v51 }
 0x26b   :  { %4867 = vst [vmem:[#allocation35_spill] sm:$0xff] %v4229_v23  ;;  %v2012_v46 = vmul.f32 0.007598758, %v1972_v56  ;;  %v1988_v30 = vld [vmem:[#allocation2 + $0x179] sm:$0x3f]  ;;  %v4870_v17 = vld [vmem:[#allocation19_spill] sm:$0xff] }
 0x26c   :  { %v1989_v7 = vld [vmem:[#allocation2 + $0x189] sm:$0x3f]  ;;  %v1990_v37 = vld [vmem:[#allocation2 + $0x199] sm:$0x3f]  ;;  %v2013_v20 = vmul.f32 0.007598758, %v1973_v18  ;;  %v4235_v44 = vadd.f32 %v2006_v32, %v4870_v17 }
 0x26d   :  { %v2014_v4 = vmul.f32 0.007598758, %v1974_v25  ;;  %v2015_v15 = vmul.f32 0.007598758, %v1975_v42  ;;  %v4868_v14 = vld [vmem:[#allocation46_spill] sm:$0xff]  ;;  %v4872_v25 = vld [vmem:[#allocation27_spill] sm:$0xff] }
 0x26e   :  { %v4232_v35 = vadd.f32 %v2005_v45, %v4868_v14  ;;  %v1991_v28 = vld [vmem:[#allocation2 + $0x1a9] sm:$0x3f]  ;;  %v1992_v63 = vld [vmem:[#allocation2 + $0x1b9] sm:$0x3f]  ;;  %v2016_v49 = vmul.f32 0.007598758, %v1976_v53  ;;  %v4238_v42 = vadd.f32 %v2007_v57, %v4872_v25 }
 0x26f   :  { %v1993_v24 = vld [vmem:[#allocation2 + $0x1c9] sm:$0x3f]  ;;  %v2017_v59 = vmul.f32 0.007598758, %v1977_v38  ;;  %v2018_v23 = vmul.f32 0.007598758, %v1978_v55  ;;  %v4241_v38 = vadd.f32 %v2008_v62, %v4133_v61  ;;  %v4250_v62 = vadd.f32 %v2011_v34, %v4142_v26 }
 0x270   :  { %4869 = vst [vmem:[#allocation61_spill] sm:$0xff] %v4232_v35  ;;  %4871 = vst [vmem:[#allocation33_spill] sm:$0xff] %v4235_v44  ;;  %v1994_v51 = vld [vmem:[#allocation2 + $0x1d9] sm:$0x3f]  ;;  %v1995_v1 = vld [vmem:[#allocation2 + $0x1e9] sm:$0x3f] }
 0x271   :  { %v1996_v56 = vld [vmem:[#allocation2 + $0x1f9] sm:$0x3f]  ;;  %v2019_v3 = vmul.f32 0.007598758, %v1979_v31  ;;  %v2020_v22 = vmul.f32 0.007598758, %v1980_v60 }
 0x272   :  { %v2021_v18 = vmul.f32 0.007598758, %v1981_v50  ;;  %4873 = vst [vmem:[#allocation70_spill] sm:$0xff] %v4238_v42  ;;  %v1997_v14 = vld [vmem:[#allocation2 + $0x209] sm:$0x3f] }
 0x273   :  { %v1998_v45 = vld [vmem:[#allocation2 + $0x219] sm:$0x3f]  ;;  %v1999_v35 = vld [vmem:[#allocation2 + $0x229] sm:$0x3f]  ;;  %v2022_v11 = vmul.f32 0.007598758, %v1982_v13  ;;  %v4247_v13 = vadd.f32 %v2010_v48, %v4139_v10 }
 0x274   :  { %v2023_v21 = vmul.f32 0.007598758, %v1983_v40  ;;  %v2024_v53 = vmul.f32 0.007598758, %v1984_v47  ;;  %v2000_v17 = vld [vmem:[#allocation2 + $0x239] sm:$0x3f] }
 0x275   :  { %v2001_v55 = vld [vmem:[#allocation2 + $0x249] sm:$0x3f]  ;;  %v2002_v32 = vld [vmem:[#allocation2 + $0x259] sm:$0x3f]  ;;  %v2025_v44 = vmul.f32 0.007598758, %v1985_v58 }
 0x276   :  { %v2026_v33 = vmul.f32 0.007598758, %v1986_v41  ;;  %v2027_v31 = vmul.f32 0.007598758, %v1987_v5  ;;  %v4874_v60 = vld [vmem:[#allocation52_spill] sm:$0xff] }
 0x277   :  { %v4244_v50 = vadd.f32 %v2009_v6, %v4874_v60  ;;  %v2003_v57 = vld [vmem:[#allocation2 + $0x269] sm:$0x3f]  ;;  %v2004_v25 = vld [vmem:[#allocation2 + $0x279] sm:$0x3f]  ;;  %v2028_v42 = vmul.f32 0.007598758, %v1988_v30  ;;  %v4253_v6 = vadd.f32 %v2012_v46, %v4145_v54  ;;  %v4265_v54 = vadd.f32 %v2016_v49, %v4157_v27 }
 0x278   :  { %v2029_v52 = vmul.f32 0.007598758, %v1989_v7  ;;  %v2030_v0 = vmul.f32 0.007598758, %v1990_v37  ;;  %v2031_v40 = vmul.f32 0.007598758, %v1991_v28  ;;  %v4256_v37 = vadd.f32 %v2013_v20, %v4148_v36 }
 0x279   :  { %4875 = vst [vmem:[#allocation42_spill] sm:$0xff] %v4244_v50  ;;  %v2032_v61 = vmul.f32 0.007598758, %v1992_v63  ;;  %v2033_v47 = vmul.f32 0.007598758, %v1993_v24  ;;  %v4259_v28 = vadd.f32 %v2014_v4, %v4151_v29  ;;  %v4262_v63 = vadd.f32 %v2015_v15, %v4154_v9  ;;  %v4876_v20 = vld [vmem:[#allocation59_spill] sm:$0xff] }
 0x27a   :  { %v2034_v58 = vmul.f32 0.007598758, %v1994_v51  ;;  %v2035_v41 = vmul.f32 0.007598758, %v1995_v1  ;;  %v2036_v5 = vmul.f32 0.007598758, %v1996_v56  ;;  %v4268_v46 = vadd.f32 %v2017_v59, %v4160_v16 }
 0x27b   :  { %v2037_v60 = vmul.f32 0.007598758, %v1997_v14  ;;  %v2038_v50 = vmul.f32 0.007598758, %v1998_v45  ;;  %v2039_v30 = vmul.f32 0.007598758, %v1999_v35  ;;  %v4271_v36 = vadd.f32 %v2018_v23, %v4163_v12 }
 0x27c   :  { %v2040_v10 = vmul.f32 0.007598758, %v2000_v17  ;;  %v2041_v48 = vmul.f32 0.007598758, %v2001_v55  ;;  %v2042_v7 = vmul.f32 0.007598758, %v2002_v32  ;;  %v4274_v35 = vadd.f32 %v2019_v3, %v4166_v43 }
 0x27d   :  { %v2043_v26 = vmul.f32 0.007598758, %v2003_v57  ;;  %v2044_v34 = vmul.f32 0.007598758, %v2004_v25  ;;  %v4277_v29 = vadd.f32 %v2020_v22, %v4169_v2  ;;  %v4280_v4 = vadd.f32 %v2021_v18, %v4876_v20  ;;  %v4877_v9 = vld [vmem:[#allocation62_spill] sm:$0xff]  ;;  %v4880_v2 = vld [vmem:[#allocation57_spill] sm:$0xff] }
 0x27e   :  { %v4283_v15 = vadd.f32 %v2022_v11, %v4877_v9  ;;  %v4286_v27 = vadd.f32 %v2023_v21, %v4172_v19  ;;  %v4289_v16 = vadd.f32 %v2024_v53, %v4175_v8  ;;  %v2085_v12 = vld [vmem:[#allocation2 + $0xa] sm:$0x3f]  ;;  %v4292_v23 = vadd.f32 %v2025_v44, %v4178_v39  ;;  %v4878_v43 = vld [vmem:[#allocation74_spill] sm:$0xff]  ;;  %v4884_v21 = vld [vmem:[#allocation13_spill] sm:$0xff] }
 0x27f   :  { %v4295_v3 = vadd.f32 %v2026_v33, %v4878_v43  ;;  %v4298_v22 = vadd.f32 %v2027_v31, %v4880_v2  ;;  %v4882_v24 = vld [vmem:[#allocation22_spill] sm:$0xff]  ;;  %v2087_v59 = vld [vmem:[#allocation2 + $0x2a] sm:$0x3f]  ;;  %v4304_v51 = vadd.f32 %v2029_v52, %v4884_v21  ;;  %v4886_v8 = vld [vmem:[#allocation53_spill] sm:$0xff] }
 0x280   :  { %v4301_v49 = vadd.f32 %v2028_v42, %v4882_v24  ;;  %v2086_v11 = vld [vmem:[#allocation2 + $0x1a] sm:$0x3f]  ;;  %v4307_v1 = vadd.f32 %v2030_v0, %v4886_v8  ;;  %v4888_v39 = vld [vmem:[#allocation73_spill] sm:$0xff]  ;;  %v2089_v18 = vld [vmem:[#allocation2 + $0x4a] sm:$0x3f] }
 0x281   :  { %4879 = vst [vmem:[#allocation16_spill] sm:$0xff] %v4295_v3  ;;  %4881 = vst [vmem:[#allocation48_spill] sm:$0xff] %v4298_v22  ;;  %v2088_v19 = vld [vmem:[#allocation2 + $0x3a] sm:$0x3f]  ;;  %v4310_v44 = vadd.f32 %v2031_v40, %v4888_v39  ;;  %v2091_v45 = vld [vmem:[#allocation2 + $0x6a] sm:$0x3f] }
 0x282   :  { %4883 = vst [vmem:[#allocation68_spill] sm:$0xff] %v4301_v49  ;;  %4885 = vst [vmem:[#allocation63_spill] sm:$0xff] %v4304_v51  ;;  %v4890_v33 = vld [vmem:[#allocation18_spill] sm:$0xff]  ;;  %v4892_v42 = vld [vmem:[#allocation47_spill] sm:$0xff] }
 0x283   :  { %4887 = vst [vmem:[#allocation54_spill] sm:$0xff] %v4307_v1  ;;  %4889 = vst [vmem:[#allocation14_spill] sm:$0xff] %v4310_v44  ;;  %v4313_v56 = vadd.f32 %v2032_v61, %v4890_v33  ;;  %v2090_v14 = vld [vmem:[#allocation2 + $0x5a] sm:$0x3f]  ;;  %v4316_v53 = vadd.f32 %v2033_v47, %v4892_v42  ;;  %v4894_v17 = vld [vmem:[#allocation23_spill] sm:$0xff] }
 0x284   :  { %v4319_v55 = vadd.f32 %v2034_v58, %v4894_v17  ;;  %v4896_v52 = vld [vmem:[#allocation36_spill] sm:$0xff]  ;;  %v4898_v0 = vld [vmem:[#allocation15_spill] sm:$0xff]  ;;  %v2092_v57 = vld [vmem:[#allocation2 + $0x7a] sm:$0x3f] }
 0x285   :  { %4891 = vst [vmem:[#allocation65_spill] sm:$0xff] %v4313_v56  ;;  %4893 = vst [vmem:[#allocation60_spill] sm:$0xff] %v4316_v53  ;;  %v4322_v32 = vadd.f32 %v2035_v41, %v4896_v52  ;;  %v4325_v31 = vadd.f32 %v2036_v5, %v4898_v0  ;;  %v2093_v25 = vld [vmem:[#allocation2 + $0x8a] sm:$0x3f]  ;;  %v2094_v40 = vld [vmem:[#allocation2 + $0x9a] sm:$0x3f] }
 0x286   :  { %4895 = vst [vmem:[#allocation43_spill] sm:$0xff] %v4319_v55  ;;  %v4900_v61 = vld [vmem:[#allocation66_spill] sm:$0xff]  ;;  %v4902_v9 = vld [vmem:[#allocation41_spill] sm:$0xff]  ;;  %v4906_v58 = vld [vmem:[#allocation24_spill] sm:$0xff] }
 0x287   :  { %4897 = vst [vmem:[#allocation49_spill] sm:$0xff] %v4322_v32  ;;  %4899 = vst [vmem:[#allocation69_spill] sm:$0xff] %v4325_v31  ;;  %v4328_v20 = vadd.f32 %v2037_v60, %v4900_v61  ;;  %v4331_v43 = vadd.f32 %v2038_v50, %v4902_v9  ;;  %v4904_v47 = vld [vmem:[#allocation38_spill] sm:$0xff]  ;;  %v4337_v24 = vadd.f32 %v2040_v10, %v4906_v58  ;;  %v2095_v41 = vld [vmem:[#allocation2 + $0xaa] sm:$0x3f] }
 0x288   :  { %v4334_v2 = vadd.f32 %v2039_v30, %v4904_v47  ;;  %v2096_v21 = vld [vmem:[#allocation2 + $0xba] sm:$0x3f]  ;;  %v2097_v8 = vld [vmem:[#allocation2 + $0xca] sm:$0x3f]  ;;  %v4910_v33 = vld [vmem:[#allocation25_spill] sm:$0xff] }
 0x289   :  { %4901 = vst [vmem:[#allocation64_spill] sm:$0xff] %v4328_v20  ;;  %4903 = vst [vmem:[#allocation71_spill] sm:$0xff] %v4331_v43  ;;  %v4908_v5 = vld [vmem:[#allocation58_spill] sm:$0xff]  ;;  %v4343_v42 = vadd.f32 %v2042_v7, %v4910_v33  ;;  %v4912_v60 = vld [vmem:[#allocation32_spill] sm:$0xff]  ;;  %v2125_v30 = vmul.f32 0.0010283801, %v2085_v12 }
 0x28a   :  { %4905 = vst [vmem:[#allocation72_spill] sm:$0xff] %v4334_v2  ;;  %4907 = vst [vmem:[#allocation50_spill] sm:$0xff] %v4337_v24  ;;  %v4340_v39 = vadd.f32 %v2041_v48, %v4908_v5  ;;  %v4346_v17 = vadd.f32 %v2043_v26, %v4912_v60  ;;  %v2098_v50 = vld [vmem:[#allocation2 + $0xda] sm:$0x3f]  ;;  %v2099_v52 = vld [vmem:[#allocation2 + $0xea] sm:$0x3f] }
 0x28b   :  { %4911 = vst [vmem:[#allocation20_spill] sm:$0xff] %v4343_v42  ;;  %v2100_v0 = vld [vmem:[#allocation2 + $0xfa] sm:$0x3f]  ;;  %v4914_v61 = vld [vmem:[#allocation35_spill] sm:$0xff]  ;;  %v2101_v10 = vld [vmem:[#allocation2 + $0x10a] sm:$0x3f] }
 0x28c   :  { %4909 = vst [vmem:[#allocation26_spill] sm:$0xff] %v4340_v39  ;;  %4913 = vst [vmem:[#allocation55_spill] sm:$0xff] %v4346_v17  ;;  %v4349_v9 = vadd.f32 %v2044_v34, %v4914_v61  ;;  %v2102_v47 = vld [vmem:[#allocation2 + $0x11a] sm:$0x3f]  ;;  %v2103_v58 = vld [vmem:[#allocation2 + $0x12a] sm:$0x3f] }
 0x28d   :  { %v2126_v24 = vmul.f32 0.0010283801, %v2086_v11  ;;  %v2127_v2 = vmul.f32 0.0010283801, %v2087_v59  ;;  %v2128_v48 = vmul.f32 0.0010283801, %v2088_v19 }
 0x28e   :  { %4915 = vst [vmem:[#allocation56_spill] sm:$0xff] %v4349_v9  ;;  %v2104_v5 = vld [vmem:[#allocation2 + $0x13a] sm:$0x3f]  ;;  %v2105_v39 = vld [vmem:[#allocation2 + $0x14a] sm:$0x3f]  ;;  %v4916_v60 = vld [vmem:[#allocation61_spill] sm:$0xff] }
 0x28f   :  { %v2106_v7 = vld [vmem:[#allocation2 + $0x15a] sm:$0x3f]  ;;  %v2129_v33 = vmul.f32 0.0010283801, %v2089_v18  ;;  %v2130_v42 = vmul.f32 0.0010283801, %v2090_v14  ;;  %v4352_v17 = vadd.f32 %v2125_v30, %v4916_v60 }
 0x290   :  { %v2131_v26 = vmul.f32 0.0010283801, %v2091_v45  ;;  %v2107_v43 = vld [vmem:[#allocation2 + $0x16a] sm:$0x3f]  ;;  %v2108_v12 = vld [vmem:[#allocation2 + $0x17a] sm:$0x3f] }
 0x291   :  { %4917 = vst [vmem:[#allocation34_spill] sm:$0xff] %v4352_v17  ;;  %v2109_v20 = vld [vmem:[#allocation2 + $0x18a] sm:$0x3f]  ;;  %v2132_v34 = vmul.f32 0.0010283801, %v2092_v57  ;;  %v4918_v31 = vld [vmem:[#allocation33_spill] sm:$0xff] }
 0x292   :  { %v2133_v61 = vmul.f32 0.0010283801, %v2093_v25  ;;  %v2134_v9 = vmul.f32 0.0010283801, %v2094_v40  ;;  %v4355_v32 = vadd.f32 %v2126_v24, %v4918_v31  ;;  %v2110_v11 = vld [vmem:[#allocation2 + $0x19a] sm:$0x3f]  ;;  %v4361_v25 = vadd.f32 %v2128_v48, %v4241_v38 }
 0x293   :  { %v2111_v59 = vld [vmem:[#allocation2 + $0x1aa] sm:$0x3f]  ;;  %v2112_v19 = vld [vmem:[#allocation2 + $0x1ba] sm:$0x3f]  ;;  %v2135_v55 = vmul.f32 0.0010283801, %v2095_v41 }
 0x294   :  { %4919 = vst [vmem:[#allocation67_spill] sm:$0xff] %v4355_v32  ;;  %v2136_v53 = vmul.f32 0.0010283801, %v2096_v21  ;;  %v2137_v18 = vmul.f32 0.0010283801, %v2097_v8  ;;  %v4920_v14 = vld [vmem:[#allocation70_spill] sm:$0xff] }
 0x295   :  { %v4358_v45 = vadd.f32 %v2127_v2, %v4920_v14  ;;  %v2113_v30 = vld [vmem:[#allocation2 + $0x1ca] sm:$0x3f]  ;;  %v2114_v60 = vld [vmem:[#allocation2 + $0x1da] sm:$0x3f]  ;;  %v2138_v56 = vmul.f32 0.0010283801, %v2098_v50 }
 0x296   :  { %v2115_v17 = vld [vmem:[#allocation2 + $0x1ea] sm:$0x3f]  ;;  %v2139_v44 = vmul.f32 0.0010283801, %v2099_v52  ;;  %v2140_v57 = vmul.f32 0.0010283801, %v2100_v0  ;;  %v4367_v52 = vadd.f32 %v2130_v42, %v4247_v13  ;;  %v2173_v13 = vadd.f32 %v2133_v61, %v4256_v37 }
 0x297   :  { %4921 = vst [vmem:[#allocation37_spill] sm:$0xff] %v4358_v45  ;;  %4922 = vst [vmem:[#allocation44_spill] sm:$0xff] %v4361_v25  ;;  %v2116_v31 = vld [vmem:[#allocation2 + $0x1fa] sm:$0x3f]  ;;  %v2117_v40 = vld [vmem:[#allocation2 + $0x20a] sm:$0x3f] }
 0x298   :  { %v2118_v24 = vld [vmem:[#allocation2 + $0x21a] sm:$0x3f]  ;;  %v2141_v32 = vmul.f32 0.0010283801, %v2101_v10  ;;  %v2142_v1 = vmul.f32 0.0010283801, %v2102_v47  ;;  %v4370_v47 = vadd.f32 %v2131_v26, %v4250_v62  ;;  %v2175_v26 = vadd.f32 %v2135_v55, %v4262_v63 }
 0x299   :  { %v2143_v41 = vmul.f32 0.0010283801, %v2103_v58  ;;  %v4923_v21 = vld [vmem:[#allocation42_spill] sm:$0xff]  ;;  %v2119_v2 = vld [vmem:[#allocation2 + $0x22a] sm:$0x3f]  ;;  %4925 = vst [vmem:[#allocation28_spill] sm:$0xff] %v4367_v52  ;;  %v2179_v37 = vadd.f32 %v2139_v44, %v4274_v35  ;;  %v2180_v61 = vadd.f32 %v2140_v57, %v4277_v29 }
 0x29a   :  { %v4364_v8 = vadd.f32 %v2129_v33, %v4923_v21  ;;  %v2120_v14 = vld [vmem:[#allocation2 + $0x23a] sm:$0x3f]  ;;  %v2121_v45 = vld [vmem:[#allocation2 + $0x24a] sm:$0x3f]  ;;  %v2144_v51 = vmul.f32 0.0010283801, %v2104_v5 }
 0x29b   :  { %v2145_v49 = vmul.f32 0.0010283801, %v2105_v39  ;;  %v2146_v50 = vmul.f32 0.0010283801, %v2106_v7  ;;  %v2122_v38 = vld [vmem:[#allocation2 + $0x25a] sm:$0x3f]  ;;  %v4390_v63 = vadd.f32 %v2143_v41, %v4286_v27 }
 0x29c   :  { %4924 = vst [vmem:[#allocation21_spill] sm:$0xff] %v4364_v8  ;;  %v2123_v0 = vld [vmem:[#allocation2 + $0x26a] sm:$0x3f]  ;;  %v2124_v48 = vld [vmem:[#allocation2 + $0x27a] sm:$0x3f]  ;;  %v4373_v8 = vadd.f32 %v2132_v34, %v4253_v6  ;;  %v2176_v6 = vadd.f32 %v2136_v53, %v4265_v54  ;;  %v2177_v34 = vadd.f32 %v2137_v18, %v4268_v46  ;;  %v4393_v55 = vadd.f32 %v2144_v51, %v4289_v16  ;;  %v4934_v18 = vld [vmem:[#allocation43_spill] sm:$0xff] }
 0x29d   :  { %v2147_v25 = vmul.f32 0.0010283801, %v2107_v43  ;;  %v2148_v22 = vmul.f32 0.0010283801, %v2108_v12  ;;  %v2149_v10 = vmul.f32 0.0010283801, %v2109_v20  ;;  %v2174_v43 = vadd.f32 %v2134_v9, %v4259_v28 }
 0x29e   :  { %v2150_v58 = vmul.f32 0.0010283801, %v2110_v11  ;;  %v2151_v33 = vmul.f32 0.0010283801, %v2111_v59  ;;  %v2152_v21 = vmul.f32 0.0010283801, %v2112_v19  ;;  %v4384_v28 = vadd.f32 %v2141_v32, %v4280_v4 }
 0x29f   :  { %v2153_v39 = vmul.f32 0.0010283801, %v2113_v30  ;;  %v2154_v5 = vmul.f32 0.0010283801, %v2114_v60  ;;  %v2155_v7 = vmul.f32 0.0010283801, %v2115_v17  ;;  %v2178_v17 = vadd.f32 %v2138_v56, %v4271_v36 }
 0x2a0   :  { %v2156_v42 = vmul.f32 0.0010283801, %v2116_v31  ;;  %v2157_v52 = vmul.f32 0.0010283801, %v2117_v40  ;;  %v2158_v3 = vmul.f32 0.0010283801, %v2118_v24  ;;  %v4387_v9 = vadd.f32 %v2142_v1, %v4283_v15 }
 0x2a1   :  { %v2159_v20 = vmul.f32 0.0010283801, %v2119_v2  ;;  %v2160_v12 = vmul.f32 0.0010283801, %v2120_v14  ;;  %v2161_v62 = vmul.f32 0.0010283801, %v2121_v45  ;;  %v4396_v54 = vadd.f32 %v2145_v49, %v4292_v23 }
 0x2a2   :  { %v2162_v11 = vmul.f32 0.0010283801, %v2122_v38  ;;  %v2163_v59 = vmul.f32 0.0010283801, %v2123_v0  ;;  %v2164_v19 = vmul.f32 0.0010283801, %v2124_v48  ;;  %v4423_v45 = vadd.f32 %v2154_v5, %v4934_v18 }
 0x2a3   :  { %v4926_v46 = vld [vmem:[#allocation16_spill] sm:$0xff]  ;;  %v4929_v15 = vld [vmem:[#allocation63_spill] sm:$0xff]  ;;  %v4930_v27 = vld [vmem:[#allocation54_spill] sm:$0xff]  ;;  %v2218_v18 = vmul.f32 %v2178_v17, %v2178_v17 }
 0x2a4   :  { %v4399_v36 = vadd.f32 %v2146_v50, %v4926_v46  ;;  %v4927_v35 = vld [vmem:[#allocation48_spill] sm:$0xff]  ;;  %v4408_v1 = vadd.f32 %v2149_v10, %v4929_v15  ;;  %v4411_v56 = vadd.f32 %v2150_v58, %v4930_v27  ;;  %v4931_v16 = vld [vmem:[#allocation14_spill] sm:$0xff]  ;;  %v4932_v23 = vld [vmem:[#allocation65_spill] sm:$0xff]  ;;  %v2213_v15 = vmul.f32 %v2173_v13, %v2173_v13 }
 0x2a5   :  { %v4402_v29 = vadd.f32 %v2147_v25, %v4927_v35  ;;  %v4928_v4 = vld [vmem:[#allocation68_spill] sm:$0xff]  ;;  %v4414_v51 = vadd.f32 %v2151_v33, %v4931_v16  ;;  %v4417_v49 = vadd.f32 %v2152_v21, %v4932_v23  ;;  %v4936_v60 = vld [vmem:[#allocation69_spill] sm:$0xff]  ;;  %v4938_v40 = vld [vmem:[#allocation71_spill] sm:$0xff]  ;;  %v2214_v27 = vmul.f32 %v2174_v43, %v2174_v43 }
 0x2a6   :  { %v4405_v44 = vadd.f32 %v2148_v22, %v4928_v4  ;;  %v4933_v53 = vld [vmem:[#allocation60_spill] sm:$0xff]  ;;  %v4935_v22 = vld [vmem:[#allocation49_spill] sm:$0xff]  ;;  %v4429_v57 = vadd.f32 %v2156_v42, %v4936_v60  ;;  %v4435_v24 = vadd.f32 %v2158_v3, %v4938_v40  ;;  %v4940_v14 = vld [vmem:[#allocation50_spill] sm:$0xff]  ;;  %v4473_v4 = vmul.f32 %v4373_v8, %v4373_v8 }
 0x2a7   :  { %v4420_v32 = vadd.f32 %v2153_v39, %v4933_v53  ;;  %v4426_v30 = vadd.f32 %v2155_v7, %v4935_v22  ;;  %v4937_v25 = vld [vmem:[#allocation64_spill] sm:$0xff]  ;;  %v4441_v50 = vadd.f32 %v2160_v12, %v4940_v14  ;;  %v4941_v38 = vld [vmem:[#allocation26_spill] sm:$0xff]  ;;  %v4943_v58 = vld [vmem:[#allocation55_spill] sm:$0xff]  ;;  %v2215_v16 = vmul.f32 %v2175_v26, %v2175_v26 }
 0x2a8   :  { %v4432_v31 = vadd.f32 %v2157_v52, %v4937_v25  ;;  %v4939_v41 = vld [vmem:[#allocation72_spill] sm:$0xff]  ;;  %v4444_v0 = vadd.f32 %v2161_v62, %v4941_v38  ;;  %v4450_v33 = vadd.f32 %v2163_v59, %v4943_v58  ;;  %v4945_v3 = vld [vmem:[#allocation34_spill] sm:$0xff]  ;;  %v4946_v5 = vld [vmem:[#allocation67_spill] sm:$0xff]  ;;  %v2216_v23 = vmul.f32 %v2176_v6, %v2176_v6 }
 0x2a9   :  { %v4438_v2 = vadd.f32 %v2159_v20, %v4939_v41  ;;  %v4942_v48 = vld [vmem:[#allocation20_spill] sm:$0xff]  ;;  %v2205_v39 = vmul.f32 %v4945_v3, %v4945_v3  ;;  %v2206_v7 = vmul.f32 %v4946_v5, %v4946_v5  ;;  %v4947_v42 = vld [vmem:[#allocation37_spill] sm:$0xff]  ;;  %v2217_v53 = vmul.f32 %v2177_v34, %v2177_v34 }
 0x2aa   :  { %v4447_v10 = vadd.f32 %v2162_v11, %v4942_v48  ;;  %v4944_v52 = vld [vmem:[#allocation56_spill] sm:$0xff]  ;;  %v2207_v20 = vmul.f32 %v4947_v42, %v4947_v42  ;;  %v4949_v11 = vld [vmem:[#allocation21_spill] sm:$0xff]  ;;  %v2219_v22 = vmul.f32 %v2179_v37, %v2179_v37  ;;  %v4475_v60 = vmul.f32 %v2180_v61, %v2180_v61 }
 0x2ab   :  { %v4453_v21 = vadd.f32 %v2164_v19, %v4944_v52  ;;  %v4948_v12 = vld [vmem:[#allocation44_spill] sm:$0xff]  ;;  %v2209_v46 = vmul.f32 %v4949_v11, %v4949_v11  ;;  %v4469_v19 = vmul.f32 %v4370_v47, %v4370_v47  ;;  %v4478_v25 = vmul.f32 %v2173_v13, %v4945_v3 }
 0x2ac   :  { %v2208_v62 = vmul.f32 %v4948_v12, %v4948_v12  ;;  %v4950_v59 = vld [vmem:[#allocation28_spill] sm:$0xff]  ;;  %v4481_v40 = vmul.f32 %v2174_v43, %v4946_v5  ;;  %v4484_v41 = vmul.f32 %v2175_v26, %v4947_v42  ;;  %v4487_v14 = vmul.f32 %v2176_v6, %v4948_v12 }
 0x2ad   :  { %v2210_v35 = vmul.f32 %v4950_v59, %v4950_v59  ;;  %v4490_v38 = vmul.f32 %v2177_v34, %v4949_v11  ;;  %v4493_v48 = vmul.f32 %v2178_v17, %v4950_v59  ;;  %v4496_v58 = vmul.f32 %v2179_v37, %v4370_v47 }
 0x2ae   :  { %v4499_v13 = vmul.f32 %v2180_v61, %v4373_v8  ;;  %v2229_v43 = vsub.f32 %v4384_v28, %v2205_v39  ;;  %v2230_v26 = vsub.f32 %v4387_v9, %v2206_v7  ;;  %v2231_v52 = vsub.f32 %v4390_v63, %v2207_v20 }
 0x2af   :  { %v2232_v6 = vsub.f32 %v4393_v55, %v2208_v62  ;;  %v2233_v34 = vsub.f32 %v4396_v54, %v2209_v46  ;;  %v2234_v3 = vsub.f32 %v4399_v36, %v2210_v35  ;;  %v2235_v17 = vsub.f32 %v4402_v29, %v4469_v19 }
 0x2b0   :  { %v2236_v47 = vsub.f32 %v4405_v44, %v4473_v4  ;;  %v2237_v8 = vsub.f32 %v4408_v1, %v2213_v15  ;;  %v2238_v37 = vsub.f32 %v4411_v56, %v2214_v27  ;;  %v2239_v61 = vsub.f32 %v4414_v51, %v2215_v16 }
 0x2b1   :  { %v2240_v28 = vsub.f32 %v4417_v49, %v2216_v23  ;;  %v2241_v9 = vsub.f32 %v4420_v32, %v2217_v53  ;;  %v2242_v63 = vsub.f32 %v4423_v45, %v2218_v18  ;;  %v2243_v55 = vsub.f32 %v4426_v30, %v2219_v22 }
 0x2b2   :  { %v2244_v54 = vsub.f32 %v4429_v57, %v4475_v60  ;;  %v2245_v36 = vsub.f32 %v4432_v31, %v4478_v25  ;;  %v2246_v29 = vsub.f32 %v4435_v24, %v4481_v40  ;;  %v2247_v44 = vsub.f32 %v4438_v2, %v4484_v41 }
 0x2b3   :  { %v2293_v1 = vadd.f32 %v2213_v15, %v2205_v39  ;;  %v2248_v56 = vsub.f32 %v4441_v50, %v4487_v14  ;;  %v2249_v51 = vsub.f32 %v4444_v0, %v4490_v38  ;;  %v2294_v49 = vadd.f32 %v2214_v27, %v2206_v7 }
 0x2b4   :  { %v2295_v32 = vadd.f32 %v2215_v16, %v2207_v20  ;;  %v2250_v45 = vsub.f32 %v4447_v10, %v4493_v48  ;;  %v2251_v30 = vsub.f32 %v4450_v33, %v4496_v58  ;;  %v2309_v31 = vadd.f32 %v2237_v8, %v2229_v43 }
 0x2b5   :  { %v2253_v24 = vmul.f32 2.0, %v4478_v25  ;;  %v2254_v2 = vmul.f32 2.0, %v4481_v40  ;;  %v2296_v50 = vadd.f32 %v2216_v23, %v2208_v62  ;;  %v2310_v39 = vadd.f32 %v2238_v37, %v2230_v26 }
 0x2b6   :  { %v2297_v5 = vadd.f32 %v2217_v53, %v2209_v46  ;;  %v2301_v0 = vadd.f32 0.0001, %v2293_v1  ;;  %v2311_v7 = vadd.f32 %v2239_v61, %v2231_v52  ;;  %v2312_v42 = vadd.f32 %v2240_v28, %v2232_v6 }
 0x2b7   :  { %v2302_v20 = vadd.f32 0.0001, %v2294_v49  ;;  %v2303_v12 = vadd.f32 0.0001, %v2295_v32  ;;  %v2313_v10 = vadd.f32 %v2241_v9, %v2233_v34  ;;  %v2314_v11 = vadd.f32 %v2242_v63, %v2234_v3 }
 0x2b8   :  { %v2298_v59 = vadd.f32 %v2218_v18, %v2210_v35  ;;  %v2317_v15 = vadd.f32 0.0009, %v2309_v31  ;;  %v2318_v27 = vadd.f32 0.0009, %v2310_v39  ;;  %v2319_v16 = vadd.f32 0.0009, %v2311_v7 }
 0x2b9   :  { %v2304_v57 = vadd.f32 0.0001, %v2296_v50  ;;  %v2315_v43 = vadd.f32 %v2243_v55, %v2235_v17  ;;  %v2320_v8 = vadd.f32 0.0009, %v2312_v42  ;;  %v2321_v25 = vadd.f32 0.0009, %v2313_v10 }
 0x2ba   :  { %v2299_v40 = vadd.f32 %v2219_v22, %v4469_v19  ;;  %v2305_v62 = vadd.f32 0.0001, %v2297_v5  ;;  %v2325_v23 = vmul.f32 %v2317_v15, %v2301_v0  ;;  %v2326_v46 = vmul.f32 %v2318_v27, %v2302_v20 }
 0x2bb   :  { %v2316_v53 = vadd.f32 %v2244_v54, %v2236_v47  ;;  %v2322_v26 = vadd.f32 0.0009, %v2314_v11  ;;  %v2327_v52 = vmul.f32 %v2319_v16, %v2303_v12  ;;  %v2328_v6 = vmul.f32 %v2320_v8, %v2304_v57 }
 0x2bc   :  { %v2255_v34 = vmul.f32 2.0, %v4484_v41  ;;  %v2269_v3 = vmul.f32 2.0, %v2245_v36  ;;  %v2300_v35 = vadd.f32 %v4475_v60, %v4473_v4  ;;  %2693 = vrcp.f32 %v2325_v23 }
 0x2bd   :  { %v2306_v18 = vadd.f32 0.0001, %v2298_v59  ;;  %v2323_v17 = vadd.f32 0.0009, %v2315_v43  ;;  %v2329_v37 = vmul.f32 %v2321_v25, %v2305_v62  ;;  %2695 = vrcp.f32 %v2326_v46 }
 0x2be   :  { %v2256_v19 = vmul.f32 2.0, %v4487_v14  ;;  %v2270_v22 = vmul.f32 2.0, %v2246_v29  ;;  %v2271_v61 = vmul.f32 2.0, %v2247_v44  ;;  %2697 = vrcp.f32 %v2327_v52 }
 0x2bf   :  { %v2307_v47 = vadd.f32 0.0001, %v2299_v40  ;;  %v2324_v28 = vadd.f32 0.0009, %v2316_v53  ;;  %v2330_v9 = vmul.f32 %v2322_v26, %v2306_v18  ;;  %2699 = vrcp.f32 %v2328_v6 }
 0x2c0   :  { %v2257_v41 = vmul.f32 2.0, %v4490_v38  ;;  %v2258_v63 = vmul.f32 2.0, %v4493_v48  ;;  %v2272_v55 = vmul.f32 2.0, %v2248_v56  ;;  %v2273_v4 = vmul.f32 2.0, %v2249_v51 }
 0x2c1   :  { %v2277_v60 = vadd.f32 0.0009, %v2269_v3  ;;  %v2308_v54 = vadd.f32 0.0001, %v2300_v35  ;;  %v2331_v36 = vmul.f32 %v2323_v17, %v2307_v47  ;;  %2701 = vrcp.f32 %v2329_v37 }
 0x2c2   :  { %v2259_v1 = vmul.f32 2.0, %v4496_v58  ;;  %v2261_v14 = vadd.f32 0.0001, %v2253_v24  ;;  %v2274_v29 = vmul.f32 2.0, %v2250_v45  ;;  %v2278_v44 = vadd.f32 0.0009, %v2270_v22 }
 0x2c3   :  { %v2262_v49 = vadd.f32 0.0001, %v2254_v2  ;;  %v2279_v32 = vadd.f32 0.0009, %v2271_v61  ;;  %v2332_v57 = vmul.f32 %v2324_v28, %v2308_v54  ;;  %2703 = vrcp.f32 %v2330_v9 }
 0x2c4   :  { %v2260_v31 = vmul.f32 2.0, %v4499_v13  ;;  %v2275_v38 = vmul.f32 2.0, %v2251_v30  ;;  %v2280_v48 = vadd.f32 0.0009, %v2272_v55  ;;  %v2281_v56 = vadd.f32 0.0009, %v2273_v4 }
 0x2c5   :  { %v2263_v51 = vadd.f32 0.0001, %v2255_v34  ;;  %v4951_v50 = vsub.f32 %v4453_v21, %v4499_v13  ;;  %v2285_v24 = vmul.f32 %v2277_v60, %v2261_v14  ;;  %2705 = vrcp.f32 %v2331_v36 }
 0x2c6   :  { %v2694_v45 = vpop.eup %2693  ;;  %v2264_v2 = vadd.f32 0.0001, %v2256_v19  ;;  %v2265_v5 = vadd.f32 0.0001, %v2257_v41  ;;  %v2282_v0 = vadd.f32 0.0009, %v2274_v29  ;;  %v2286_v7 = vmul.f32 %v2278_v44, %v2262_v49 }
 0x2c7   :  { %v2276_v39 = vmul.f32 2.0, %v4951_v50  ;;  %v2696_v42 = vpop.eup %2695  ;;  %v2266_v20 = vadd.f32 0.0001, %v2258_v63  ;;  %v2287_v12 = vmul.f32 %v2279_v32, %v2263_v51  ;;  %2707 = vrcp.f32 %v2332_v57 }
 0x2c8   :  { %v2341_v33 = vmul.f32 %v2694_v45, %v2285_v24  ;;  %v2698_v58 = vpop.eup %2697  ;;  %v2283_v30 = vadd.f32 0.0009, %v2275_v38  ;;  %v2288_v10 = vmul.f32 %v2280_v48, %v2264_v2  ;;  %v2289_v11 = vmul.f32 %v2281_v56, %v2265_v5 }
 0x2c9   :  { %v2342_v59 = vmul.f32 %v2696_v42, %v2286_v7  ;;  %v2700_v15 = vpop.eup %2699  ;;  %v2267_v21 = vadd.f32 0.0001, %v2259_v1  ;;  %v2284_v13 = vadd.f32 0.0009, %v2276_v39  ;;  %v2343_v27 = vmul.f32 %v2698_v58, %v2287_v12 }
 0x2ca   :  { %v2290_v16 = vmul.f32 %v2282_v0, %v2266_v20  ;;  %v2344_v43 = vmul.f32 %v2700_v15, %v2288_v10  ;;  %v2350_v8 = vsel %vm2349_vm2, %v2341_v33, 0.0  ;;  %v2268_v46 = vadd.f32 0.0001, %v2260_v31 }
 0x2cb   :  { %v2351_v25 = vsel %vm2349_vm2, %v2342_v59, 0.0  ;;  %v2702_v40 = vpop.eup %2701  ;;  %v2353_v23 = vsel %vm2349_vm2, %v2343_v27, 0.0  ;;  %v2291_v53 = vmul.f32 %v2283_v30, %v2267_v21 }
 0x2cc   :  { %v2352_v62 = vadd.f32 %v2351_v25, %v2350_v8  ;;  %v2345_v26 = vmul.f32 %v2702_v40, %v2289_v11  ;;  %v2355_v52 = vsel %vm2349_vm2, %v2344_v43, 0.0  ;;  %v2292_v3 = vmul.f32 %v2284_v13, %v2268_v46 }
 0x2cd   :  { %v2704_v6 = vpop.eup %2703 }
 0x2ce   :  { %v2354_v34 = vadd.f32 %v2353_v23, %v2352_v62  ;;  %v2346_v35 = vmul.f32 %v2704_v6, %v2290_v16  ;;  %v2357_v19 = vsel %vm2349_vm2, %v2345_v26, 0.0 }
 0x2cf   :  { %v2706_v18 = vpop.eup %2705 }
 0x2d0   :  { %v2356_v17 = vadd.f32 %v2355_v52, %v2354_v34  ;;  %v2347_v37 = vmul.f32 %v2706_v18, %v2291_v53  ;;  %v2359_v28 = vsel %vm2349_vm2, %v2346_v35, 0.0 }
 0x2d1   :  { %v2708_v22 = vpop.eup %2707 }
 0x2d2   :  { %v2358_v61 = vadd.f32 %v2357_v19, %v2356_v17  ;;  %v2348_v47 = vmul.f32 %v2708_v22, %v2292_v3  ;;  %v2361_v41 = vsel %vm2349_vm2, %v2347_v37, 0.0 }
 0x2d4   :  { %v2360_v9 = vadd.f32 %v2359_v28, %v2358_v61  ;;  %v2363_v55 = vsel %vm2349_vm2, %v2348_v47, 0.0 }
 0x2d6   :  { %v2362_v63 = vadd.f32 %v2361_v41, %v2360_v9 }
 0x2d8   :  { %v2364_v4 = vadd.f32 %v2363_v55, %v2362_v63 }
 0x2da   :  { %2365 = vadd.xlane.f32.xlu0 %v2364_v4 }
 0x367   :  { %v2366_v60 = vpop.xlane.xlu0 %2365 }
 0x368   :  { %v2367_v54 = vrot.slane %v2366_v60, 4 }
 0x36a   :  { %v2368_v36 = vadd.f32 %v2367_v54, %v2366_v60 }
 0x36c   :  { %v2369_v1 = vrot.slane %v2368_v36, 2 }
 0x36e   :  { %v2370_v14 = vadd.f32 %v2369_v1, %v2368_v36 }
 0x370   :  { %v2371_v29 = vrot.slane %v2370_v14, 1 }
 0x372   :  { %v2372_v44 = vadd.f32 %v2371_v29, %v2370_v14 }
 0x374   :  { %2685 = vpush %v2372_v44 }
 0x3a5   :  { %s2686_s22 = spop %2685 }
 0x3a6   :  { %v2374_v49 = vstv %s2686_s22 }
 0x3a7   :  { %2376 = vst [vmem:[#allocation9] sm:$0x1] %v2374_v49 }
 0x3a8   :  { %2786 = shalt.err (!%p2783_p0)
}
 0x3a9   :  { %s2787_s27 = scalar_lea.hbm %s4576_s3, 16 }
 0x3aa   :  { %p2788_p1 = scmp.ne.s32.totalorder %s4576_s3, %s2787_s27  ;;  %p2791_p2 = scmp.lt.u32.totalorder %s2787_s27, %s4576_s3 }
 0x3ac   :  { %p2793_p3 = pnand %p2791_p2, %p2788_p1 }
 0x3ae   :  { %2796 = shalt.err (!%p2793_p3)
}
 0x3af   :  { %2386 = dma.vmem_to_hbm [thread:$0]  %s2384_s21, 16, %s4576_s3, [#allocation5]  }
 0x3b0   :  { %2801 = dma.done.wait [#allocation5], 16  }
 0x3b1   :  { %2802 = vsyncadd [#allocation5], 4294967280 }
 0x3b2   :  { %2390 = vsyncpa [#allocation4], 1 }
 0x3b3   :  { %2391 = vsyncpa [#allocation7], 1 }
 0x3b4   :  { %2392 = vsyncpa [#allocation5], 1 }

</bundles_post_ra>
